<compile_context>
chip_gen: v7x
topology: tpu7x:2x2x1
jax: 0.10.0
libtpu: 0.0.40
codegen_flags: <defaults>
</compile_context>

<pallas_src>
import functools

import jax
import jax.numpy as jnp
from jax import lax
from jax.experimental import pallas as pl
from jax.experimental.pallas import tpu as pltpu


def _wn_kernel(x_ref, y_ref, ws_ref, bs_ref, wv_ref, bv_ref, wo_ref, bo_ref,
               we_ref, be_ref, outa_ref, outb_ref, xy_buf, skip_acc,
               *, dilations, radix, dil_ch, res_ch, skip_ch, left_pad, T):
    # x_ref  : (1, Cin_in, T)            input in NCT layout (one batch element)
    # y_ref  : (1, A, T)                 aux features
    # ws_ref : (R, Cin_in)   bs_ref: (R, 1)            start 1x1 conv
    # wv_ref : (depth, radix, 2D, R+A)   bv_ref: (depth, 2D, 1)   dilated convs (per tap)
    # wo_ref : (depth, R+S, D)           bo_ref: (depth, R+S, 1)  1x1 convs (last layer padded)
    # we_ref : (2*Cin_in, S) be_ref: (2*Cin_in, 1)      end 1x1 conv
    # outa/outb : (1, Cin_in, T)         end(cum_skip).chunk(2, 1)
    # xy_buf : VMEM (R+A, left_pad + T + right_pad)  f32, concat(x, y) with zero halos
    # skip_acc: VMEM (S, T) f32
    D, R, S = dil_ch, res_ch, skip_ch
    depth = len(dilations)
    in_ch = x_ref.shape[1]
    aux_ch = y_ref.shape[1]

    # Zero scratch: the halo columns of xy_buf implement the conv's zero padding.
    xy_buf[...] = jnp.zeros_like(xy_buf)
    skip_acc[...] = jnp.zeros_like(skip_acc)

    # start: 1x1 conv as (R, Cin_in) @ (Cin_in, T) -> write into the residual rows of xy_buf.
    x0 = jnp.dot(ws_ref[...], x_ref[0].astype(jnp.float32),
                 preferred_element_type=jnp.float32) + bs_ref[...]
    xy_buf[0:R, left_pad:left_pad + T] = x0
    xy_buf[R:R + aux_ch, left_pad:left_pad + T] = y_ref[0].astype(jnp.float32)

    # Residual stack (statically unrolled: depth and dilations are compile-time constants).
    for l, d in enumerate(dilations):
        p = d * (radix - 1) // 2
        acc = jnp.zeros((2 * D, T), jnp.float32)
        for r in range(radix):                      # dilated conv = sum of shifted matmuls
            start = left_pad - p + r * d            # static lane offset into the halo buffer
            xs = xy_buf[:, start:start + T]         # (R+A, T)
            acc = acc + jnp.dot(wv_ref[l, r], xs,
                                preferred_element_type=jnp.float32)
        acc = acc + bv_ref[l]                       # (2D, 1) broadcast over T

        # torch.chunk(2, 1): first D channels -> zw, last D -> zf (free sublane split).
        z = jnp.tanh(acc[:D]) * jax.nn.sigmoid(acc[D:])          # (D, T)

        # 1x1 conv: (R+S, D) @ (D, T). For the last layer the residual rows are zero-padded.
        out = jnp.dot(wo_ref[l], z, preferred_element_type=jnp.float32) + bo_ref[l]

        if l < depth - 1:                           # residual update (skipped on last layer)
            xy_buf[0:R, left_pad:left_pad + T] = (
                xy_buf[0:R, left_pad:left_pad + T] + out[:R])
        skip_acc[...] = skip_acc[...] + out[R:]     # cum_skip += skip

    # end: 1x1 conv on the accumulated skip, then chunk(2, 1) along channels.
    end = jnp.dot(we_ref[...], skip_acc[...],
                  preferred_element_type=jnp.float32) + be_ref[...]   # (2*Cin_in, T)
    outa_ref[0] = end[:in_ch].astype(outa_ref.dtype)
    outb_ref[0] = end[in_ch:].astype(outb_ref.dtype)


def wn_forward(x, y, ws_w, ws_b, wv_ws, wv_bs, wo_ws, wo_bs, we_w, we_b,
               *, dilations, radix, dilation_channels, residual_channels,
               skip_channels):
    """Forward pass of WN. All tensors in PyTorch layouts.

    x: (B, in_channels, T)   y: (B, aux_channels, T)
    ws_w: (R, in_channels, 1)           ws_b: (R,)
    wv_ws[l]: (2D, R+A, radix)          wv_bs[l]: (2D,)
    wo_ws[l]: (R+S, D, 1) for l<depth-1, (S, D, 1) for the last layer; wo_bs likewise
    we_w: (2*in_channels, S, 1)         we_b: (2*in_channels,)
    Returns the two chunks of end(cum_skip): each (B, in_channels, T).
    """
    B, in_ch, T = x.shape
    A = y.shape[1]
    D, R, S = dilation_channels, residual_channels, skip_channels
    Cin2 = R + A
    depth = len(dilations)

    pads = [d * (radix - 1) // 2 for d in dilations]
    left_pad = max(pads)
    right_pad = max((radix - 1) * d - p for d, p in zip(dilations, pads))
    T2 = left_pad + T + right_pad

    # --- weight packing (tiny, one-time; no activation layout ops anywhere) ---
    ws = ws_w[:, :, 0]                                            # (R, Cin_in)
    bs = ws_b.reshape(R, 1)
    wv_all = jnp.stack([jnp.transpose(w, (2, 0, 1)) for w in wv_ws])   # (depth, radix, 2D, Cin2)
    bv_all = jnp.stack(wv_bs).reshape(depth, 2 * D, 1)
    wo_list, bo_list = [], []
    for l in range(depth):
        w = wo_ws[l][:, :, 0]
        b = wo_bs[l]
        if l == depth - 1:   # last layer emits skip only -> pad residual rows with zeros
            w = jnp.concatenate([jnp.zeros((R, D), w.dtype), w], axis=0)
            b = jnp.concatenate([jnp.zeros((R,), b.dtype), b], axis=0)
        wo_list.append(w)
        bo_list.append(b)
    wo_all = jnp.stack(wo_list)                                   # (depth, R+S, D)
    bo_all = jnp.stack(bo_list).reshape(depth, R + S, 1)
    we = we_w[:, :, 0]                                            # (2*Cin_in, S)
    be = we_b.reshape(2 * in_ch, 1)

    kernel = functools.partial(
        _wn_kernel, dilations=tuple(dilations), radix=radix,
        dil_ch=D, res_ch=R, skip_ch=S, left_pad=left_pad, T=T)

    flops = 2 * B * T * (in_ch * R
                         + depth * radix * Cin2 * 2 * D
                         + depth * D * (R + S)
                         + S * 2 * in_ch)
    transcendentals = 2 * B * T * D * depth
    bytes_accessed = 4 * (B * T * (in_ch + A + 2 * in_ch)
                          + depth * (radix * Cin2 * 2 * D + (R + S) * D)
                          + R * in_ch + 2 * in_ch * S)

    outa, outb = pl.pallas_call(
        kernel,
        out_shape=(jax.ShapeDtypeStruct((B, in_ch, T), x.dtype),
                   jax.ShapeDtypeStruct((B, in_ch, T), x.dtype)),
        grid=(B,),
        in_specs=[
            pl.BlockSpec((1, in_ch, T), lambda b: (b, 0, 0)),
            pl.BlockSpec((1, A, T), lambda b: (b, 0, 0)),
            pl.BlockSpec((R, in_ch), lambda b: (0, 0)),
            pl.BlockSpec((R, 1), lambda b: (0, 0)),
            pl.BlockSpec((depth, radix, 2 * D, Cin2), lambda b: (0, 0, 0, 0)),
            pl.BlockSpec((depth, 2 * D, 1), lambda b: (0, 0, 0)),
            pl.BlockSpec((depth, R + S, D), lambda b: (0, 0, 0)),
            pl.BlockSpec((depth, R + S, 1), lambda b: (0, 0, 0)),
            pl.BlockSpec((2 * in_ch, S), lambda b: (0, 0)),
            pl.BlockSpec((2 * in_ch, 1), lambda b: (0, 0)),
        ],
        out_specs=(
            pl.BlockSpec((1, in_ch, T), lambda b: (b, 0, 0)),
            pl.BlockSpec((1, in_ch, T), lambda b: (b, 0, 0)),
        ),
        scratch_shapes=[
            pltpu.VMEM((Cin2, T2), jnp.float32),   # concat(x, y) + zero halos, persistent x
            pltpu.VMEM((S, T), jnp.float32),       # cum_skip accumulator
        ],
        compiler_params=pltpu.CompilerParams(
            dimension_semantics=("parallel",)),
        cost_estimate=pl.CostEstimate(
            flops=flops, transcendentals=transcendentals,
            bytes_accessed=bytes_accessed),
    )(x, y, ws, bs, wv_all, bv_all, wo_all, bo_all, we, be)
    return outa, outb


# ----------------------------- pure-JAX reference -----------------------------

def _conv1x1(x, w, b):
    out = lax.conv_general_dilated(x, w, (1,), [(0, 0)],
                                   dimension_numbers=("NCH", "OIH", "NCH"))
    return out + b[None, :, None]


def wn_reference(x, y, ws_w, ws_b, wv_ws, wv_bs, wo_ws, wo_bs, we_w, we_b,
                 *, dilations, radix, residual_channels):
    R = residual_channels
    depth = len(dilations)
    x = _conv1x1(x, ws_w, ws_b)
    cum_skip = None
    for l, d in enumerate(dilations):
        pad = d * (radix - 1) // 2
        xy = jnp.concatenate([x, y], axis=1)
        out = lax.conv_general_dilated(
            xy, wv_ws[l], (1,), [(pad, pad)], rhs_dilation=(d,),
            dimension_numbers=("NCH", "OIH", "NCH"))
        out = out + wv_bs[l][None, :, None]
        zw, zf = jnp.split(out, 2, axis=1)
        z = jnp.tanh(zw) * jax.nn.sigmoid(zf)
        o2 = _conv1x1(z, wo_ws[l], wo_bs[l])
        if l < depth - 1:
            x = x + o2[:, :R]
            skip = o2[:, R:]
        else:
            skip = o2
        cum_skip = skip if cum_skip is None else cum_skip + skip
    end = _conv1x1(cum_skip, we_w, we_b)
    c = end.shape[1] // 2
    return end[:, :c], end[:, c:]


if __name__ == "__main__":
    # Small shapes consistent with the module (WN with bias=True, non-zero end weights so the
    # numerical check is meaningful; zero_init only affects initialization, not semantics).
    in_channels = 8
    aux_channels = 16
    dilation_channels = 32
    residual_channels = 32
    skip_channels = 32
    depth = 4
    radix = 3
    B, T = 2, 256
    dilations = [2 ** i for i in range(depth)]
    Cin2 = residual_channels + aux_channels

    key = jax.random.PRNGKey(0)
    keys = jax.random.split(key, 8 + 4 * depth)
    ki = iter(keys)

    x = jax.random.normal(next(ki), (B, in_channels, T), jnp.float32)
    y = jax.random.normal(next(ki), (B, aux_channels, T), jnp.float32)

    ws_w = 0.1 * jax.random.normal(next(ki), (residual_channels, in_channels, 1), jnp.float32)
    ws_b = 0.1 * jax.random.normal(next(ki), (residual_channels,), jnp.float32)

    wv_ws, wv_bs, wo_ws, wo_bs = [], [], [], []
    for l in range(depth):
        wv_ws.append(0.1 * jax.random.normal(
            next(ki), (2 * dilation_channels, Cin2, radix), jnp.float32))
        wv_bs.append(0.1 * jax.random.normal(
            next(ki), (2 * dilation_channels,), jnp.float32))
        out_ch = (residual_channels + skip_channels) if l < depth - 1 else skip_channels
        wo_ws.append(0.1 * jax.random.normal(
            next(ki), (out_ch, dilation_channels, 1), jnp.float32))
        wo_bs.append(0.1 * jax.random.normal(next(ki), (out_ch,), jnp.float32))

    we_w = 0.1 * jax.random.normal(next(ki), (2 * in_channels, skip_channels, 1), jnp.float32)
    we_b = 0.1 * jax.random.normal(next(ki), (2 * in_channels,), jnp.float32)

    out_a, out_b = wn_forward(
        x, y, ws_w, ws_b, wv_ws, wv_bs, wo_ws, wo_bs, we_w, we_b,
        dilations=dilations, radix=radix,
        dilation_channels=dilation_channels,
        residual_channels=residual_channels,
        skip_channels=skip_channels)
    jax.block_until_ready((out_a, out_b))

    ref_a, ref_b = wn_reference(
        x, y, ws_w, ws_b, wv_ws, wv_bs, wo_ws, wo_bs, we_w, we_b,
        dilations=dilations, radix=radix, residual_channels=residual_channels)

    assert jnp.allclose(out_a, ref_a, atol=2e-4, rtol=2e-4), "chunk-0 mismatch"
    assert jnp.allclose(out_b, ref_b, atol=2e-4, rtol=2e-4), "chunk-1 mismatch"
    print("KERNEL_OK")
</pallas_src>

<mosaic_0001>
module attributes {stable_mosaic.version = 11 : i64} {
  func.func @_wn_kernel(%arg0: i32, %arg1: memref<1x8x256xf32, #tpu.memory_space<vmem>>, %arg2: memref<1x16x256xf32, #tpu.memory_space<vmem>>, %arg3: memref<32x8xf32, #tpu.memory_space<vmem>>, %arg4: memref<32x1xf32, #tpu.memory_space<vmem>>, %arg5: memref<4x3x64x48xf32, #tpu.memory_space<vmem>>, %arg6: memref<4x64x1xf32, #tpu.memory_space<vmem>>, %arg7: memref<4x64x32xf32, #tpu.memory_space<vmem>>, %arg8: memref<4x64x1xf32, #tpu.memory_space<vmem>>, %arg9: memref<16x32xf32, #tpu.memory_space<vmem>>, %arg10: memref<16x1xf32, #tpu.memory_space<vmem>>, %arg11: memref<1x8x256xf32, #tpu.memory_space<vmem>>, %arg12: memref<1x8x256xf32, #tpu.memory_space<vmem>>, %arg13: memref<48x272xf32, #tpu.memory_space<vmem>>, %arg14: memref<32x256xf32, #tpu.memory_space<vmem>>) attributes {dimension_semantics = [#tpu.dimension_semantics<parallel>], iteration_bounds = array<i64: 2>, scalar_prefetch = 0 : i64, scratch_operands = 2 : i64, tpu.core_type = #tpu.core_type<tc>, window_params = [{transform_indices = @transform_0, window_bounds = array<i64: 1, 8, 256>}, {transform_indices = @transform_1, window_bounds = array<i64: 1, 16, 256>}, {pipeline_mode = #tpu.pipeline_mode<synchronous>, transform_indices = @transform_2, window_bounds = array<i64: 32, 8>}, {pipeline_mode = #tpu.pipeline_mode<synchronous>, transform_indices = @transform_3, window_bounds = array<i64: 32, 1>}, {pipeline_mode = #tpu.pipeline_mode<synchronous>, transform_indices = @transform_4, window_bounds = array<i64: 4, 3, 64, 48>}, {pipeline_mode = #tpu.pipeline_mode<synchronous>, transform_indices = @transform_5, window_bounds = array<i64: 4, 64, 1>}, {pipeline_mode = #tpu.pipeline_mode<synchronous>, transform_indices = @transform_6, window_bounds = array<i64: 4, 64, 32>}, {pipeline_mode = #tpu.pipeline_mode<synchronous>, transform_indices = @transform_7, window_bounds = array<i64: 4, 64, 1>}, {pipeline_mode = #tpu.pipeline_mode<synchronous>, transform_indices = @transform_8, window_bounds = array<i64: 16, 32>}, {pipeline_mode = #tpu.pipeline_mode<synchronous>, transform_indices = @transform_9, window_bounds = array<i64: 16, 1>}, {transform_indices = @transform_10, window_bounds = array<i64: 1, 8, 256>}, {transform_indices = @transform_11, window_bounds = array<i64: 1, 8, 256>}]} {
    %cst = arith.constant 0.000000e+00 : f32
    %0 = vector.broadcast %cst : f32 to vector<48x272xf32>
    %c0 = arith.constant 0 : index
    %c0_0 = arith.constant 0 : index
    %1 = vector.load %arg13[%c0, %c0_0] : memref<48x272xf32, #tpu.memory_space<vmem>>, vector<48x272xf32>
    tpu.vector_store %arg13[%c0, %c0_0], %0 {strides = array<i32>} : memref<48x272xf32, #tpu.memory_space<vmem>>, vector<48x272xf32>,
    %cst_1 = arith.constant 0.000000e+00 : f32
    %2 = vector.broadcast %cst_1 : f32 to vector<32x256xf32>
    %c0_2 = arith.constant 0 : index
    %c0_3 = arith.constant 0 : index
    %3 = vector.load %arg14[%c0_2, %c0_3] : memref<32x256xf32, #tpu.memory_space<vmem>>, vector<32x256xf32>
    tpu.vector_store %arg14[%c0_2, %c0_3], %2 {strides = array<i32>} : memref<32x256xf32, #tpu.memory_space<vmem>>, vector<32x256xf32>,
    %c0_4 = arith.constant 0 : index
    %c0_5 = arith.constant 0 : index
    %4 = vector.load %arg3[%c0_4, %c0_5] : memref<32x8xf32, #tpu.memory_space<vmem>>, vector<32x8xf32>
    %c0_6 = arith.constant 0 : index
    %c0_7 = arith.constant 0 : index
    %c0_8 = arith.constant 0 : index
    %5 = vector.load %arg1[%c0_6, %c0_7, %c0_8] : memref<1x8x256xf32, #tpu.memory_space<vmem>>, vector<1x8x256xf32>
    %6 = vector.shape_cast %5 : vector<1x8x256xf32> to vector<8x256xf32>
    %cst_9 = arith.constant dense<0.000000e+00> : vector<32x256xf32>
    %7 = tpu.matmul %4, %6, %cst_9 {dimension_numbers = #tpu.dot_dimension_numbers<[1], [0], [0], [1], [0, 0, 1, 1], [], []>} : vector<32x8xf32>, vector<8x256xf32>, vector<32x256xf32> -> vector<32x256xf32>
    %c0_10 = arith.constant 0 : index
    %c0_11 = arith.constant 0 : index
    %8 = vector.load %arg4[%c0_10, %c0_11] : memref<32x1xf32, #tpu.memory_space<vmem>>, vector<32x1xf32>
    %9 = vector.broadcast %8 : vector<32x1xf32> to vector<32x256xf32>
    %10 = arith.addf %7, %9 : vector<32x256xf32>
    %c0_12 = arith.constant 0 : index
    %c8 = arith.constant 8 : index
    %11 = vector.load %arg13[%c0_12, %c8] : memref<48x272xf32, #tpu.memory_space<vmem>>, vector<32x256xf32>
    tpu.vector_store %arg13[%c0_12, %c8], %10 {strides = array<i32>} : memref<48x272xf32, #tpu.memory_space<vmem>>, vector<32x256xf32>,
    %c0_13 = arith.constant 0 : index
    %c0_14 = arith.constant 0 : index
    %c0_15 = arith.constant 0 : index
    %12 = vector.load %arg2[%c0_13, %c0_14, %c0_15] : memref<1x16x256xf32, #tpu.memory_space<vmem>>, vector<1x16x256xf32>
    %13 = vector.shape_cast %12 : vector<1x16x256xf32> to vector<16x256xf32>
    %c32 = arith.constant 32 : index
    %c8_16 = arith.constant 8 : index
    %14 = vector.load %arg13[%c32, %c8_16] : memref<48x272xf32, #tpu.memory_space<vmem>>, vector<16x256xf32>
    tpu.vector_store %arg13[%c32, %c8_16], %13 {strides = array<i32>} : memref<48x272xf32, #tpu.memory_space<vmem>>, vector<16x256xf32>,
    %cst_17 = arith.constant 0.000000e+00 : f32
    %15 = vector.broadcast %cst_17 : f32 to vector<64x256xf32>
    %c0_18 = arith.constant 0 : index
    %c7 = arith.constant 7 : index
    %16 = vector.load %arg13[%c0_18, %c7] : memref<48x272xf32, #tpu.memory_space<vmem>>, vector<48x256xf32>
    %c0_19 = arith.constant 0 : index
    %c0_20 = arith.constant 0 : index
    %c0_21 = arith.constant 0 : index
    %c0_22 = arith.constant 0 : index
    %17 = vector.load %arg5[%c0_19, %c0_20, %c0_21, %c0_22] : memref<4x3x64x48xf32, #tpu.memory_space<vmem>>, vector<1x1x64x48xf32>
    %18 = vector.shape_cast %17 : vector<1x1x64x48xf32> to vector<64x48xf32>
    %cst_23 = arith.constant dense<0.000000e+00> : vector<64x256xf32>
    %19 = tpu.matmul %18, %16, %cst_23 {dimension_numbers = #tpu.dot_dimension_numbers<[1], [0], [0], [1], [0, 0, 1, 1], [], []>} : vector<64x48xf32>, vector<48x256xf32>, vector<64x256xf32> -> vector<64x256xf32>
    %20 = arith.addf %15, %19 : vector<64x256xf32>
    %c0_24 = arith.constant 0 : index
    %c8_25 = arith.constant 8 : index
    %21 = vector.load %arg13[%c0_24, %c8_25] : memref<48x272xf32, #tpu.memory_space<vmem>>, vector<48x256xf32>
    %c0_26 = arith.constant 0 : index
    %c1 = arith.constant 1 : index
    %c0_27 = arith.constant 0 : index
    %c0_28 = arith.constant 0 : index
    %22 = vector.load %arg5[%c0_26, %c1, %c0_27, %c0_28] : memref<4x3x64x48xf32, #tpu.memory_space<vmem>>, vector<1x1x64x48xf32>
    %23 = vector.shape_cast %22 : vector<1x1x64x48xf32> to vector<64x48xf32>
    %cst_29 = arith.constant dense<0.000000e+00> : vector<64x256xf32>
    %24 = tpu.matmul %23, %21, %cst_29 {dimension_numbers = #tpu.dot_dimension_numbers<[1], [0], [0], [1], [0, 0, 1, 1], [], []>} : vector<64x48xf32>, vector<48x256xf32>, vector<64x256xf32> -> vector<64x256xf32>
    %25 = arith.addf %20, %24 : vector<64x256xf32>
    %c0_30 = arith.constant 0 : index
    %c9 = arith.constant 9 : index
    %26 = vector.load %arg13[%c0_30, %c9] : memref<48x272xf32, #tpu.memory_space<vmem>>, vector<48x256xf32>
    %c0_31 = arith.constant 0 : index
    %c2 = arith.constant 2 : index
    %c0_32 = arith.constant 0 : index
    %c0_33 = arith.constant 0 : index
    %27 = vector.load %arg5[%c0_31, %c2, %c0_32, %c0_33] : memref<4x3x64x48xf32, #tpu.memory_space<vmem>>, vector<1x1x64x48xf32>
    %28 = vector.shape_cast %27 : vector<1x1x64x48xf32> to vector<64x48xf32>
    %cst_34 = arith.constant dense<0.000000e+00> : vector<64x256xf32>
    %29 = tpu.matmul %28, %26, %cst_34 {dimension_numbers = #tpu.dot_dimension_numbers<[1], [0], [0], [1], [0, 0, 1, 1], [], []>} : vector<64x48xf32>, vector<48x256xf32>, vector<64x256xf32> -> vector<64x256xf32>
    %30 = arith.addf %25, %29 : vector<64x256xf32>
    %c0_35 = arith.constant 0 : index
    %c0_36 = arith.constant 0 : index
    %c0_37 = arith.constant 0 : index
    %31 = vector.load %arg6[%c0_35, %c0_36, %c0_37] : memref<4x64x1xf32, #tpu.memory_space<vmem>>, vector<1x64x1xf32>
    %32 = vector.shape_cast %31 : vector<1x64x1xf32> to vector<64x1xf32>
    %33 = vector.broadcast %32 : vector<64x1xf32> to vector<64x256xf32>
    %34 = arith.addf %30, %33 : vector<64x256xf32>
    %35 = vector.extract_strided_slice %34 {offsets = [0, 0], sizes = [32, 256], strides = [1, 1]} : vector<64x256xf32> to vector<32x256xf32>
    %36 = math.tanh %35 : vector<32x256xf32>
    %37 = vector.extract_strided_slice %34 {offsets = [32, 0], sizes = [32, 256], strides = [1, 1]} : vector<64x256xf32> to vector<32x256xf32>
    %38 = arith.negf %37 : vector<32x256xf32>
    %39 = math.exp %38 : vector<32x256xf32>
    %cst_38 = arith.constant 1.000000e+00 : f32
    %40 = vector.broadcast %cst_38 : f32 to vector<32x256xf32>
    %41 = arith.addf %40, %39 : vector<32x256xf32>
    %42 = arith.divf %40, %41 : vector<32x256xf32>
    %43 = arith.mulf %36, %42 : vector<32x256xf32>
    %c0_39 = arith.constant 0 : index
    %c0_40 = arith.constant 0 : index
    %c0_41 = arith.constant 0 : index
    %44 = vector.load %arg7[%c0_39, %c0_40, %c0_41] : memref<4x64x32xf32, #tpu.memory_space<vmem>>, vector<1x64x32xf32>
    %45 = vector.shape_cast %44 : vector<1x64x32xf32> to vector<64x32xf32>
    %cst_42 = arith.constant dense<0.000000e+00> : vector<64x256xf32>
    %46 = tpu.matmul %45, %43, %cst_42 {dimension_numbers = #tpu.dot_dimension_numbers<[1], [0], [0], [1], [0, 0, 1, 1], [], []>} : vector<64x32xf32>, vector<32x256xf32>, vector<64x256xf32> -> vector<64x256xf32>
    %c0_43 = arith.constant 0 : index
    %c0_44 = arith.constant 0 : index
    %c0_45 = arith.constant 0 : index
    %47 = vector.load %arg8[%c0_43, %c0_44, %c0_45] : memref<4x64x1xf32, #tpu.memory_space<vmem>>, vector<1x64x1xf32>
    %48 = vector.shape_cast %47 : vector<1x64x1xf32> to vector<64x1xf32>
    %49 = vector.broadcast %48 : vector<64x1xf32> to vector<64x256xf32>
    %50 = arith.addf %46, %49 : vector<64x256xf32>
    %c0_46 = arith.constant 0 : index
    %c8_47 = arith.constant 8 : index
    %51 = vector.load %arg13[%c0_46, %c8_47] : memref<48x272xf32, #tpu.memory_space<vmem>>, vector<32x256xf32>
    %52 = vector.extract_strided_slice %50 {offsets = [0, 0], sizes = [32, 256], strides = [1, 1]} : vector<64x256xf32> to vector<32x256xf32>
    %53 = arith.addf %51, %52 : vector<32x256xf32>
    %c0_48 = arith.constant 0 : index
    %c8_49 = arith.constant 8 : index
    %54 = vector.load %arg13[%c0_48, %c8_49] : memref<48x272xf32, #tpu.memory_space<vmem>>, vector<32x256xf32>
    tpu.vector_store %arg13[%c0_48, %c8_49], %53 {strides = array<i32>} : memref<48x272xf32, #tpu.memory_space<vmem>>, vector<32x256xf32>,
    %c0_50 = arith.constant 0 : index
    %c0_51 = arith.constant 0 : index
    %55 = vector.load %arg14[%c0_50, %c0_51] : memref<32x256xf32, #tpu.memory_space<vmem>>, vector<32x256xf32>
    %56 = vector.extract_strided_slice %50 {offsets = [32, 0], sizes = [32, 256], strides = [1, 1]} : vector<64x256xf32> to vector<32x256xf32>
    %57 = arith.addf %55, %56 : vector<32x256xf32>
    %c0_52 = arith.constant 0 : index
    %c0_53 = arith.constant 0 : index
    %58 = vector.load %arg14[%c0_52, %c0_53] : memref<32x256xf32, #tpu.memory_space<vmem>>, vector<32x256xf32>
    tpu.vector_store %arg14[%c0_52, %c0_53], %57 {strides = array<i32>} : memref<32x256xf32, #tpu.memory_space<vmem>>, vector<32x256xf32>,
    %cst_54 = arith.constant 0.000000e+00 : f32
    %59 = vector.broadcast %cst_54 : f32 to vector<64x256xf32>
    %c0_55 = arith.constant 0 : index
    %c6 = arith.constant 6 : index
    %60 = vector.load %arg13[%c0_55, %c6] : memref<48x272xf32, #tpu.memory_space<vmem>>, vector<48x256xf32>
    %c1_56 = arith.constant 1 : index
    %c0_57 = arith.constant 0 : index
    %c0_58 = arith.constant 0 : index
    %c0_59 = arith.constant 0 : index
    %61 = vector.load %arg5[%c1_56, %c0_57, %c0_58, %c0_59] : memref<4x3x64x48xf32, #tpu.memory_space<vmem>>, vector<1x1x64x48xf32>
    %62 = vector.shape_cast %61 : vector<1x1x64x48xf32> to vector<64x48xf32>
    %cst_60 = arith.constant dense<0.000000e+00> : vector<64x256xf32>
    %63 = tpu.matmul %62, %60, %cst_60 {dimension_numbers = #tpu.dot_dimension_numbers<[1], [0], [0], [1], [0, 0, 1, 1], [], []>} : vector<64x48xf32>, vector<48x256xf32>, vector<64x256xf32> -> vector<64x256xf32>
    %64 = arith.addf %59, %63 : vector<64x256xf32>
    %c0_61 = arith.constant 0 : index
    %c8_62 = arith.constant 8 : index
    %65 = vector.load %arg13[%c0_61, %c8_62] : memref<48x272xf32, #tpu.memory_space<vmem>>, vector<48x256xf32>
    %c1_63 = arith.constant 1 : index
    %c1_64 = arith.constant 1 : index
    %c0_65 = arith.constant 0 : index
    %c0_66 = arith.constant 0 : index
    %66 = vector.load %arg5[%c1_63, %c1_64, %c0_65, %c0_66] : memref<4x3x64x48xf32, #tpu.memory_space<vmem>>, vector<1x1x64x48xf32>
    %67 = vector.shape_cast %66 : vector<1x1x64x48xf32> to vector<64x48xf32>
    %cst_67 = arith.constant dense<0.000000e+00> : vector<64x256xf32>
    %68 = tpu.matmul %67, %65, %cst_67 {dimension_numbers = #tpu.dot_dimension_numbers<[1], [0], [0], [1], [0, 0, 1, 1], [], []>} : vector<64x48xf32>, vector<48x256xf32>, vector<64x256xf32> -> vector<64x256xf32>
    %69 = arith.addf %64, %68 : vector<64x256xf32>
    %c0_68 = arith.constant 0 : index
    %c10 = arith.constant 10 : index
    %70 = vector.load %arg13[%c0_68, %c10] : memref<48x272xf32, #tpu.memory_space<vmem>>, vector<48x256xf32>
    %c1_69 = arith.constant 1 : index
    %c2_70 = arith.constant 2 : index
    %c0_71 = arith.constant 0 : index
    %c0_72 = arith.constant 0 : index
    %71 = vector.load %arg5[%c1_69, %c2_70, %c0_71, %c0_72] : memref<4x3x64x48xf32, #tpu.memory_space<vmem>>, vector<1x1x64x48xf32>
    %72 = vector.shape_cast %71 : vector<1x1x64x48xf32> to vector<64x48xf32>
    %cst_73 = arith.constant dense<0.000000e+00> : vector<64x256xf32>
    %73 = tpu.matmul %72, %70, %cst_73 {dimension_numbers = #tpu.dot_dimension_numbers<[1], [0], [0], [1], [0, 0, 1, 1], [], []>} : vector<64x48xf32>, vector<48x256xf32>, vector<64x256xf32> -> vector<64x256xf32>
    %74 = arith.addf %69, %73 : vector<64x256xf32>
    %c1_74 = arith.constant 1 : index
    %c0_75 = arith.constant 0 : index
    %c0_76 = arith.constant 0 : index
    %75 = vector.load %arg6[%c1_74, %c0_75, %c0_76] : memref<4x64x1xf32, #tpu.memory_space<vmem>>, vector<1x64x1xf32>
    %76 = vector.shape_cast %75 : vector<1x64x1xf32> to vector<64x1xf32>
    %77 = vector.broadcast %76 : vector<64x1xf32> to vector<64x256xf32>
    %78 = arith.addf %74, %77 : vector<64x256xf32>
    %79 = vector.extract_strided_slice %78 {offsets = [0, 0], sizes = [32, 256], strides = [1, 1]} : vector<64x256xf32> to vector<32x256xf32>
    %80 = math.tanh %79 : vector<32x256xf32>
    %81 = vector.extract_strided_slice %78 {offsets = [32, 0], sizes = [32, 256], strides = [1, 1]} : vector<64x256xf32> to vector<32x256xf32>
    %82 = arith.negf %81 : vector<32x256xf32>
    %83 = math.exp %82 : vector<32x256xf32>
    %cst_77 = arith.constant 1.000000e+00 : f32
    %84 = vector.broadcast %cst_77 : f32 to vector<32x256xf32>
    %85 = arith.addf %84, %83 : vector<32x256xf32>
    %86 = arith.divf %84, %85 : vector<32x256xf32>
    %87 = arith.mulf %80, %86 : vector<32x256xf32>
    %c1_78 = arith.constant 1 : index
    %c0_79 = arith.constant 0 : index
    %c0_80 = arith.constant 0 : index
    %88 = vector.load %arg7[%c1_78, %c0_79, %c0_80] : memref<4x64x32xf32, #tpu.memory_space<vmem>>, vector<1x64x32xf32>
    %89 = vector.shape_cast %88 : vector<1x64x32xf32> to vector<64x32xf32>
    %cst_81 = arith.constant dense<0.000000e+00> : vector<64x256xf32>
    %90 = tpu.matmul %89, %87, %cst_81 {dimension_numbers = #tpu.dot_dimension_numbers<[1], [0], [0], [1], [0, 0, 1, 1], [], []>} : vector<64x32xf32>, vector<32x256xf32>, vector<64x256xf32> -> vector<64x256xf32>
    %c1_82 = arith.constant 1 : index
    %c0_83 = arith.constant 0 : index
    %c0_84 = arith.constant 0 : index
    %91 = vector.load %arg8[%c1_82, %c0_83, %c0_84] : memref<4x64x1xf32, #tpu.memory_space<vmem>>, vector<1x64x1xf32>
    %92 = vector.shape_cast %91 : vector<1x64x1xf32> to vector<64x1xf32>
    %93 = vector.broadcast %92 : vector<64x1xf32> to vector<64x256xf32>
    %94 = arith.addf %90, %93 : vector<64x256xf32>
    %c0_85 = arith.constant 0 : index
    %c8_86 = arith.constant 8 : index
    %95 = vector.load %arg13[%c0_85, %c8_86] : memref<48x272xf32, #tpu.memory_space<vmem>>, vector<32x256xf32>
    %96 = vector.extract_strided_slice %94 {offsets = [0, 0], sizes = [32, 256], strides = [1, 1]} : vector<64x256xf32> to vector<32x256xf32>
    %97 = arith.addf %95, %96 : vector<32x256xf32>
    %c0_87 = arith.constant 0 : index
    %c8_88 = arith.constant 8 : index
    %98 = vector.load %arg13[%c0_87, %c8_88] : memref<48x272xf32, #tpu.memory_space<vmem>>, vector<32x256xf32>
    tpu.vector_store %arg13[%c0_87, %c8_88], %97 {strides = array<i32>} : memref<48x272xf32, #tpu.memory_space<vmem>>, vector<32x256xf32>,
    %c0_89 = arith.constant 0 : index
    %c0_90 = arith.constant 0 : index
    %99 = vector.load %arg14[%c0_89, %c0_90] : memref<32x256xf32, #tpu.memory_space<vmem>>, vector<32x256xf32>
    %100 = vector.extract_strided_slice %94 {offsets = [32, 0], sizes = [32, 256], strides = [1, 1]} : vector<64x256xf32> to vector<32x256xf32>
    %101 = arith.addf %99, %100 : vector<32x256xf32>
    %c0_91 = arith.constant 0 : index
    %c0_92 = arith.constant 0 : index
    %102 = vector.load %arg14[%c0_91, %c0_92] : memref<32x256xf32, #tpu.memory_space<vmem>>, vector<32x256xf32>
    tpu.vector_store %arg14[%c0_91, %c0_92], %101 {strides = array<i32>} : memref<32x256xf32, #tpu.memory_space<vmem>>, vector<32x256xf32>,
    %cst_93 = arith.constant 0.000000e+00 : f32
    %103 = vector.broadcast %cst_93 : f32 to vector<64x256xf32>
    %c0_94 = arith.constant 0 : index
    %c4 = arith.constant 4 : index
    %104 = vector.load %arg13[%c0_94, %c4] : memref<48x272xf32, #tpu.memory_space<vmem>>, vector<48x256xf32>
    %c2_95 = arith.constant 2 : index
    %c0_96 = arith.constant 0 : index
    %c0_97 = arith.constant 0 : index
    %c0_98 = arith.constant 0 : index
    %105 = vector.load %arg5[%c2_95, %c0_96, %c0_97, %c0_98] : memref<4x3x64x48xf32, #tpu.memory_space<vmem>>, vector<1x1x64x48xf32>
    %106 = vector.shape_cast %105 : vector<1x1x64x48xf32> to vector<64x48xf32>
    %cst_99 = arith.constant dense<0.000000e+00> : vector<64x256xf32>
    %107 = tpu.matmul %106, %104, %cst_99 {dimension_numbers = #tpu.dot_dimension_numbers<[1], [0], [0], [1], [0, 0, 1, 1], [], []>} : vector<64x48xf32>, vector<48x256xf32>, vector<64x256xf32> -> vector<64x256xf32>
    %108 = arith.addf %103, %107 : vector<64x256xf32>
    %c0_100 = arith.constant 0 : index
    %c8_101 = arith.constant 8 : index
    %109 = vector.load %arg13[%c0_100, %c8_101] : memref<48x272xf32, #tpu.memory_space<vmem>>, vector<48x256xf32>
    %c2_102 = arith.constant 2 : index
    %c1_103 = arith.constant 1 : index
    %c0_104 = arith.constant 0 : index
    %c0_105 = arith.constant 0 : index
    %110 = vector.load %arg5[%c2_102, %c1_103, %c0_104, %c0_105] : memref<4x3x64x48xf32, #tpu.memory_space<vmem>>, vector<1x1x64x48xf32>
    %111 = vector.shape_cast %110 : vector<1x1x64x48xf32> to vector<64x48xf32>
    %cst_106 = arith.constant dense<0.000000e+00> : vector<64x256xf32>
    %112 = tpu.matmul %111, %109, %cst_106 {dimension_numbers = #tpu.dot_dimension_numbers<[1], [0], [0], [1], [0, 0, 1, 1], [], []>} : vector<64x48xf32>, vector<48x256xf32>, vector<64x256xf32> -> vector<64x256xf32>
    %113 = arith.addf %108, %112 : vector<64x256xf32>
    %c0_107 = arith.constant 0 : index
    %c12 = arith.constant 12 : index
    %114 = vector.load %arg13[%c0_107, %c12] : memref<48x272xf32, #tpu.memory_space<vmem>>, vector<48x256xf32>
    %c2_108 = arith.constant 2 : index
    %c2_109 = arith.constant 2 : index
    %c0_110 = arith.constant 0 : index
    %c0_111 = arith.constant 0 : index
    %115 = vector.load %arg5[%c2_108, %c2_109, %c0_110, %c0_111] : memref<4x3x64x48xf32, #tpu.memory_space<vmem>>, vector<1x1x64x48xf32>
    %116 = vector.shape_cast %115 : vector<1x1x64x48xf32> to vector<64x48xf32>
    %cst_112 = arith.constant dense<0.000000e+00> : vector<64x256xf32>
    %117 = tpu.matmul %116, %114, %cst_112 {dimension_numbers = #tpu.dot_dimension_numbers<[1], [0], [0], [1], [0, 0, 1, 1], [], []>} : vector<64x48xf32>, vector<48x256xf32>, vector<64x256xf32> -> vector<64x256xf32>
    %118 = arith.addf %113, %117 : vector<64x256xf32>
    %c2_113 = arith.constant 2 : index
    %c0_114 = arith.constant 0 : index
    %c0_115 = arith.constant 0 : index
    %119 = vector.load %arg6[%c2_113, %c0_114, %c0_115] : memref<4x64x1xf32, #tpu.memory_space<vmem>>, vector<1x64x1xf32>
    %120 = vector.shape_cast %119 : vector<1x64x1xf32> to vector<64x1xf32>
    %121 = vector.broadcast %120 : vector<64x1xf32> to vector<64x256xf32>
    %122 = arith.addf %118, %121 : vector<64x256xf32>
    %123 = vector.extract_strided_slice %122 {offsets = [0, 0], sizes = [32, 256], strides = [1, 1]} : vector<64x256xf32> to vector<32x256xf32>
    %124 = math.tanh %123 : vector<32x256xf32>
    %125 = vector.extract_strided_slice %122 {offsets = [32, 0], sizes = [32, 256], strides = [1, 1]} : vector<64x256xf32> to vector<32x256xf32>
    %126 = arith.negf %125 : vector<32x256xf32>
    %127 = math.exp %126 : vector<32x256xf32>
    %cst_116 = arith.constant 1.000000e+00 : f32
    %128 = vector.broadcast %cst_116 : f32 to vector<32x256xf32>
    %129 = arith.addf %128, %127 : vector<32x256xf32>
    %130 = arith.divf %128, %129 : vector<32x256xf32>
    %131 = arith.mulf %124, %130 : vector<32x256xf32>
    %c2_117 = arith.constant 2 : index
    %c0_118 = arith.constant 0 : index
    %c0_119 = arith.constant 0 : index
    %132 = vector.load %arg7[%c2_117, %c0_118, %c0_119] : memref<4x64x32xf32, #tpu.memory_space<vmem>>, vector<1x64x32xf32>
    %133 = vector.shape_cast %132 : vector<1x64x32xf32> to vector<64x32xf32>
    %cst_120 = arith.constant dense<0.000000e+00> : vector<64x256xf32>
    %134 = tpu.matmul %133, %131, %cst_120 {dimension_numbers = #tpu.dot_dimension_numbers<[1], [0], [0], [1], [0, 0, 1, 1], [], []>} : vector<64x32xf32>, vector<32x256xf32>, vector<64x256xf32> -> vector<64x256xf32>
    %c2_121 = arith.constant 2 : index
    %c0_122 = arith.constant 0 : index
    %c0_123 = arith.constant 0 : index
    %135 = vector.load %arg8[%c2_121, %c0_122, %c0_123] : memref<4x64x1xf32, #tpu.memory_space<vmem>>, vector<1x64x1xf32>
    %136 = vector.shape_cast %135 : vector<1x64x1xf32> to vector<64x1xf32>
    %137 = vector.broadcast %136 : vector<64x1xf32> to vector<64x256xf32>
    %138 = arith.addf %134, %137 : vector<64x256xf32>
    %c0_124 = arith.constant 0 : index
    %c8_125 = arith.constant 8 : index
    %139 = vector.load %arg13[%c0_124, %c8_125] : memref<48x272xf32, #tpu.memory_space<vmem>>, vector<32x256xf32>
    %140 = vector.extract_strided_slice %138 {offsets = [0, 0], sizes = [32, 256], strides = [1, 1]} : vector<64x256xf32> to vector<32x256xf32>
    %141 = arith.addf %139, %140 : vector<32x256xf32>
    %c0_126 = arith.constant 0 : index
    %c8_127 = arith.constant 8 : index
    %142 = vector.load %arg13[%c0_126, %c8_127] : memref<48x272xf32, #tpu.memory_space<vmem>>, vector<32x256xf32>
    tpu.vector_store %arg13[%c0_126, %c8_127], %141 {strides = array<i32>} : memref<48x272xf32, #tpu.memory_space<vmem>>, vector<32x256xf32>,
    %c0_128 = arith.constant 0 : index
    %c0_129 = arith.constant 0 : index
    %143 = vector.load %arg14[%c0_128, %c0_129] : memref<32x256xf32, #tpu.memory_space<vmem>>, vector<32x256xf32>
    %144 = vector.extract_strided_slice %138 {offsets = [32, 0], sizes = [32, 256], strides = [1, 1]} : vector<64x256xf32> to vector<32x256xf32>
    %145 = arith.addf %143, %144 : vector<32x256xf32>
    %c0_130 = arith.constant 0 : index
    %c0_131 = arith.constant 0 : index
    %146 = vector.load %arg14[%c0_130, %c0_131] : memref<32x256xf32, #tpu.memory_space<vmem>>, vector<32x256xf32>
    tpu.vector_store %arg14[%c0_130, %c0_131], %145 {strides = array<i32>} : memref<32x256xf32, #tpu.memory_space<vmem>>, vector<32x256xf32>,
    %cst_132 = arith.constant 0.000000e+00 : f32
    %147 = vector.broadcast %cst_132 : f32 to vector<64x256xf32>
    %c0_133 = arith.constant 0 : index
    %c0_134 = arith.constant 0 : index
    %148 = vector.load %arg13[%c0_133, %c0_134] : memref<48x272xf32, #tpu.memory_space<vmem>>, vector<48x256xf32>
    %c3 = arith.constant 3 : index
    %c0_135 = arith.constant 0 : index
    %c0_136 = arith.constant 0 : index
    %c0_137 = arith.constant 0 : index
    %149 = vector.load %arg5[%c3, %c0_135, %c0_136, %c0_137] : memref<4x3x64x48xf32, #tpu.memory_space<vmem>>, vector<1x1x64x48xf32>
    %150 = vector.shape_cast %149 : vector<1x1x64x48xf32> to vector<64x48xf32>
    %cst_138 = arith.constant dense<0.000000e+00> : vector<64x256xf32>
    %151 = tpu.matmul %150, %148, %cst_138 {dimension_numbers = #tpu.dot_dimension_numbers<[1], [0], [0], [1], [0, 0, 1, 1], [], []>} : vector<64x48xf32>, vector<48x256xf32>, vector<64x256xf32> -> vector<64x256xf32>
    %152 = arith.addf %147, %151 : vector<64x256xf32>
    %c0_139 = arith.constant 0 : index
    %c8_140 = arith.constant 8 : index
    %153 = vector.load %arg13[%c0_139, %c8_140] : memref<48x272xf32, #tpu.memory_space<vmem>>, vector<48x256xf32>
    %c3_141 = arith.constant 3 : index
    %c1_142 = arith.constant 1 : index
    %c0_143 = arith.constant 0 : index
    %c0_144 = arith.constant 0 : index
    %154 = vector.load %arg5[%c3_141, %c1_142, %c0_143, %c0_144] : memref<4x3x64x48xf32, #tpu.memory_space<vmem>>, vector<1x1x64x48xf32>
    %155 = vector.shape_cast %154 : vector<1x1x64x48xf32> to vector<64x48xf32>
    %cst_145 = arith.constant dense<0.000000e+00> : vector<64x256xf32>
    %156 = tpu.matmul %155, %153, %cst_145 {dimension_numbers = #tpu.dot_dimension_numbers<[1], [0], [0], [1], [0, 0, 1, 1], [], []>} : vector<64x48xf32>, vector<48x256xf32>, vector<64x256xf32> -> vector<64x256xf32>
    %157 = arith.addf %152, %156 : vector<64x256xf32>
    %c0_146 = arith.constant 0 : index
    %c16 = arith.constant 16 : index
    %158 = vector.load %arg13[%c0_146, %c16] : memref<48x272xf32, #tpu.memory_space<vmem>>, vector<48x256xf32>
    %c3_147 = arith.constant 3 : index
    %c2_148 = arith.constant 2 : index
    %c0_149 = arith.constant 0 : index
    %c0_150 = arith.constant 0 : index
    %159 = vector.load %arg5[%c3_147, %c2_148, %c0_149, %c0_150] : memref<4x3x64x48xf32, #tpu.memory_space<vmem>>, vector<1x1x64x48xf32>
    %160 = vector.shape_cast %159 : vector<1x1x64x48xf32> to vector<64x48xf32>
    %cst_151 = arith.constant dense<0.000000e+00> : vector<64x256xf32>
    %161 = tpu.matmul %160, %158, %cst_151 {dimension_numbers = #tpu.dot_dimension_numbers<[1], [0], [0], [1], [0, 0, 1, 1], [], []>} : vector<64x48xf32>, vector<48x256xf32>, vector<64x256xf32> -> vector<64x256xf32>
    %162 = arith.addf %157, %161 : vector<64x256xf32>
    %c3_152 = arith.constant 3 : index
    %c0_153 = arith.constant 0 : index
    %c0_154 = arith.constant 0 : index
    %163 = vector.load %arg6[%c3_152, %c0_153, %c0_154] : memref<4x64x1xf32, #tpu.memory_space<vmem>>, vector<1x64x1xf32>
    %164 = vector.shape_cast %163 : vector<1x64x1xf32> to vector<64x1xf32>
    %165 = vector.broadcast %164 : vector<64x1xf32> to vector<64x256xf32>
    %166 = arith.addf %162, %165 : vector<64x256xf32>
    %167 = vector.extract_strided_slice %166 {offsets = [0, 0], sizes = [32, 256], strides = [1, 1]} : vector<64x256xf32> to vector<32x256xf32>
    %168 = math.tanh %167 : vector<32x256xf32>
    %169 = vector.extract_strided_slice %166 {offsets = [32, 0], sizes = [32, 256], strides = [1, 1]} : vector<64x256xf32> to vector<32x256xf32>
    %170 = arith.negf %169 : vector<32x256xf32>
    %171 = math.exp %170 : vector<32x256xf32>
    %cst_155 = arith.constant 1.000000e+00 : f32
    %172 = vector.broadcast %cst_155 : f32 to vector<32x256xf32>
    %173 = arith.addf %172, %171 : vector<32x256xf32>
    %174 = arith.divf %172, %173 : vector<32x256xf32>
    %175 = arith.mulf %168, %174 : vector<32x256xf32>
    %c3_156 = arith.constant 3 : index
    %c0_157 = arith.constant 0 : index
    %c0_158 = arith.constant 0 : index
    %176 = vector.load %arg7[%c3_156, %c0_157, %c0_158] : memref<4x64x32xf32, #tpu.memory_space<vmem>>, vector<1x64x32xf32>
    %177 = vector.shape_cast %176 : vector<1x64x32xf32> to vector<64x32xf32>
    %cst_159 = arith.constant dense<0.000000e+00> : vector<64x256xf32>
    %178 = tpu.matmul %177, %175, %cst_159 {dimension_numbers = #tpu.dot_dimension_numbers<[1], [0], [0], [1], [0, 0, 1, 1], [], []>} : vector<64x32xf32>, vector<32x256xf32>, vector<64x256xf32> -> vector<64x256xf32>
    %c3_160 = arith.constant 3 : index
    %c0_161 = arith.constant 0 : index
    %c0_162 = arith.constant 0 : index
    %179 = vector.load %arg8[%c3_160, %c0_161, %c0_162] : memref<4x64x1xf32, #tpu.memory_space<vmem>>, vector<1x64x1xf32>
    %180 = vector.shape_cast %179 : vector<1x64x1xf32> to vector<64x1xf32>
    %181 = vector.broadcast %180 : vector<64x1xf32> to vector<64x256xf32>
    %182 = arith.addf %178, %181 : vector<64x256xf32>
    %c0_163 = arith.constant 0 : index
    %c0_164 = arith.constant 0 : index
    %183 = vector.load %arg14[%c0_163, %c0_164] : memref<32x256xf32, #tpu.memory_space<vmem>>, vector<32x256xf32>
    %184 = vector.extract_strided_slice %182 {offsets = [32, 0], sizes = [32, 256], strides = [1, 1]} : vector<64x256xf32> to vector<32x256xf32>
    %185 = arith.addf %183, %184 : vector<32x256xf32>
    %c0_165 = arith.constant 0 : index
    %c0_166 = arith.constant 0 : index
    %186 = vector.load %arg14[%c0_165, %c0_166] : memref<32x256xf32, #tpu.memory_space<vmem>>, vector<32x256xf32>
    tpu.vector_store %arg14[%c0_165, %c0_166], %185 {strides = array<i32>} : memref<32x256xf32, #tpu.memory_space<vmem>>, vector<32x256xf32>,
    %c0_167 = arith.constant 0 : index
    %c0_168 = arith.constant 0 : index
    %187 = vector.load %arg9[%c0_167, %c0_168] : memref<16x32xf32, #tpu.memory_space<vmem>>, vector<16x32xf32>
    %c0_169 = arith.constant 0 : index
    %c0_170 = arith.constant 0 : index
    %188 = vector.load %arg14[%c0_169, %c0_170] : memref<32x256xf32, #tpu.memory_space<vmem>>, vector<32x256xf32>
    %cst_171 = arith.constant dense<0.000000e+00> : vector<16x256xf32>
    %189 = tpu.matmul %187, %188, %cst_171 {dimension_numbers = #tpu.dot_dimension_numbers<[1], [0], [0], [1], [0, 0, 1, 1], [], []>} : vector<16x32xf32>, vector<32x256xf32>, vector<16x256xf32> -> vector<16x256xf32>
    %c0_172 = arith.constant 0 : index
    %c0_173 = arith.constant 0 : index
    %190 = vector.load %arg10[%c0_172, %c0_173] : memref<16x1xf32, #tpu.memory_space<vmem>>, vector<16x1xf32>
    %191 = vector.broadcast %190 : vector<16x1xf32> to vector<16x256xf32>
    %192 = arith.addf %189, %191 : vector<16x256xf32>
    %193 = vector.extract_strided_slice %192 {offsets = [0, 0], sizes = [8, 256], strides = [1, 1]} : vector<16x256xf32> to vector<8x256xf32>
    %c0_174 = arith.constant 0 : index
    %c0_175 = arith.constant 0 : index
    %c0_176 = arith.constant 0 : index
    %194 = vector.load %arg11[%c0_174, %c0_175, %c0_176] : memref<1x8x256xf32, #tpu.memory_space<vmem>>, vector<1x8x256xf32>
    %195 = vector.shape_cast %194 : vector<1x8x256xf32> to vector<8x256xf32>
    %196 = vector.shape_cast %193 : vector<8x256xf32> to vector<1x8x256xf32>
    tpu.vector_store %arg11[%c0_174, %c0_175, %c0_176], %196 {strides = array<i32>} : memref<1x8x256xf32, #tpu.memory_space<vmem>>, vector<1x8x256xf32>,
    %197 = vector.extract_strided_slice %192 {offsets = [8, 0], sizes = [8, 256], strides = [1, 1]} : vector<16x256xf32> to vector<8x256xf32>
    %c0_177 = arith.constant 0 : index
    %c0_178 = arith.constant 0 : index
    %c0_179 = arith.constant 0 : index
    %198 = vector.load %arg12[%c0_177, %c0_178, %c0_179] : memref<1x8x256xf32, #tpu.memory_space<vmem>>, vector<1x8x256xf32>
    %199 = vector.shape_cast %198 : vector<1x8x256xf32> to vector<8x256xf32>
    %200 = vector.shape_cast %197 : vector<8x256xf32> to vector<1x8x256xf32>
    tpu.vector_store %arg12[%c0_177, %c0_178, %c0_179], %200 {strides = array<i32>} : memref<1x8x256xf32, #tpu.memory_space<vmem>>, vector<1x8x256xf32>,
    return
  }
  func.func @transform_0(%arg0: i32) -> (i32, i32, i32) {
    %c0_i32 = arith.constant 0 : i32
    %c0_i32_0 = arith.constant 0 : i32
    %c0_i32_1 = arith.constant 0 : i32
    return %arg0, %c0_i32, %c0_i32_0 : i32, i32, i32
  }
  func.func @transform_1(%arg0: i32) -> (i32, i32, i32) {
    %c0_i32 = arith.constant 0 : i32
    %c0_i32_0 = arith.constant 0 : i32
    %c0_i32_1 = arith.constant 0 : i32
    return %arg0, %c0_i32, %c0_i32_0 : i32, i32, i32
  }
  func.func @transform_2(%arg0: i32) -> (i32, i32) {
    %c0_i32 = arith.constant 0 : i32
    %c0_i32_0 = arith.constant 0 : i32
    %c0_i32_1 = arith.constant 0 : i32
    return %c0_i32, %c0_i32_0 : i32, i32
  }
  func.func @transform_3(%arg0: i32) -> (i32, i32) {
    %c0_i32 = arith.constant 0 : i32
    %c0_i32_0 = arith.constant 0 : i32
    %c0_i32_1 = arith.constant 0 : i32
    return %c0_i32, %c0_i32_0 : i32, i32
  }
  func.func @transform_4(%arg0: i32) -> (i32, i32, i32, i32) {
    %c0_i32 = arith.constant 0 : i32
    %c0_i32_0 = arith.constant 0 : i32
    %c0_i32_1 = arith.constant 0 : i32
    %c0_i32_2 = arith.constant 0 : i32
    %c0_i32_3 = arith.constant 0 : i32
    return %c0_i32, %c0_i32_0, %c0_i32_1, %c0_i32_2 : i32, i32, i32, i32
  }
  func.func @transform_5(%arg0: i32) -> (i32, i32, i32) {
    %c0_i32 = arith.constant 0 : i32
    %c0_i32_0 = arith.constant 0 : i32
    %c0_i32_1 = arith.constant 0 : i32
    %c0_i32_2 = arith.constant 0 : i32
    return %c0_i32, %c0_i32_0, %c0_i32_1 : i32, i32, i32
  }
  func.func @transform_6(%arg0: i32) -> (i32, i32, i32) {
    %c0_i32 = arith.constant 0 : i32
    %c0_i32_0 = arith.constant 0 : i32
    %c0_i32_1 = arith.constant 0 : i32
    %c0_i32_2 = arith.constant 0 : i32
    return %c0_i32, %c0_i32_0, %c0_i32_1 : i32, i32, i32
  }
  func.func @transform_7(%arg0: i32) -> (i32, i32, i32) {
    %c0_i32 = arith.constant 0 : i32
    %c0_i32_0 = arith.constant 0 : i32
    %c0_i32_1 = arith.constant 0 : i32
    %c0_i32_2 = arith.constant 0 : i32
    return %c0_i32, %c0_i32_0, %c0_i32_1 : i32, i32, i32
  }
  func.func @transform_8(%arg0: i32) -> (i32, i32) {
    %c0_i32 = arith.constant 0 : i32
    %c0_i32_0 = arith.constant 0 : i32
    %c0_i32_1 = arith.constant 0 : i32
    return %c0_i32, %c0_i32_0 : i32, i32
  }
  func.func @transform_9(%arg0: i32) -> (i32, i32) {
    %c0_i32 = arith.constant 0 : i32
    %c0_i32_0 = arith.constant 0 : i32
    %c0_i32_1 = arith.constant 0 : i32
    return %c0_i32, %c0_i32_0 : i32, i32
  }
  func.func @transform_10(%arg0: i32) -> (i32, i32, i32) {
    %c0_i32 = arith.constant 0 : i32
    %c0_i32_0 = arith.constant 0 : i32
    %c0_i32_1 = arith.constant 0 : i32
    return %arg0, %c0_i32, %c0_i32_0 : i32, i32, i32
  }
  func.func @transform_11(%arg0: i32) -> (i32, i32, i32) {
    %c0_i32 = arith.constant 0 : i32
    %c0_i32_0 = arith.constant 0 : i32
    %c0_i32_1 = arith.constant 0 : i32
    return %arg0, %c0_i32, %c0_i32_0 : i32, i32, i32
  }
}

</mosaic_0001>

<bundles_post_ra>
// kernel: tpu_custom_call.1
= control target key start
LH: loop header
LB: loop body
LE: loop exit
PB: predicated region body
PF: predicated region fallthrough
CT: control target
= control target key end

     0   :  { %17 = vsyncpa [#allocation5], 0  ;;  %s8287_s0 = inlined_call_operand.vmem [shape: f32[2,8,256], index: 0, kind: input, shape index: {}]   ;;  %s8288_s1 = inlined_call_operand.vmem [shape: f32[2,16,256], index: 1, kind: input, shape index: {}]   ;;  %s8289_s2 = inlined_call_operand.vmem [shape: f32[32,8], index: 2, kind: input, shape index: {}]   ;;  %s8290_s3 = inlined_call_operand.vmem [shape: f32[32,1], index: 3, kind: input, shape index: {}]   ;;  %s8291_s4 = inlined_call_operand.vmem [shape: f32[4,3,64,48], index: 4, kind: input, shape index: {}]   ;;  %s8292_s5 = inlined_call_operand.vmem [shape: f32[4,64,1], index: 5, kind: input, shape index: {}]   ;;  %s8293_s6 = inlined_call_operand.vmem [shape: f32[4,64,32], index: 6, kind: input, shape index: {}]   ;;  %s8294_s7 = inlined_call_operand.vmem [shape: f32[4,64,1], index: 7, kind: input, shape index: {}]   ;;  %s8295_s8 = inlined_call_operand.vmem [shape: f32[16,32], index: 8, kind: input, shape index: {}]   ;;  %s8296_s9 = inlined_call_operand.vmem [shape: f32[16,1], index: 9, kind: input, shape index: {}]   ;;  %s8297_s10 = inlined_call_operand.hbm [shape: f32[2,8,256], index: 10, kind: output, shape index: {0}]   ;;  %s8298_s11 = inlined_call_operand.hbm [shape: f32[2,8,256], index: 11, kind: output, shape index: {1}]  }
   0x1   :  { %19 = vsyncpa [#allocation5 + $0x1], 0 }
   0x2   :  { %20 = vsyncpa [#allocation7], 0 }
   0x3   :  { %22 = vsyncpa [#allocation7 + $0x1], 0  ;;  %s6776_s17 = smov 0   ;;  %s6778_s18 = smov 0  }
   0x4   :  { %s6780_s19 = smov 0   ;;  %s6782_s20 = smov 0  }
   0x5 LB: > { %8303 = sst [smem:[#allocation10_spill]] %s6697_s19  ;;  %s6797_s21 = sadd.s32 4294967295, %s6701_s20   ;;  %s6701_s20 = sphi %s6782_s20, %s8311_s20   ;;  %s6697_s19 = sphi %s6780_s19, %s8313_s19   ;;  %s6693_s18 = sphi %s6778_s18, %s8315_s18   ;;  %s6689_s17 = sphi %s6776_s17, %s8314_s17  }
   0x6   : > { %s5138_s22 = sadd.s32 4294967294, %s6701_s20   ;;  %s6801_s23 = sadd.s32 1, %s6701_s20  }
   0x7   : > { %8304 = sst [smem:[#allocation11_spill]] %s6801_s23  ;;  %s255_s24 = sadd.s32 1, %s6697_s19 }
   0x8   : > { %s252_s25 = ssub.s32 %s6701_s20, %s6801_s23  ;;  %p265_p0 = scmp.ne.s32.totalorder %s6697_s19, %s6693_s18 }
   0x9   : > { %p253_p1 = scmp.eq.s32.totalorder %s252_s25, 0  ;;  %p266_p2 = scmp.eq.s32.totalorder %s6797_s21, 1 }
   0xa   : > { %p271_p3 = scmp.ne.s32.totalorder %s6693_s18, %s6689_s17  ;;  %p272_p4 = scmp.eq.s32.totalorder %s5138_s22, 1 }
   0xb   : > { %s6812_s26 = scalar_select %p253_p1, %s6697_s19, %s255_s24  }
   0xc   : > { %p6814_p5 = por %p266_p2, %p265_p0  ;;  %p6818_p6 = por %p272_p4, %p271_p3 }
   0xd   : > { %8305 = sst [smem:[#allocation12_spill]] %s6812_s26  ;;  %p5141_p7 = scmp.ge.s32.totalorder %s6701_s20, 1 }
   0xe   : > { %s8307_s28 = scalar_select %p6818_p6, 1, 0 }
   0xf   : > { %p356_p8 = scmp.lt.s32.totalorder %s6701_s20, 3 }
  0x10   : > { %8308 = sst [smem:[#allocation13_spill]] %s8307_s28 }
  0x11   : > { %p357_p9 = pnand %p5141_p7, %p356_p8 }
  0x12   : > { %p406_p10 = scmp.lt.s32.totalorder (!%p357_p9), %s6797_s21, 1  ;;  %v6703_v0 = vmov (!%p357_p9), 0.0   ;;  %v449_v1 = vld [vmem:[%s8290_s3] sm:$0xff] (!%p357_p9)  ;;  %v6704_v2 = vmov (!%p357_p9), 0   ;;  %v451_v3 = vld [vmem:[%s8290_s3 + $0x10] sm:$0xff] (!%p357_p9)  ;;  %v450_v4 = vld [vmem:[%s8290_s3 + $0x8] sm:$0xff] (!%p357_p9) }
  0x13   : > { %360 = sbr.rel (%p357_p9) target bundleno = 3821 (0xeed), region = 60  ;;  %550 = vmatprep.mubr.f32.mxu0 (!%p357_p9), %v6703_v0  ;;  %416 = vst [vmem:[#allocation2] sm:$0xff] (!%p357_p9), %v6703_v0  ;;  %420 = vst [vmem:[#allocation2 + $0x18] sm:$0xff] (!%p357_p9), %v6703_v0  ;;  %861 = vmatprep.mubr.f32.mxu1 (!%p357_p9), %v6703_v0  ;;  %v452_v5 = vld [vmem:[%s8290_s3 + $0x18] sm:$0xff] (!%p357_p9)  ;;  %v443_v8 = vld [vmem:[%s8289_s2] sm:$0xff] (!%p357_p9)  ;;  %vm473_vm0 = vcmask (!%p357_p9), 64512  }
  0x14   : > { %423 = vst [vmem:[#allocation2 + $0x30] sm:$0xff] (!%p357_p9), %v6703_v0  ;;  %426 = vst [vmem:[#allocation2 + $0x48] sm:$0xff] (!%p357_p9), %v6703_v0  ;;  %5915 = vset.pattern.permute.xlu0 (!%p357_p9), %v6704_v2  ;;  %5916 = vset.pattern.permute.xlu1 (!%p357_p9), %v6704_v2  ;;  %v444_v11 = vld [vmem:[%s8289_s2 + $0x8] sm:$0xff] (!%p357_p9)  ;;  %s6705_s26 = smov (!%p357_p9), 8   ;;  %v445_v12 = vld [vmem:[%s8289_s2 + $0x10] sm:$0xff] (!%p357_p9)  ;;  %vm418_vm1 = vcmask (!%p357_p9), 130048  }
  0x15   : > { %429 = vst [vmem:[#allocation2 + $0x60] sm:$0xff] (!%p357_p9), %v6703_v0  ;;  %432 = vst [vmem:[#allocation2 + $0x78] sm:$0xff] (!%p357_p9), %v6703_v0  ;;  %455 = vperm.xlu0 (!%p357_p9), %5915, %v449_v1   ;;  %465 = vperm.xlu1 (!%p357_p9), %5916, %v451_v3   ;;  %v446_v13 = vld [vmem:[%s8289_s2 + $0x18] sm:$0xff] (!%p357_p9)  ;;  %vm615_vm2 = vcmask (!%p357_p9), 1047616   ;;  %s6706_s24 = smov (!%p357_p9), 120   ;;  %s6707_s25 = smov (!%p357_p9), 121  }
  0x16   : > { %431 = vst.msk [vmem:[#allocation2 + $0x70] sm:$0xff] (!%p357_p9), %vm418_vm1, %v6703_v0  ;;  %419 = vst.msk [vmem:[#allocation2 + $0x10] sm:$0xff] (!%p357_p9), %vm418_vm1, %v6703_v0  ;;  %s6708_s29 = smov (!%p357_p9), 119   ;;  %vm747_vm3 = vcmask (!%p357_p9), 982016   ;;  %vm946_vm4 = vcmask (!%p357_p9), 990208   ;;  %vm772_vm5 = vcmask (!%p357_p9), 392192  }
  0x17   : > { %422 = vst.msk [vmem:[#allocation2 + $0x28] sm:$0xff] (!%p357_p9), %vm418_vm1, %v6703_v0  ;;  %425 = vst.msk [vmem:[#allocation2 + $0x40] sm:$0xff] (!%p357_p9), %vm418_vm1, %v6703_v0  ;;  %vm1153_vm6 = vcmask (!%p357_p9), 973824   ;;  %vm1515_vm7 = vcmask (!%p357_p9), 261120   ;;  %s6709_s19 = smov (!%p357_p9), 122   ;;  %s6710_s23 = smov (!%p357_p9), 118  }
  0x18   : > { %428 = vst.msk [vmem:[#allocation2 + $0x58] sm:$0xff] (!%p357_p9), %vm418_vm1, %v6703_v0  ;;  %434 = vst.msk [vmem:[#allocation2 + $0x88] sm:$0xff] (!%p357_p9), %vm418_vm1, %v6703_v0  ;;  %vm2040_vm8 = vcmask (!%p357_p9), 998400   ;;  %vm2247_vm9 = vcmask (!%p357_p9), 965632   ;;  %s6712_s14 = smov (!%p357_p9), 116   ;;  %vm3136_vm10 = vcmask (!%p357_p9), 1014784  }
  0x19   : > { %460 = vperm.xlu0 (!%p357_p9), %5915, %v450_v4   ;;  %470 = vperm.xlu1 (!%p357_p9), %5916, %v452_v5   ;;  %vm3343_vm11 = vcmask (!%p357_p9), 949248   ;;  %vm4378_vm12 = vcmask (!%p357_p9), 916480  }
  0x1a   : > { %s407_s12 = scalar_select %p406_p10, %s6797_s21, 1 }
  0x1c   : > { %s5482_s15 = sshll.u32 %s407_s12, 4  ;;  %s5483_s16 = sshll.u32 %s407_s12, 5 }
  0x1d   : > { %s410_s30 = scalar_lea.vmem %s8287_s0, %s5482_s15  ;;  %s6852_s13 = scalar_lea.vmem %s8288_s1, %s5483_s16 }
  0x1e   : > { %v448_v6 = vld [vmem:[%s410_s30 + $0x8] sm:$0xff]  ;;  %v447_v7 = vld [vmem:[%s410_s30] sm:$0xff]  ;;  %v630_v37 = vld [vmem:[%s6852_s13 + $0x10] sm:$0xff]  ;;  %s6711_s12 = smov 124   ;;  %s6714_s16 = smov [#allocation4]  }
  0x1f   : > { %486 = vmatprep.subr.mxu0 %v448_v6  ;;  %v628_v9 = vld [vmem:[%s6852_s13] sm:$0xff]  ;;  %v629_v10 = vld [vmem:[%s6852_s13 + $0x8] sm:$0xff]  ;;  %v631_v38 = vld [vmem:[%s6852_s13 + $0x18] sm:$0xff]  ;;  %s6611_s22 = sshll.u32 %s6714_s16, 4  ;;  %s6612_s22 = int_to_ptr.vmem [resolvable:$false] %s6611_s22 }
  0x20   : > { %487 = vmatpush1.msra.mxu0 %v447_v7  ;;  %636 = vrot.lane.b32.xlu0 %v628_v9, %s6705_s26 }
  0x21   : > { %5148 = vmatmul.mubr.msk.f32.vlgmr.msra.gmra.mrb[0].mxu0 %vm473_vm0, %v443_v8  ;;  %638 = vrot.lane.b32.xlu1 %v629_v10, %s6705_s26 }
  0x22   : > { %556 = vmatprep.mubr.f32.mxu0 %v6703_v0 }
  0x25   : > { %5149 = vmatmul.mubr.msk.f32.gmra.mrb[2].mxu0 %vm473_vm0, %v444_v11 }
  0x26   : > { %562 = vmatprep.mubr.f32.mxu0 %v6703_v0 }
  0x29   : > { %5150 = vmatmul.mubr.msk.f32.gmra.mrb[4].mxu0 %vm473_vm0, %v445_v12 }
  0x2a   : > { %568 = vmatprep.mubr.f32.mxu0 %v6703_v0 }
  0x2d   : > { %5151 = vmatmul.mubr.msk.f32.gmra.mrb[6].mxu0 %vm473_vm0, %v446_v13 }
  0x2e   : > { %1604 = vmatprep.mubr.f32.mxu0 %v6703_v0 }
  0x94   : > { %v456_v14 = vpop.permute.xlu0 %455  ;;  %v466_v15 = vpop.permute.xlu1 %465 }
  0x98   : > { %v461_v16 = vpop.permute.xlu0 %460  ;;  %v471_v17 = vpop.permute.xlu1 %470 }
  0x9c   : > { %v637_v18 = vpop.permute.xlu0 %636  ;;  %v639_v19 = vpop.permute.xlu1 %638 }
  0x9d   : > { %652 = vst.msk [vmem:[#allocation2 + $0x60] sm:$0xff] %vm615_vm2, %v637_v18  ;;  %v6887_v20 = vsel %vm473_vm0, %v637_v18, %v639_v19  ;;  %v1338_v18 = vld [vmem:[%s8292_s5 + $0x38] sm:$0xff] }
  0x9e   : > { %654 = vst.msk [vmem:[#allocation2 + $0x70] sm:$0xff] %vm473_vm0, %v639_v19  ;;  %653 = vst [vmem:[#allocation2 + $0x68] sm:$0xff] %v6887_v20  ;;  %v1331_v19 = vld [vmem:[%s8292_s5] sm:$0xff] }
  0xa4   : > { %v670_v11 = vld [vmem:[#allocation2 + $0x60] sm:$0xff] }
  0xa5   : > { %v672_v5 = vld [vmem:[#allocation2 + $0x70] sm:$0xff]  ;;  %v6961_v12 = vld [vmem:[#allocation2 + $0x60] sm:$0xff] }
  0xa6   : > { %v5947_v7 = vpack.i.bf16 %v672_v5, %v6887_v20  ;;  %v1332_v20 = vld [vmem:[%s8292_s5 + $0x8] sm:$0xff] }
  0xf4   : > { %v552_v21 = vpop.f32.mrb[0].mxu0 }
  0xf5   : > { %v553_v22 = vadd.f32 %v552_v21, %v456_v14  ;;  %v554_v23 = vpop.f32.mrb[1].mxu0  ;;  %v1333_v21 = vld [vmem:[%s8292_s5 + $0x10] sm:$0xff] }
  0xf6   : > { %v555_v24 = vadd.f32 %v554_v23, %v456_v14  ;;  %v1467_v23 = vld [vmem:[%s8294_s7] sm:$0xff] }
  0xf7   : > { %583 = vrot.lane.b32.xlu0 %v553_v22, %s6705_s26  ;;  %v1334_v22 = vld [vmem:[%s8292_s5 + $0x18] sm:$0xff] }
  0xf8   : > { %v558_v25 = vpop.f32.mrb[2].mxu0  ;;  %585 = vrot.lane.b32.xlu1 %v555_v24, %s6705_s26  ;;  %v1468_v24 = vld [vmem:[%s8294_s7 + $0x8] sm:$0xff] }
  0xf9   : > { %v559_v26 = vadd.f32 %v558_v25, %v461_v16  ;;  %v560_v27 = vpop.f32.mrb[3].mxu0  ;;  %v1469_v25 = vld [vmem:[%s8294_s7 + $0x10] sm:$0xff] }
  0xfa   : > { %v561_v28 = vadd.f32 %v560_v27, %v461_v16  ;;  %v1336_v16 = vld [vmem:[%s8292_s5 + $0x28] sm:$0xff] }
  0xfb   : > { %587 = vrot.lane.b32.xlu0 %v559_v26, %s6705_s26  ;;  %v1470_v26 = vld [vmem:[%s8294_s7 + $0x18] sm:$0xff] }
  0xfc   : > { %v564_v29 = vpop.f32.mrb[4].mxu0  ;;  %589 = vrot.lane.b32.xlu1 %v561_v28, %s6705_s26 }
  0xfd   : > { %v565_v30 = vadd.f32 %v564_v29, %v466_v15  ;;  %v566_v31 = vpop.f32.mrb[5].mxu0 }
  0xfe   : > { %v567_v32 = vadd.f32 %v566_v31, %v466_v15  ;;  %v1335_v15 = vld [vmem:[%s8292_s5 + $0x20] sm:$0xff] }
  0xff   : > { %591 = vrot.lane.b32.xlu0 %v565_v30, %s6705_s26 }
 0x100   : > { %v570_v33 = vpop.f32.mrb[6].mxu0  ;;  %593 = vrot.lane.b32.xlu1 %v567_v32, %s6705_s26 }
 0x101   : > { %v571_v34 = vadd.f32 %v570_v33, %v471_v17  ;;  %v572_v35 = vpop.f32.mrb[7].mxu0 }
 0x102   : > { %v573_v36 = vadd.f32 %v572_v35, %v471_v17  ;;  %v1337_v17 = vld [vmem:[%s8292_s5 + $0x30] sm:$0xff] }
 0x103   : > { %595 = vrot.lane.b32.xlu0 %v571_v34, %s6705_s26 }
 0x104   : > { %597 = vrot.lane.b32.xlu1 %v573_v36, %s6705_s26 }
 0x107   : > { %640 = vrot.lane.b32.xlu0 %v630_v37, %s6705_s26 }
 0x108   : > { %642 = vrot.lane.b32.xlu1 %v631_v38, %s6705_s26 }
 0x169   : > { %v584_v39 = vpop.permute.xlu0 %583 }
 0x16a   : > { %616 = vst.msk [vmem:[#allocation2] sm:$0xff] %vm615_vm2, %v584_v39  ;;  %v586_v40 = vpop.permute.xlu1 %585 }
 0x16b   : > { %618 = vst.msk [vmem:[#allocation2 + $0x10] sm:$0xff] %vm473_vm0, %v586_v40  ;;  %v6907_v44 = vsel %vm473_vm0, %v584_v39, %v586_v40 }
 0x16d   : > { %v588_v41 = vpop.permute.xlu0 %587 }
 0x16e   : > { %619 = vst.msk [vmem:[#allocation2 + $0x18] sm:$0xff] %vm615_vm2, %v588_v41  ;;  %v590_v42 = vpop.permute.xlu1 %589 }
 0x16f   : > { %621 = vst.msk [vmem:[#allocation2 + $0x28] sm:$0xff] %vm473_vm0, %v590_v42  ;;  %v6921_v51 = vsel %vm473_vm0, %v588_v41, %v590_v42 }
 0x171   : > { %v592_v43 = vpop.permute.xlu0 %591  ;;  %v6916_v49 = vld [vmem:[#allocation2] sm:$0xff] }
 0x172   : > { %622 = vst.msk [vmem:[#allocation2 + $0x30] sm:$0xff] %vm615_vm2, %v592_v43  ;;  %v594_v45 = vpop.permute.xlu1 %593  ;;  %v6910_v46 = vld [vmem:[#allocation2 + $0x10] sm:$0xff] }
 0x173   : > { %624 = vst.msk [vmem:[#allocation2 + $0x40] sm:$0xff] %vm473_vm0, %v594_v45  ;;  %v5917_v47 = vpack.i.bf16 %v6910_v46, %v6907_v44  ;;  %v6935_v58 = vsel %vm473_vm0, %v592_v43, %v594_v45 }
 0x175   : > { %v596_v48 = vpop.permute.xlu0 %595  ;;  %5918 = vrot.lane.b32.xlu0 %v5917_v47, %s6706_s24  ;;  %v6918_v50 = vld [vmem:[#allocation2 + $0x18] sm:$0xff] }
 0x176   : > { %625 = vst.msk [vmem:[#allocation2 + $0x48] sm:$0xff] %vm615_vm2, %v596_v48  ;;  %v598_v52 = vpop.permute.xlu1 %597  ;;  %v5922_v53 = vpack.i.bf16 %v6918_v50, %v6916_v49  ;;  %v6926_v54 = vld [vmem:[#allocation2 + $0x28] sm:$0xff] }
 0x177   : > { %v602_v55 = vsel %vm473_vm0, %v596_v48, %v598_v52  ;;  %627 = vst.msk [vmem:[#allocation2 + $0x58] sm:$0xff] %vm473_vm0, %v598_v52  ;;  %v5927_v56 = vpack.i.bf16 %v6926_v54, %v6921_v51 }
 0x178   : > { %626 = vst [vmem:[#allocation2 + $0x50] sm:$0xff] %v602_v55 }
 0x179   : > { %v641_v57 = vpop.permute.xlu0 %640  ;;  %5923 = vrot.lane.b32.xlu0 %v5922_v53, %s6706_s24  ;;  %5928 = vrot.lane.b32.xlu1 %v5927_v56, %s6706_s24  ;;  %v6945_v63 = vld [vmem:[#allocation2 + $0x30] sm:$0xff] }
 0x17a   : > { %655 = vst.msk [vmem:[#allocation2 + $0x78] sm:$0xff] %vm615_vm2, %v641_v57  ;;  %v643_v59 = vpop.permute.xlu1 %642  ;;  %v6938_v60 = vld [vmem:[#allocation2 + $0x40] sm:$0xff] }
 0x17b   : > { %v645_v61 = vsel %vm473_vm0, %v641_v57, %v643_v59  ;;  %657 = vst.msk [vmem:[#allocation2 + $0x88] sm:$0xff] %vm473_vm0, %v643_v59  ;;  %v5932_v62 = vpack.i.bf16 %v6938_v60, %v6935_v58 }
 0x17c   : > { %656 = vst [vmem:[#allocation2 + $0x80] sm:$0xff] %v645_v61 }
 0x17d   : > { %5933 = vrot.lane.b32.xlu1 %v5932_v62, %s6706_s24  ;;  %v6947_v1 = vld [vmem:[#allocation2 + $0x48] sm:$0xff] }
 0x17e   : > { %v5937_v2 = vpack.i.bf16 %v6947_v1, %v6945_v63  ;;  %v6951_v3 = vld [vmem:[#allocation2 + $0x58] sm:$0xff] }
 0x17f   : > { %v5942_v4 = vpack.i.bf16 %v6951_v3, %v602_v55 }
 0x181   : > { %5938 = vrot.lane.b32.xlu1 %v5937_v2, %s6706_s24  ;;  %5943 = vrot.lane.b32.xlu0 %v5942_v4, %s6706_s24  ;;  %v673_v9 = vld [vmem:[#allocation2 + $0x78] sm:$0xff] }
 0x182   : > { %v675_v6 = vld [vmem:[#allocation2 + $0x88] sm:$0xff]  ;;  %v6957_v10 = vld [vmem:[#allocation2 + $0x78] sm:$0xff]  ;;  %v5957_v13 = vpack.i.bf16 %v673_v9, %v670_v11 }
 0x183   : > { %v5952_v8 = vpack.i.bf16 %v675_v6, %v645_v61  ;;  %v5640_v14 = vpack.c.bf16 %v6957_v10, %v6961_v12  ;;  %v5396_v10 = vld [vmem:[%s8291_s4 + $0x2a0] sm:$0xff] }
 0x184   : > { %v5416_v12 = vld [vmem:[%s8291_s4 + $0x2c0] sm:$0xff] }
 0x185   : > { %5948 = vrot.lane.b32.xlu0 %v5947_v7, %s6706_s24  ;;  %5953 = vrot.lane.b32.xlu1 %v5952_v8, %s6706_s24 }
 0x189   : > { %5958 = vrot.lane.b32.xlu0 %v5957_v13, %s6706_s24  ;;  %5963 = vrot.lane.b32.xlu1 %v5917_v47, %s6707_s25 }
 0x18d   : > { %5968 = vrot.lane.b32.xlu0 %v5927_v56, %s6707_s25  ;;  %5973 = vrot.lane.b32.xlu1 %v5922_v53, %s6707_s25 }
 0x191   : > { %5978 = vrot.lane.b32.xlu0 %v5932_v62, %s6707_s25  ;;  %5988 = vrot.lane.b32.xlu1 %v5942_v4, %s6707_s25 }
 0x195   : > { %5983 = vrot.lane.b32.xlu0 %v5937_v2, %s6707_s25  ;;  %5993 = vrot.lane.b32.xlu1 %v5947_v7, %s6707_s25 }
 0x199   : > { %5998 = vrot.lane.b32.xlu0 %v5952_v8, %s6707_s25  ;;  %6003 = vrot.lane.b32.xlu1 %v5957_v13, %s6707_s25  ;;  %s8197_s25 = sand.u32 1, %s6693_s18  }
 0x19a   : > { %s5002_s15 = scalar_lea.sflag [#allocation5], %s8197_s25 }
 0x19d   : > { %6008 = vrot.lane.b32.xlu0 %v5917_v47, %s6708_s29  ;;  %6013 = vrot.lane.b32.xlu1 %v5927_v56, %s6708_s29 }
 0x1a1   : > { %6018 = vrot.lane.b32.xlu0 %v5922_v53, %s6708_s29  ;;  %6023 = vrot.lane.b32.xlu1 %v5932_v62, %s6708_s29 }
 0x1a5   : > { %6033 = vrot.lane.b32.xlu0 %v5942_v4, %s6708_s29  ;;  %6028 = vrot.lane.b32.xlu1 %v5937_v2, %s6708_s29 }
 0x1a9   : > { %6038 = vrot.lane.b32.xlu0 %v5947_v7, %s6708_s29  ;;  %6043 = vrot.lane.b32.xlu1 %v5952_v8, %s6708_s29 }
 0x1ad   : > { %6048 = vrot.lane.b32.xlu0 %v5957_v13, %s6708_s29  ;;  %1361 = vperm.xlu1 %5916, %v1335_v15   ;;  %s5142_s29 = sshll.u32 %s8197_s25, 4 }
 0x1ae   : > { %s398_s30 = scalar_lea.vmem [#allocation4], %s5142_s29 }
 0x1af   : > { %s5021_s13 = sshll.u32 %s398_s30, 4  ;;  %s8208_s13 = int_to_ptr.vmem [resolvable:$true] %s5021_s13 }
 0x1b0   : > { %p6614_p0 = scmp.lt.s32.totalorder %s8208_s13, %s6612_s22 }
 0x1b1   : > { %1366 = vperm.xlu0 %5915, %v1336_v16   ;;  %1371 = vperm.xlu1 %5916, %v1337_v17  }
 0x1b5   : > { %1376 = vperm.xlu0 %5915, %v1338_v18   ;;  %1341 = vperm.xlu1 %5916, %v1331_v19  }
 0x1b9   : > { %1346 = vperm.xlu0 %5915, %v1332_v20   ;;  %1351 = vperm.xlu1 %5916, %v1333_v21  }
 0x1bd   : > { %1356 = vperm.xlu0 %5915, %v1334_v22   ;;  %1477 = vperm.xlu1 %5916, %v1467_v23  }
 0x1c1   : > { %1482 = vperm.xlu0 %5915, %v1468_v24   ;;  %1487 = vperm.xlu1 %5916, %v1469_v25  }
 0x1c5   : > { %1492 = vperm.xlu0 %5915, %v1470_v26  }
 0x1e7   : > { %v5919_v27 = vpop.permute.xlu0 %5918 }
 0x1e8   : > { %v5921_v28 = vunpack.i.h.bf16 %v5919_v27  ;;  %v5920_v29 = vunpack.i.l.bf16 %v5919_v27 }
 0x1ea   : > { %v749_v36 = vsel %vm747_vm3, %v5920_v29, %v5921_v28 }
 0x1eb   : > { %v5929_v30 = vpop.permute.xlu1 %5928  ;;  %v5924_v31 = vpop.permute.xlu0 %5923 }
 0x1ec   : > { %v5931_v32 = vunpack.i.h.bf16 %v5929_v30  ;;  %v5930_v33 = vunpack.i.l.bf16 %v5929_v30  ;;  %v5926_v34 = vunpack.i.h.bf16 %v5924_v31  ;;  %v5925_v35 = vunpack.i.l.bf16 %v5924_v31 }
 0x1ee   : > { %v751_v37 = vsel %vm747_vm3, %v5930_v33, %v5931_v32  ;;  %v748_v38 = vsel %vm747_vm3, %v5925_v35, %v5920_v29  ;;  %v750_v39 = vsel %vm747_vm3, %v5926_v34, %v5930_v33  ;;  %v5152_v32 = vld [vmem:[%s8291_s4 + $0x40] sm:$0xff] }
 0x1ef   : > { %v5934_v40 = vpop.permute.xlu1 %5933  ;;  %v5486_v41 = vpack.c.bf16 %v751_v37, %v749_v36  ;;  %v5488_v42 = vpack.c.bf16 %v750_v39, %v748_v38 }
 0x1f0   : > { %v5936_v43 = vunpack.i.h.bf16 %v5934_v40  ;;  %v5935_v45 = vunpack.i.l.bf16 %v5934_v40 }
 0x1f1   : > { %5487 = vmatprep.subr.bf16.mxu1 %v5486_v41 }
 0x1f2   : > { %5489 = vmatpush1.bf16.msra.mxu1 %v5488_v42  ;;  %v753_v57 = vsel %vm747_vm3, %v5935_v45, %v5936_v43 }
 0x1f3   : > { %v5939_v47 = vpop.permute.xlu1 %5938  ;;  %v5944_v48 = vpop.permute.xlu0 %5943 }
 0x1f4   : > { %v5941_v52 = vunpack.i.h.bf16 %v5939_v47  ;;  %v5940_v53 = vunpack.i.l.bf16 %v5939_v47  ;;  %v5946_v55 = vunpack.i.h.bf16 %v5944_v48  ;;  %v5945_v56 = vunpack.i.l.bf16 %v5944_v48  ;;  %v5153_v47 = vld [vmem:[%s8291_s4 + $0x48] sm:$0xff] }
 0x1f6   : > { %v755_v59 = vsel %vm747_vm3, %v5945_v56, %v5946_v55  ;;  %v752_v61 = vsel %vm747_vm3, %v5940_v53, %v5935_v45  ;;  %v754_v62 = vsel %vm747_vm3, %v5941_v52, %v5945_v56 }
 0x1f7   : > { %v5954_v2 = vpop.permute.xlu1 %5953  ;;  %v5949_v4 = vpop.permute.xlu0 %5948  ;;  %v5490_v5 = vpack.c.bf16 %v755_v59, %v753_v57  ;;  %v5492_v6 = vpack.c.bf16 %v754_v62, %v752_v61  ;;  %v5154_v61 = vld [vmem:[%s8291_s4 + $0x50] sm:$0xff] }
 0x1f8   : > { %v5956_v7 = vunpack.i.h.bf16 %v5954_v2  ;;  %v5955_v8 = vunpack.i.l.bf16 %v5954_v2  ;;  %v5951_v9 = vunpack.i.h.bf16 %v5949_v4  ;;  %v5950_v11 = vunpack.i.l.bf16 %v5949_v4 }
 0x1f9   : > { %5491 = vmatprep.subr.bf16.mxu1 %v5490_v5 }
 0x1fa   : > { %5493 = vmatpush1.bf16.msra.mxu1 %v5492_v6  ;;  %v757_v13 = vsel %vm747_vm3, %v5950_v11, %v5951_v9  ;;  %v759_v15 = vsel %vm747_vm3, %v5955_v8, %v5956_v7 }
 0x1fb   : > { %v5964_v16 = vpop.permute.xlu1 %5963  ;;  %v5959_v17 = vpop.permute.xlu0 %5958  ;;  %v5494_v18 = vpack.c.bf16 %v759_v15, %v757_v13 }
 0x1fc   : > { %v5961_v19 = vunpack.i.h.bf16 %v5959_v17  ;;  %v5960_v20 = vunpack.i.l.bf16 %v5959_v17  ;;  %v5966_v21 = vunpack.i.h.bf16 %v5964_v16  ;;  %v5965_v22 = vunpack.i.l.bf16 %v5964_v16  ;;  %v5155_v16 = vld [vmem:[%s8291_s4 + $0x58] sm:$0xff] }
 0x1fd   : > { %5495 = vmatprep.subr.bf16.mxu1 %v5494_v18 }
 0x1fe   : > { %v756_v23 = vsel %vm747_vm3, %v5960_v20, %v5950_v11  ;;  %v758_v24 = vsel %vm747_vm3, %v5961_v19, %v5955_v8  ;;  %v948_v35 = vsel %vm946_vm4, %v5965_v22, %v5966_v21 }
 0x1ff   : > { %v5974_v25 = vpop.permute.xlu1 %5973  ;;  %v5969_v26 = vpop.permute.xlu0 %5968  ;;  %v5496_v27 = vpack.c.bf16 %v758_v24, %v756_v23 }
 0x200   : > { %v5976_v28 = vunpack.i.h.bf16 %v5974_v25  ;;  %v5975_v29 = vunpack.i.l.bf16 %v5974_v25  ;;  %v5971_v30 = vunpack.i.h.bf16 %v5969_v26  ;;  %v5970_v31 = vunpack.i.l.bf16 %v5969_v26 }
 0x201   : > { %5497 = vmatpush1.bf16.msra.mxu1 %v5496_v27 }
 0x202   : > { %v947_v33 = vsel %vm946_vm4, %v5975_v29, %v5965_v22  ;;  %v949_v34 = vsel %vm946_vm4, %v5976_v28, %v5970_v31  ;;  %v950_v36 = vsel %vm946_vm4, %v5970_v31, %v5971_v30  ;;  %v5156_v29 = vld [vmem:[%s8291_s4 + $0x60] sm:$0xff] }
 0x203   : > { %v5989_v37 = vpop.permute.xlu1 %5988  ;;  %v5979_v38 = vpop.permute.xlu0 %5978  ;;  %v5498_v39 = vpack.c.bf16 %v950_v36, %v948_v35  ;;  %v5500_v40 = vpack.c.bf16 %v949_v34, %v947_v33  ;;  %v5157_v35 = vld [vmem:[%s8291_s4 + $0x68] sm:$0xff] }
 0x204   : > { %v5991_v41 = vunpack.i.h.bf16 %v5989_v37  ;;  %v5990_v42 = vunpack.i.l.bf16 %v5989_v37  ;;  %v5981_v43 = vunpack.i.h.bf16 %v5979_v38  ;;  %v5980_v45 = vunpack.i.l.bf16 %v5979_v38  ;;  %5160 = vmatmul.mubr.msk.f32.vlgmr.msra.gmra.mrb[0].mxu1 %vm772_vm5, %v5152_v32  ;;  %v5158_v38 = vld [vmem:[%s8291_s4 + $0x70] sm:$0xff] }
 0x205   : > { %5499 = vmatprep.subr.bf16.mxu1 %v5498_v39  ;;  %867 = vmatprep.mubr.f32.mxu1 %v6703_v0 }
 0x206   : > { %5501 = vmatpush1.bf16.msra.mxu1 %v5500_v40  ;;  %v952_v48 = vsel %vm946_vm4, %v5980_v45, %v5981_v43  ;;  %v954_v52 = vsel %vm946_vm4, %v5990_v42, %v5991_v41 }
 0x207   : > { %v5994_v53 = vpop.permute.xlu1 %5993  ;;  %v5984_v55 = vpop.permute.xlu0 %5983  ;;  %v5502_v56 = vpack.c.bf16 %v954_v52, %v952_v48 }
 0x208   : > { %v5986_v57 = vunpack.i.h.bf16 %v5984_v55  ;;  %v5985_v59 = vunpack.i.l.bf16 %v5984_v55  ;;  %5161 = vmatmul.mubr.msk.f32.gmra.mrb[2].mxu1 %vm772_vm5, %v5153_v47  ;;  %v5996_v62 = vunpack.i.h.bf16 %v5994_v53  ;;  %v5995_v2 = vunpack.i.l.bf16 %v5994_v53 }
 0x209   : > { %5503 = vmatprep.subr.bf16.mxu1 %v5502_v56  ;;  %873 = vmatprep.mubr.f32.mxu1 %v6703_v0 }
 0x20a   : > { %v953_v4 = vsel %vm946_vm4, %v5986_v57, %v5990_v42  ;;  %v951_v5 = vsel %vm946_vm4, %v5985_v59, %v5980_v45  ;;  %v956_v19 = vsel %vm946_vm4, %v5995_v2, %v5996_v62  ;;  %v5159_v45 = vld [vmem:[%s8291_s4 + $0x78] sm:$0xff] }
 0x20b   : > { %v6004_v6 = vpop.permute.xlu1 %6003  ;;  %v5999_v7 = vpop.permute.xlu0 %5998  ;;  %v5504_v8 = vpack.c.bf16 %v953_v4, %v951_v5 }
 0x20c   : > { %v6006_v9 = vunpack.i.h.bf16 %v6004_v6  ;;  %v6005_v11 = vunpack.i.l.bf16 %v6004_v6  ;;  %v6001_v13 = vunpack.i.h.bf16 %v5999_v7  ;;  %v6000_v15 = vunpack.i.l.bf16 %v5999_v7  ;;  %5162 = vmatmul.mubr.msk.f32.gmra.mrb[4].mxu1 %vm772_vm5, %v5154_v61  ;;  %v676_v6 = vld [vmem:[%s8291_s4] sm:$0xff] }
 0x20d   : > { %5505 = vmatpush1.bf16.msra.mxu1 %v5504_v8  ;;  %879 = vmatprep.mubr.f32.mxu1 %v6703_v0 }
 0x20e   : > { %v955_v17 = vsel %vm946_vm4, %v6005_v11, %v5995_v2  ;;  %v957_v18 = vsel %vm946_vm4, %v6006_v9, %v6000_v15  ;;  %v958_v20 = vsel %vm946_vm4, %v6000_v15, %v6001_v13 }
 0x20f   : > { %v6014_v21 = vpop.permute.xlu1 %6013  ;;  %v6009_v22 = vpop.permute.xlu0 %6008  ;;  %v5506_v23 = vpack.c.bf16 %v958_v20, %v956_v19  ;;  %v5508_v24 = vpack.c.bf16 %v957_v18, %v955_v17  ;;  %v677_v17 = vld [vmem:[%s8291_s4 + $0x8] sm:$0xff] }
 0x210   : > { %v6016_v25 = vunpack.i.h.bf16 %v6014_v21  ;;  %v6015_v26 = vunpack.i.l.bf16 %v6014_v21  ;;  %v6011_v27 = vunpack.i.h.bf16 %v6009_v22  ;;  %v6010_v28 = vunpack.i.l.bf16 %v6009_v22  ;;  %5163 = vmatmul.mubr.msk.f32.gmra.mrb[6].mxu1 %vm772_vm5, %v5155_v16 }
 0x211   : > { %5507 = vmatprep.subr.bf16.mxu1 %v5506_v23  ;;  %885 = vmatprep.mubr.f32.mxu1 %v6703_v0 }
 0x212   : > { %5509 = vmatpush1.bf16.msra.mxu1 %v5508_v24  ;;  %v1155_v30 = vsel %vm1153_vm6, %v6010_v28, %v6011_v27  ;;  %v1157_v31 = vsel %vm1153_vm6, %v6015_v26, %v6016_v25  ;;  %v678_v24 = vld [vmem:[%s8291_s4 + $0x10] sm:$0xff]  ;;  %v680_v27 = vld [vmem:[%s8291_s4 + $0x20] sm:$0xff] }
 0x213   : > { %v6024_v32 = vpop.permute.xlu1 %6023  ;;  %v6019_v33 = vpop.permute.xlu0 %6018  ;;  %v5510_v34 = vpack.c.bf16 %v1157_v31, %v1155_v30  ;;  %v683_v30 = vld [vmem:[%s8291_s4 + $0x38] sm:$0xff]  ;;  %v5176_v31 = vld [vmem:[%s8291_s4 + $0x80] sm:$0xff] }
 0x214   : > { %5164 = vmatmul.mubr.msk.f32.gmra.mrb[8].mxu1 %vm772_vm5, %v5156_v29  ;;  %v6021_v40 = vunpack.i.h.bf16 %v6019_v33  ;;  %v6020_v41 = vunpack.i.l.bf16 %v6019_v33  ;;  %v6026_v48 = vunpack.i.h.bf16 %v6024_v32  ;;  %v6025_v52 = vunpack.i.l.bf16 %v6024_v32  ;;  %v682_v29 = vld [vmem:[%s8291_s4 + $0x30] sm:$0xff]  ;;  %v5177_v32 = vld [vmem:[%s8291_s4 + $0x88] sm:$0xff] }
 0x215   : > { %5511 = vmatprep.subr.bf16.mxu1 %v5510_v34  ;;  %891 = vmatprep.mubr.f32.mxu1 %v6703_v0  ;;  %v5178_v33 = vld [vmem:[%s8291_s4 + $0x90] sm:$0xff]  ;;  %v5179_v34 = vld [vmem:[%s8291_s4 + $0x98] sm:$0xff] }
 0x216   : > { %v1156_v55 = vsel %vm1153_vm6, %v6021_v40, %v6015_v26  ;;  %v1154_v56 = vsel %vm1153_vm6, %v6020_v41, %v6010_v28  ;;  %v1159_v9 = vsel %vm1153_vm6, %v6025_v52, %v6026_v48  ;;  %v679_v26 = vld [vmem:[%s8291_s4 + $0x18] sm:$0xff]  ;;  %v681_v28 = vld [vmem:[%s8291_s4 + $0x28] sm:$0xff] }
 0x217   : > { %v6034_v36 = vpop.permute.xlu0 %6033  ;;  %v6029_v37 = vpop.permute.xlu1 %6028  ;;  %v5512_v8 = vpack.c.bf16 %v1156_v55, %v1154_v56 }
 0x218   : > { %5165 = vmatmul.mubr.msk.f32.gmra.mrb[10].mxu1 %vm772_vm5, %v5157_v35  ;;  %v6036_v42 = vunpack.i.h.bf16 %v6034_v36  ;;  %v6035_v43 = vunpack.i.l.bf16 %v6034_v36  ;;  %v6030_v53 = vunpack.i.l.bf16 %v6029_v37  ;;  %v6031_v57 = vunpack.i.h.bf16 %v6029_v37  ;;  %v5180_v35 = vld [vmem:[%s8291_s4 + $0xa0] sm:$0xff]  ;;  %v5181_v36 = vld [vmem:[%s8291_s4 + $0xa8] sm:$0xff]  ;;  %v5182_v37 = vld [vmem:[%s8291_s4 + $0xb0] sm:$0xff] }
 0x219   : > { %897 = vmatprep.mubr.f32.mxu1 %v6703_v0 }
 0x21a   : > { %v1161_v59 = vsel %vm1153_vm6, %v6035_v43, %v6036_v42  ;;  %v1158_v7 = vsel %vm1153_vm6, %v6030_v53, %v6025_v52  ;;  %v1160_v11 = vsel %vm1153_vm6, %v6031_v57, %v6035_v43 }
 0x21b   : > { %v6039_v39 = vpop.permute.xlu0 %6038  ;;  %v6044_v47 = vpop.permute.xlu1 %6043  ;;  %v5514_v16 = vpack.c.bf16 %v1161_v59, %v1159_v9  ;;  %v5516_v20 = vpack.c.bf16 %v1160_v11, %v1158_v7 }
 0x21c   : > { %5166 = vmatmul.mubr.msk.f32.gmra.mrb[12].mxu1 %vm772_vm5, %v5158_v38  ;;  %v6046_v61 = vunpack.i.h.bf16 %v6044_v47  ;;  %v6045_v62 = vunpack.i.l.bf16 %v6044_v47  ;;  %v6041_v2 = vunpack.i.h.bf16 %v6039_v39  ;;  %v6040_v4 = vunpack.i.l.bf16 %v6039_v39  ;;  %v5183_v38 = vld [vmem:[%s8291_s4 + $0xb8] sm:$0xff] }
 0x21d   : > { %903 = vmatprep.mubr.f32.mxu1 %v6703_v0 }
 0x21e   : > { %v1163_v18 = vsel %vm1153_vm6, %v6040_v4, %v6041_v2  ;;  %v1165_v19 = vsel %vm1153_vm6, %v6045_v62, %v6046_v61 }
 0x21f   : > { %v6049_v5 = vpop.permute.xlu0 %6048  ;;  %v5518_v23 = vpack.c.bf16 %v1165_v19, %v1163_v18 }
 0x220   : > { %5167 = vmatmul.mubr.msk.f32.gmra.mrb[14].mxu1 %vm772_vm5, %v5159_v45  ;;  %v6051_v13 = vunpack.i.h.bf16 %v6049_v5  ;;  %v6050_v15 = vunpack.i.l.bf16 %v6049_v5 }
 0x221   : > { %1059 = vmatprep.mubr.f32.mxu1 %v6703_v0 }
 0x222   : > { %v1164_v21 = vsel %vm1153_vm6, %v6051_v13, %v6045_v62  ;;  %v1162_v22 = vsel %vm1153_vm6, %v6050_v15, %v6040_v4 }
 0x223   : > { %v5520_v25 = vpack.c.bf16 %v1164_v21, %v1162_v22 }
 0x224   : > { %5168 = vmatmul.mubr.msk.f32.vlgmr.msra.gmra.mrb[0].mxu1 %vm772_vm5, %v676_v6 }
 0x225   : > { %5513 = vmatpush1.bf16.msra.mxu1 %v5512_v8  ;;  %1065 = vmatprep.mubr.f32.mxu1 %v6703_v0 }
 0x226   : > { %5515 = vmatprep.subr.bf16.mxu1 %v5514_v16 }
 0x228   : > { %5169 = vmatmul.mubr.msk.f32.gmra.mrb[2].mxu1 %vm772_vm5, %v677_v17 }
 0x229   : > { %5517 = vmatpush1.bf16.msra.mxu1 %v5516_v20  ;;  %1071 = vmatprep.mubr.f32.mxu1 %v6703_v0 }
 0x22a   : > { %5519 = vmatprep.subr.bf16.mxu1 %v5518_v23 }
 0x22c   : > { %5170 = vmatmul.mubr.msk.f32.gmra.mrb[4].mxu1 %vm772_vm5, %v678_v24  ;;  %v1362_v47 = vpop.permute.xlu1 %1361 }
 0x22d   : > { %5521 = vmatpush1.bf16.msra.mxu1 %v5520_v25  ;;  %1077 = vmatprep.mubr.f32.mxu1 %v6703_v0 }
 0x230   : > { %5171 = vmatmul.mubr.msk.f32.gmra.mrb[6].mxu1 %vm772_vm5, %v679_v26  ;;  %v1367_v53 = vpop.permute.xlu0 %1366  ;;  %v1372_v56 = vpop.permute.xlu1 %1371 }
 0x231   : > { %1083 = vmatprep.mubr.f32.mxu1 %v6703_v0 }
 0x234   : > { %5172 = vmatmul.mubr.msk.f32.gmra.mrb[8].mxu1 %vm772_vm5, %v680_v27  ;;  %v1377_v5 = vpop.permute.xlu0 %1376  ;;  %v1342_v9 = vpop.permute.xlu1 %1341 }
 0x235   : > { %1089 = vmatprep.mubr.f32.mxu1 %v6703_v0 }
 0x238   : > { %5173 = vmatmul.mubr.msk.f32.gmra.mrb[10].mxu1 %vm772_vm5, %v681_v28  ;;  %v1347_v20 = vpop.permute.xlu0 %1346 }
 0x239   : > { %1095 = vmatprep.mubr.f32.mxu1 %v6703_v0 }
 0x23c   : > { %5174 = vmatmul.mubr.msk.f32.gmra.mrb[12].mxu1 %vm772_vm5, %v682_v29 }
 0x23d   : > { %1101 = vmatprep.mubr.f32.mxu1 %v6703_v0 }
 0x240   : > { %5175 = vmatmul.mubr.msk.f32.gmra.mrb[14].mxu1 %vm772_vm5, %v683_v30 }
 0x241   : > { %1266 = vmatprep.mubr.f32.mxu1 %v6703_v0 }
 0x244   : > { %5184 = vmatmul.mubr.msk.f32.vlgmr.msra.gmra.mrb[0].mxu1 %vm772_vm5, %v5176_v31 }
 0x245   : > { %1272 = vmatprep.mubr.f32.mxu1 %v6703_v0 }
 0x248   : > { %5185 = vmatmul.mubr.msk.f32.gmra.mrb[2].mxu1 %vm772_vm5, %v5177_v32 }
 0x249   : > { %1278 = vmatprep.mubr.f32.mxu1 %v6703_v0 }
 0x24c   : > { %5186 = vmatmul.mubr.msk.f32.gmra.mrb[4].mxu1 %vm772_vm5, %v5178_v33 }
 0x24d   : > { %1284 = vmatprep.mubr.f32.mxu1 %v6703_v0 }
 0x250   : > { %5187 = vmatmul.mubr.msk.f32.gmra.mrb[6].mxu1 %vm772_vm5, %v5179_v34 }
 0x251   : > { %1290 = vmatprep.mubr.f32.mxu1 %v6703_v0 }
 0x254   : > { %5188 = vmatmul.mubr.msk.f32.gmra.mrb[8].mxu1 %vm772_vm5, %v5180_v35 }
 0x255   : > { %1296 = vmatprep.mubr.f32.mxu1 %v6703_v0 }
 0x258   : > { %5189 = vmatmul.mubr.msk.f32.gmra.mrb[10].mxu1 %vm772_vm5, %v5181_v36 }
 0x259   : > { %1302 = vmatprep.mubr.f32.mxu1 %v6703_v0 }
 0x25c   : > { %5190 = vmatmul.mubr.msk.f32.gmra.mrb[12].mxu1 %vm772_vm5, %v5182_v37  ;;  %v1352_v37 = vpop.permute.xlu1 %1351 }
 0x25d   : > { %1308 = vmatprep.mubr.f32.mxu1 %v6703_v0 }
 0x260   : > { %5191 = vmatmul.mubr.msk.f32.gmra.mrb[14].mxu1 %vm772_vm5, %v5183_v38 }
 0x261   : > { %3051 = vmatprep.mubr.f32.mxu1 %v6703_v0 }
 0x317   : > { %v1268_v39 = vpop.f32.mrb[0].mxu1 }
 0x318   : > { %v1270_v40 = vpop.f32.mrb[1].mxu1  ;;  %v1379_v13 = vadd.f32 %v1342_v9, %v1268_v39 }
 0x319   : > { %v1380_v21 = vadd.f32 %v1342_v9, %v1270_v40 }
 0x31b   : > { %v1274_v41 = vpop.f32.mrb[2].mxu1 }
 0x31c   : > { %v1276_v42 = vpop.f32.mrb[3].mxu1  ;;  %v1381_v23 = vadd.f32 %v1347_v20, %v1274_v41 }
 0x31d   : > { %v1382_v34 = vadd.f32 %v1347_v20, %v1276_v42 }
 0x31f   : > { %v1280_v43 = vpop.f32.mrb[4].mxu1 }
 0x320   : > { %v1282_v45 = vpop.f32.mrb[5].mxu1  ;;  %v1383_v39 = vadd.f32 %v1352_v37, %v1280_v43 }
 0x321   : > { %v1384_v41 = vadd.f32 %v1352_v37, %v1282_v45  ;;  %v1478_v37 = vpop.permute.xlu1 %1477 }
 0x323   : > { %v7158_v48 = vpop.f32.mrb[6].mxu1 }
 0x324   : > { %v7160_v52 = vpop.f32.mrb[7].mxu1 }
 0x327   : > { %v1292_v55 = vpop.f32.mrb[8].mxu1 }
 0x328   : > { %v1387_v57 = vadd.f32 %v1362_v47, %v1292_v55  ;;  %v1294_v59 = vpop.f32.mrb[9].mxu1 }
 0x329   : > { %v1388_v61 = vadd.f32 %v1362_v47, %v1294_v59 }
 0x32a   : > { %v5192_v62 = vmul.f32 -1.442695, %v1387_v57  ;;  %v1357_v57 = vpop.permute.xlu0 %1356 }
 0x32b   : > { %v5193_v2 = vmul.f32 -1.442695, %v1388_v61  ;;  %v1298_v4 = vpop.f32.mrb[10].mxu1  ;;  %v1385_v61 = vadd.f32 %v1357_v57, %v7158_v48  ;;  %v1386_v45 = vadd.f32 %v1357_v57, %v7160_v52 }
 0x32c   : > { %6412 = vpow2.f32 %v5192_v62  ;;  %v1389_v6 = vadd.f32 %v1367_v53, %v1298_v4  ;;  %v1300_v7 = vpop.f32.mrb[11].mxu1 }
 0x32d   : > { %6414 = vpow2.f32 %v5193_v2  ;;  %v1390_v8 = vadd.f32 %v1367_v53, %v1300_v7 }
 0x32e   : > { %v5194_v11 = vmul.f32 -1.442695, %v1389_v6 }
 0x32f   : > { %v5195_v15 = vmul.f32 -1.442695, %v1390_v8  ;;  %v1304_v16 = vpop.f32.mrb[12].mxu1 }
 0x330   : > { %6416 = vpow2.f32 %v5194_v11  ;;  %v1391_v17 = vadd.f32 %v1372_v56, %v1304_v16  ;;  %v1306_v18 = vpop.f32.mrb[13].mxu1 }
 0x331   : > { %6418 = vpow2.f32 %v5195_v15  ;;  %v1392_v19 = vadd.f32 %v1372_v56, %v1306_v18 }
 0x332   : > { %v5196_v22 = vmul.f32 -1.442695, %v1391_v17  ;;  %6420 = vtanh.f32 %v1379_v13 }
 0x333   : > { %v5197_v24 = vmul.f32 -1.442695, %v1392_v19  ;;  %v1310_v25 = vpop.f32.mrb[14].mxu1 }
 0x334   : > { %6422 = vpow2.f32 %v5196_v22  ;;  %v1393_v26 = vadd.f32 %v1377_v5, %v1310_v25  ;;  %v1312_v27 = vpop.f32.mrb[15].mxu1 }
 0x335   : > { %6424 = vpow2.f32 %v5197_v24  ;;  %v1394_v28 = vadd.f32 %v1377_v5, %v1312_v27 }
 0x336   : > { %v6413_v29 = vpop.eup %6412  ;;  %6426 = vtanh.f32 %v1380_v21  ;;  %v5198_v30 = vmul.f32 -1.442695, %v1393_v26 }
 0x337   : > { %v6415_v31 = vpop.eup %6414  ;;  %6428 = vtanh.f32 %v1381_v23  ;;  %v1427_v32 = vadd.f32 1.0, %v6413_v29  ;;  %v5199_v33 = vmul.f32 -1.442695, %v1394_v28 }
 0x338   : > { %v1428_v35 = vadd.f32 1.0, %v6415_v31  ;;  %6430 = vpow2.f32 %v5198_v30 }
 0x339   : > { %6432 = vrcp.f32 %v1427_v32 }
 0x33a   : > { %v6417_v36 = vpop.eup %6416  ;;  %6434 = vrcp.f32 %v1428_v35  ;;  %v1461_v35 = vld [vmem:[%s8293_s6 + $0x10] sm:$0xff] }
 0x33b   : > { %v6419_v38 = vpop.eup %6418  ;;  %v1429_v40 = vadd.f32 1.0, %v6417_v36  ;;  %6436 = vpow2.f32 %v5199_v33  ;;  %v1459_v33 = vld [vmem:[%s8293_s6] sm:$0xff]  ;;  %v1462_v36 = vld [vmem:[%s8293_s6 + $0x18] sm:$0xff] }
 0x33c   : > { %6438 = vtanh.f32 %v1382_v34  ;;  %v1430_v47 = vadd.f32 1.0, %v6419_v38  ;;  %v6421_v53 = vpop.eup %6420  ;;  %v1460_v34 = vld [vmem:[%s8293_s6 + $0x8] sm:$0xff] }
 0x33d   : > { %6440 = vrcp.f32 %v1429_v40 }
 0x33e   : > { %v6423_v55 = vpop.eup %6422  ;;  %6442 = vrcp.f32 %v1430_v47  ;;  %v1483_v47 = vpop.permute.xlu0 %1482 }
 0x33f   : > { %v6425_v56 = vpop.eup %6424  ;;  %6444 = vtanh.f32 %v1383_v39  ;;  %v1431_v42 = vadd.f32 1.0, %v6423_v55 }
 0x340   : > { %v6427_v59 = vpop.eup %6426  ;;  %6446 = vtanh.f32 %v1384_v41  ;;  %v1432_v62 = vadd.f32 1.0, %v6425_v56 }
 0x341   : > { %v6429_v2 = vpop.eup %6428  ;;  %6448 = vrcp.f32 %v1431_v42  ;;  %v1488_v42 = vpop.permute.xlu1 %1487 }
 0x342   : > { %v6431_v43 = vpop.eup %6430  ;;  %6450 = vrcp.f32 %v1432_v62 }
 0x343   : > { %v6433_v4 = vpop.eup %6432  ;;  %v1433_v5 = vadd.f32 1.0, %v6431_v43  ;;  %6452 = vtanh.f32 %v1385_v61  ;;  %v1493_v43 = vpop.permute.xlu0 %1492 }
 0x344   : > { %v6435_v6 = vpop.eup %6434  ;;  %v1451_v7 = vmul.f32 %v6433_v4, %v6421_v53 }
 0x345   : > { %v6437_v8 = vpop.eup %6436  ;;  %6454 = vrcp.f32 %v1433_v5  ;;  %v1452_v9 = vmul.f32 %v6435_v6, %v6427_v59 }
 0x346   : > { %v6439_v11 = vpop.eup %6438  ;;  %v1434_v13 = vadd.f32 1.0, %v6437_v8  ;;  %6456 = vtanh.f32 %v1386_v45 }
 0x347   : > { %v6441_v15 = vpop.eup %6440 }
 0x348   : > { %v6443_v48 = vpop.eup %6442  ;;  %6458 = vrcp.f32 %v1434_v13  ;;  %v1453_v16 = vmul.f32 %v6441_v15, %v6429_v2 }
 0x349   : > { %v6445_v17 = vpop.eup %6444  ;;  %v1454_v18 = vmul.f32 %v6443_v48, %v6439_v11 }
 0x34a   : > { %v6447_v19 = vpop.eup %6446  ;;  %v5524_v20 = vpack.c.bf16 %v1453_v16, %v1451_v7 }
 0x34b   : > { %v6449_v21 = vpop.eup %6448  ;;  %v5522_v52 = vpack.c.bf16 %v1454_v18, %v1452_v9 }
 0x34c   : > { %v6451_v22 = vpop.eup %6450  ;;  %v1455_v23 = vmul.f32 %v6449_v21, %v6445_v17 }
 0x34d   : > { %5523 = vmatprep.subr.bf16.mxu0 %v5522_v52  ;;  %v1456_v24 = vmul.f32 %v6451_v22, %v6447_v19  ;;  %v6453_v25 = vpop.eup %6452 }
 0x34e   : > { %5525 = vmatpush1.bf16.msra.mxu0 %v5524_v20 }
 0x34f   : > { %v6455_v26 = vpop.eup %6454 }
 0x350   : > { %v1457_v27 = vmul.f32 %v6455_v26, %v6453_v25  ;;  %v6457_v28 = vpop.eup %6456 }
 0x352   : > { %v6459_v29 = vpop.eup %6458  ;;  %v5528_v30 = vpack.c.bf16 %v1457_v27, %v1455_v23 }
 0x353   : > { %v1458_v31 = vmul.f32 %v6459_v29, %v6457_v28 }
 0x355   : > { %v5526_v32 = vpack.c.bf16 %v1458_v31, %v1456_v24  ;;  %v1663_v24 = vld [vmem:[#allocation2 + $0x50] sm:$0xff] }
 0x357   : > { %5527 = vmatprep.subr.bf16.mxu0 %v5526_v32 }
 0x358   : > { %5529 = vmatpush1.bf16.msra.mxu0 %v5528_v30  ;;  %v1464_v30 = vld [vmem:[%s8293_s6 + $0x28] sm:$0xff] }
 0x35b   : > { %5200 = vmatmul.mubr.msk.f32.vlgmr.msra.gmra.mrb[8].mxu0 %vm1515_vm7, %v1459_v33  ;;  %v1465_v33 = vld [vmem:[%s8293_s6 + $0x30] sm:$0xff] }
 0x35c   : > { %1610 = vmatprep.mubr.f32.mxu0 %v6703_v0 }
 0x35f   : > { %5201 = vmatmul.mubr.msk.f32.gmra.mrb[10].mxu0 %vm1515_vm7, %v1460_v34 }
 0x360   : > { %1616 = vmatprep.mubr.f32.mxu0 %v6703_v0 }
 0x363   : > { %5202 = vmatmul.mubr.msk.f32.gmra.mrb[12].mxu0 %vm1515_vm7, %v1461_v35 }
 0x364   : > { %1622 = vmatprep.mubr.f32.mxu0 %v6703_v0 }
 0x367   : > { %5203 = vmatmul.mubr.msk.f32.gmra.mrb[14].mxu0 %vm1515_vm7, %v1462_v36 }
 0x368   : > { %1628 = vmatprep.mubr.f32.mxu0 %v6703_v0 }
 0x42e   : > { %v1606_v38 = vpop.f32.mrb[8].mxu0 }
 0x42f   : > { %v1607_v39 = vadd.f32 %v1606_v38, %v1478_v37  ;;  %v1608_v40 = vpop.f32.mrb[9].mxu0 }
 0x430   : > { %v1609_v41 = vadd.f32 %v1608_v40, %v1478_v37  ;;  %v1769_v40 = vld [vmem:[#allocation2 + $0x80] sm:$0xff] }
 0x431   : > { %1673 = vrot.lane.b32.xlu1 %v1607_v39, %s6705_s26  ;;  %v1466_v39 = vld [vmem:[%s8293_s6 + $0x38] sm:$0xff] }
 0x432   : > { %v1612_v53 = vpop.f32.mrb[10].mxu0  ;;  %1675 = vrot.lane.b32.xlu0 %v1609_v41, %s6705_s26  ;;  %v1766_v41 = vld [vmem:[#allocation2 + $0x68] sm:$0xff] }
 0x433   : > { %v1613_v55 = vadd.f32 %v1612_v53, %v1483_v47  ;;  %v1614_v56 = vpop.f32.mrb[11].mxu0  ;;  %v6604_v53 = vld [vmem:[#allocation2 + $0x88] sm:$0xff] }
 0x434   : > { %v1615_v57 = vadd.f32 %v1614_v56, %v1483_v47  ;;  %v1767_v47 = vld [vmem:[#allocation2 + $0x70] sm:$0xff] }
 0x435   : > { %1677 = vrot.lane.b32.xlu1 %v1613_v55, %s6705_s26  ;;  %v6087_v55 = vpack.i.bf16 %v6604_v53, %v1769_v40  ;;  %v6082_v56 = vpack.i.bf16 %v1767_v47, %v1766_v41 }
 0x436   : > { %v1618_v59 = vpop.f32.mrb[12].mxu0  ;;  %1679 = vrot.lane.b32.xlu0 %v1615_v57, %s6705_s26  ;;  %v1768_v57 = vld [vmem:[#allocation2 + $0x78] sm:$0xff] }
 0x437   : > { %v1619_v61 = vadd.f32 %v1618_v59, %v1488_v42  ;;  %v1620_v62 = vpop.f32.mrb[13].mxu0 }
 0x438   : > { %v1621_v2 = vadd.f32 %v1620_v62, %v1488_v42  ;;  %v1765_v42 = vld [vmem:[#allocation2 + $0x60] sm:$0xff]  ;;  %v5262_v62 = vld [vmem:[%s8292_s5 + $0x70] sm:$0xff] }
 0x439   : > { %1681 = vrot.lane.b32.xlu1 %v1619_v61, %s6705_s26  ;;  %v6092_v59 = vpack.i.bf16 %v1768_v57, %v1765_v42  ;;  %v5260_v61 = vld [vmem:[%s8292_s5 + $0x60] sm:$0xff] }
 0x43a   : > { %v1624_v4 = vpop.f32.mrb[14].mxu0  ;;  %1683 = vrot.lane.b32.xlu0 %v1621_v2, %s6705_s26  ;;  %v5261_v2 = vld [vmem:[%s8292_s5 + $0x68] sm:$0xff] }
 0x43b   : > { %v1625_v45 = vadd.f32 %v1624_v4, %v1493_v43  ;;  %v1626_v5 = vpop.f32.mrb[15].mxu0  ;;  %v5263_v4 = vld [vmem:[%s8292_s5 + $0x78] sm:$0xff] }
 0x43c   : > { %v1627_v6 = vadd.f32 %v1626_v5, %v1493_v43  ;;  %v5256_v43 = vld [vmem:[%s8292_s5 + $0x40] sm:$0xff]  ;;  %v5257_v5 = vld [vmem:[%s8292_s5 + $0x48] sm:$0xff] }
 0x43d   : > { %1685 = vrot.lane.b32.xlu1 %v1625_v45, %s6705_s26  ;;  %v5258_v45 = vld [vmem:[%s8292_s5 + $0x50] sm:$0xff] }
 0x43e   : > { %1687 = vrot.lane.b32.xlu0 %v1627_v6, %s6705_s26  ;;  %v5280_v6 = vld [vmem:[%s8294_s7 + $0x40] sm:$0xff] }
 0x4a3   : > { %v1674_v7 = vpop.permute.xlu1 %1673 }
 0x4a4   : > { %v1705_v8 = vadd.f32 %v1674_v7, %v6916_v49  ;;  %v1676_v9 = vpop.permute.xlu0 %1675 }
 0x4a5   : > { %v1689_v11 = vsel %vm473_vm0, %v1674_v7, %v1676_v9  ;;  %v1707_v13 = vadd.f32 %v1676_v9, %v6910_v46  ;;  %v5259_v7 = vld [vmem:[%s8292_s5 + $0x58] sm:$0xff]  ;;  %v5281_v9 = vld [vmem:[%s8294_s7 + $0x48] sm:$0xff] }
 0x4a6   : > { %1717 = vst.msk [vmem:[#allocation2] sm:$0xff] %vm615_vm2, %v1705_v8  ;;  %v1706_v15 = vadd.f32 %v1689_v11, %v6907_v44  ;;  %v5282_v8 = vld [vmem:[%s8294_s7 + $0x50] sm:$0xff]  ;;  %v5283_v11 = vld [vmem:[%s8294_s7 + $0x58] sm:$0xff] }
 0x4a7   : > { %1719 = vst.msk [vmem:[#allocation2 + $0x10] sm:$0xff] %vm473_vm0, %v1707_v13  ;;  %v1678_v48 = vpop.permute.xlu1 %1677 }
 0x4a8   : > { %1718 = vst [vmem:[#allocation2 + $0x8] sm:$0xff] %v1706_v15  ;;  %v1708_v16 = vadd.f32 %v1678_v48, %v6918_v50  ;;  %v1680_v17 = vpop.permute.xlu0 %1679 }
 0x4a9   : > { %v1690_v18 = vsel %vm473_vm0, %v1678_v48, %v1680_v17  ;;  %v1710_v49 = vadd.f32 %v1680_v17, %v6926_v54 }
 0x4aa   : > { %1720 = vst.msk [vmem:[#allocation2 + $0x18] sm:$0xff] %vm615_vm2, %v1708_v16  ;;  %v1709_v19 = vadd.f32 %v1690_v18, %v6921_v51 }
 0x4ab   : > { %1722 = vst.msk [vmem:[#allocation2 + $0x28] sm:$0xff] %vm473_vm0, %v1710_v49  ;;  %v1682_v46 = vpop.permute.xlu1 %1681 }
 0x4ac   : > { %1721 = vst [vmem:[#allocation2 + $0x20] sm:$0xff] %v1709_v19  ;;  %v1711_v44 = vadd.f32 %v1682_v46, %v6945_v63  ;;  %v1684_v20 = vpop.permute.xlu0 %1683  ;;  %v1463_v63 = vld [vmem:[%s8293_s6 + $0x20] sm:$0xff] }
 0x4ad   : > { %v1691_v21 = vsel %vm473_vm0, %v1682_v46, %v1684_v20  ;;  %v1713_v50 = vadd.f32 %v1684_v20, %v6938_v60  ;;  %5204 = vmatmul.mubr.msk.f32.gmra.mrb[16].mxu0 %vm1515_vm7, %v1463_v63  ;;  %v7224_v26 = vld [vmem:[#allocation2] sm:$0xff] }
 0x4ae   : > { %1723 = vst.msk [vmem:[#allocation2 + $0x30] sm:$0xff] %vm615_vm2, %v1711_v44  ;;  %v1712_v52 = vadd.f32 %v1691_v21, %v6935_v58  ;;  %v7209_v54 = vld [vmem:[#allocation2 + $0x10] sm:$0xff]  ;;  %1634 = vmatprep.mubr.f32.mxu0 %v6703_v0 }
 0x4af   : > { %1725 = vst.msk [vmem:[#allocation2 + $0x40] sm:$0xff] %vm473_vm0, %v1713_v50  ;;  %v1686_v51 = vpop.permute.xlu1 %1685  ;;  %v7213_v22 = vpack.i.bf16 %v7209_v54, %v1706_v15 }
 0x4b0   : > { %1724 = vst [vmem:[#allocation2 + $0x38] sm:$0xff] %v1712_v52  ;;  %v1714_v23 = vadd.f32 %v1686_v51, %v6947_v1  ;;  %v1688_v60 = vpop.permute.xlu0 %1687 }
 0x4b1   : > { %v1692_v58 = vsel %vm473_vm0, %v1686_v51, %v1688_v60  ;;  %v1716_v25 = vadd.f32 %v1688_v60, %v6951_v3  ;;  %6053 = vrot.lane.b32.xlu1 %v7213_v22, %s6706_s24  ;;  %v7226_v27 = vld [vmem:[#allocation2 + $0x18] sm:$0xff]  ;;  %5205 = vmatmul.mubr.msk.f32.gmra.mrb[18].mxu0 %vm1515_vm7, %v1464_v30 }
 0x4b2   : > { %1726 = vst.msk [vmem:[#allocation2 + $0x48] sm:$0xff] %vm615_vm2, %v1714_v23  ;;  %v1715_v1 = vadd.f32 %v1692_v58, %v1663_v24  ;;  %v6057_v28 = vpack.i.bf16 %v7226_v27, %v7224_v26  ;;  %v7232_v29 = vld [vmem:[#allocation2 + $0x28] sm:$0xff]  ;;  %1640 = vmatprep.mubr.f32.mxu0 %v6703_v0 }
 0x4b3   : > { %1728 = vst.msk [vmem:[#allocation2 + $0x58] sm:$0xff] %vm473_vm0, %v1716_v25  ;;  %v6062_v3 = vpack.i.bf16 %v7232_v29, %v1709_v19 }
 0x4b4   : > { %1727 = vst [vmem:[#allocation2 + $0x50] sm:$0xff] %v1715_v1 }
 0x4b5   : > { %6058 = vrot.lane.b32.xlu1 %v6057_v28, %s6706_s24  ;;  %6063 = vrot.lane.b32.xlu0 %v6062_v3, %s6706_s24  ;;  %v7251_v34 = vld [vmem:[#allocation2 + $0x30] sm:$0xff] }
 0x4b6   : > { %v7242_v31 = vld [vmem:[#allocation2 + $0x40] sm:$0xff]  ;;  %5206 = vmatmul.mubr.msk.f32.gmra.mrb[20].mxu0 %vm1515_vm7, %v1465_v33 }
 0x4b7   : > { %v6067_v32 = vpack.i.bf16 %v7242_v31, %v1712_v52  ;;  %1646 = vmatprep.mubr.f32.mxu0 %v6703_v0 }
 0x4b9   : > { %6068 = vrot.lane.b32.xlu0 %v6067_v32, %s6706_s24  ;;  %v7253_v35 = vld [vmem:[#allocation2 + $0x48] sm:$0xff] }
 0x4ba   : > { %v6072_v36 = vpack.i.bf16 %v7253_v35, %v7251_v34  ;;  %v7258_v37 = vld [vmem:[#allocation2 + $0x58] sm:$0xff]  ;;  %5207 = vmatmul.mubr.msk.f32.gmra.mrb[22].mxu0 %vm1515_vm7, %v1466_v39 }
 0x4bb   : > { %v6077_v38 = vpack.i.bf16 %v7258_v37, %v1715_v1  ;;  %1955 = vmatprep.mubr.f32.mxu0 %v6703_v0 }
 0x4bd   : > { %6073 = vrot.lane.b32.xlu0 %v6072_v36, %s6706_s24  ;;  %6078 = vrot.lane.b32.xlu1 %v6077_v38, %s6706_s24 }
 0x4c1   : > { %6088 = vrot.lane.b32.xlu0 %v6087_v55, %s6706_s24  ;;  %6083 = vrot.lane.b32.xlu1 %v6082_v56, %s6706_s24 }
 0x4c5   : > { %6098 = vrot.lane.b32.xlu0 %v7213_v22, %s6709_s19  ;;  %6093 = vrot.lane.b32.xlu1 %v6092_v59, %s6706_s24 }
 0x4c9   : > { %6108 = vrot.lane.b32.xlu0 %v6057_v28, %s6709_s19  ;;  %6103 = vrot.lane.b32.xlu1 %v6062_v3, %s6709_s19 }
 0x4cd   : > { %6123 = vrot.lane.b32.xlu0 %v6077_v38, %s6709_s19  ;;  %6113 = vrot.lane.b32.xlu1 %v6067_v32, %s6709_s19 }
 0x4d1   : > { %6128 = vrot.lane.b32.xlu0 %v6082_v56, %s6709_s19  ;;  %6118 = vrot.lane.b32.xlu1 %v6072_v36, %s6709_s19 }
 0x4d5   : > { %6138 = vrot.lane.b32.xlu0 %v6092_v59, %s6709_s19  ;;  %6133 = vrot.lane.b32.xlu1 %v6087_v55, %s6709_s19 }
 0x4d9   : > { %6148 = vrot.lane.b32.xlu0 %v6062_v3, %s6710_s23  ;;  %6143 = vrot.lane.b32.xlu1 %v7213_v22, %s6710_s23 }
 0x4dd   : > { %6158 = vrot.lane.b32.xlu0 %v6067_v32, %s6710_s23  ;;  %6153 = vrot.lane.b32.xlu1 %v6057_v28, %s6710_s23 }
 0x4e1   : > { %6163 = vrot.lane.b32.xlu0 %v6072_v36, %s6710_s23  ;;  %6168 = vrot.lane.b32.xlu1 %v6077_v38, %s6710_s23 }
 0x4e5   : > { %6178 = vrot.lane.b32.xlu0 %v6087_v55, %s6710_s23  ;;  %6173 = vrot.lane.b32.xlu1 %v6082_v56, %s6710_s23 }
 0x4e9   : > { %2456 = vperm.xlu0 %5915, %v5260_v61   ;;  %6183 = vrot.lane.b32.xlu1 %v6092_v59, %s6710_s23  ;;  %s8210_s23 = scalar_lea.vmem [#allocation6], %s5142_s29 }
 0x4ed   : > { %2466 = vperm.xlu0 %5915, %v5262_v62   ;;  %2461 = vperm.xlu1 %5916, %v5261_v2  }
 0x4f1   : > { %2436 = vperm.xlu0 %5915, %v5256_v43   ;;  %2471 = vperm.xlu1 %5916, %v5263_v4  }
 0x4f5   : > { %2446 = vperm.xlu0 %5915, %v5258_v45   ;;  %2441 = vperm.xlu1 %5916, %v5257_v5  }
 0x4f9   : > { %2574 = vperm.xlu0 %5915, %v5280_v6   ;;  %2451 = vperm.xlu1 %5916, %v5259_v7  }
 0x4fd   : > { %2584 = vperm.xlu0 %5915, %v5282_v8   ;;  %2579 = vperm.xlu1 %5916, %v5281_v9  }
 0x501   : > { %2589 = vperm.xlu1 %5916, %v5283_v11  }
 0x523   : > { %v6054_v13 = vpop.permute.xlu1 %6053 }
 0x524   : > { %v6056_v15 = vunpack.i.h.bf16 %v6054_v13  ;;  %v6055_v48 = vunpack.i.l.bf16 %v6054_v13 }
 0x526   : > { %v1844_v21 = vsel %vm747_vm3, %v6055_v48, %v6056_v15 }
 0x527   : > { %v6064_v16 = vpop.permute.xlu0 %6063  ;;  %v6059_v17 = vpop.permute.xlu1 %6058 }
 0x528   : > { %v6066_v18 = vunpack.i.h.bf16 %v6064_v16  ;;  %v6065_v49 = vunpack.i.l.bf16 %v6064_v16  ;;  %v6061_v19 = vunpack.i.h.bf16 %v6059_v17  ;;  %v6060_v46 = vunpack.i.l.bf16 %v6059_v17 }
 0x52a   : > { %v1845_v44 = vsel %vm747_vm3, %v6061_v19, %v6065_v49  ;;  %v1843_v20 = vsel %vm747_vm3, %v6060_v46, %v6055_v48  ;;  %v1846_v50 = vsel %vm747_vm3, %v6065_v49, %v6066_v18  ;;  %v5216_v48 = vld [vmem:[%s8291_s4 + $0x100] sm:$0xff] }
 0x52b   : > { %v6069_v52 = vpop.permute.xlu0 %6068  ;;  %v5530_v51 = vpack.c.bf16 %v1846_v50, %v1844_v21  ;;  %v5532_v22 = vpack.c.bf16 %v1845_v44, %v1843_v20 }
 0x52c   : > { %v6071_v63 = vunpack.i.h.bf16 %v6069_v52  ;;  %v6070_v23 = vunpack.i.l.bf16 %v6069_v52 }
 0x52d   : > { %5531 = vmatprep.subr.bf16.mxu0 %v5530_v51 }
 0x52e   : > { %5533 = vmatpush1.bf16.msra.mxu0 %v5532_v22  ;;  %v1848_v32 = vsel %vm747_vm3, %v6070_v23, %v6071_v63  ;;  %v5217_v22 = vld [vmem:[%s8291_s4 + $0x108] sm:$0xff] }
 0x52f   : > { %v6074_v60 = vpop.permute.xlu0 %6073  ;;  %v6079_v24 = vpop.permute.xlu1 %6078 }
 0x530   : > { %v6076_v58 = vunpack.i.h.bf16 %v6074_v60  ;;  %v6075_v25 = vunpack.i.l.bf16 %v6074_v60  ;;  %v6081_v1 = vunpack.i.h.bf16 %v6079_v24  ;;  %v6080_v28 = vunpack.i.l.bf16 %v6079_v24 }
 0x532   : > { %v1847_v3 = vsel %vm747_vm3, %v6075_v25, %v6070_v23  ;;  %v1849_v30 = vsel %vm747_vm3, %v6076_v58, %v6080_v28  ;;  %v1850_v33 = vsel %vm747_vm3, %v6080_v28, %v6081_v1  ;;  %v5218_v28 = vld [vmem:[%s8291_s4 + $0x110] sm:$0xff] }
 0x533   : > { %v6089_v36 = vpop.permute.xlu0 %6088  ;;  %v6084_v38 = vpop.permute.xlu1 %6083  ;;  %v5534_v39 = vpack.c.bf16 %v1850_v33, %v1848_v32  ;;  %v5536_v40 = vpack.c.bf16 %v1849_v30, %v1847_v3 }
 0x534   : > { %v6091_v41 = vunpack.i.h.bf16 %v6089_v36  ;;  %v6090_v47 = vunpack.i.l.bf16 %v6089_v36  ;;  %v6086_v53 = vunpack.i.h.bf16 %v6084_v38  ;;  %v6085_v55 = vunpack.i.l.bf16 %v6084_v38 }
 0x535   : > { %5535 = vmatprep.subr.bf16.mxu0 %v5534_v39 }
 0x536   : > { %5537 = vmatpush1.bf16.msra.mxu0 %v5536_v40  ;;  %v1852_v56 = vsel %vm747_vm3, %v6085_v55, %v6086_v53  ;;  %v1854_v57 = vsel %vm747_vm3, %v6090_v47, %v6091_v41 }
 0x537   : > { %v6099_v42 = vpop.permute.xlu0 %6098  ;;  %v6094_v59 = vpop.permute.xlu1 %6093  ;;  %v5538_v61 = vpack.c.bf16 %v1854_v57, %v1852_v56 }
 0x538   : > { %v6096_v62 = vunpack.i.h.bf16 %v6094_v59  ;;  %v6095_v2 = vunpack.i.l.bf16 %v6094_v59  ;;  %v6101_v43 = vunpack.i.h.bf16 %v6099_v42  ;;  %v6100_v4 = vunpack.i.l.bf16 %v6099_v42 }
 0x539   : > { %5539 = vmatprep.subr.bf16.mxu0 %v5538_v61 }
 0x53a   : > { %v1853_v45 = vsel %vm747_vm3, %v6096_v62, %v6090_v47  ;;  %v1851_v5 = vsel %vm747_vm3, %v6095_v2, %v6085_v55  ;;  %v2042_v18 = vsel %vm2040_vm8, %v6100_v4, %v6101_v43  ;;  %v5219_v55 = vld [vmem:[%s8291_s4 + $0x118] sm:$0xff] }
 0x53b   : > { %v6109_v6 = vpop.permute.xlu0 %6108  ;;  %v6104_v7 = vpop.permute.xlu1 %6103  ;;  %v5540_v8 = vpack.c.bf16 %v1853_v45, %v1851_v5 }
 0x53c   : > { %v6111_v9 = vunpack.i.h.bf16 %v6109_v6  ;;  %v6110_v11 = vunpack.i.l.bf16 %v6109_v6  ;;  %v6106_v13 = vunpack.i.h.bf16 %v6104_v7  ;;  %v6105_v15 = vunpack.i.l.bf16 %v6104_v7  ;;  %v5220_v7 = vld [vmem:[%s8291_s4 + $0x120] sm:$0xff] }
 0x53d   : > { %5541 = vmatpush1.bf16.msra.mxu0 %v5540_v8 }
 0x53e   : > { %v2041_v16 = vsel %vm2040_vm8, %v6110_v11, %v6100_v4  ;;  %v2043_v17 = vsel %vm2040_vm8, %v6111_v9, %v6105_v15  ;;  %v2044_v49 = vsel %vm2040_vm8, %v6105_v15, %v6106_v13 }
 0x53f   : > { %v6124_v19 = vpop.permute.xlu0 %6123  ;;  %v6114_v46 = vpop.permute.xlu1 %6113  ;;  %v5542_v44 = vpack.c.bf16 %v2044_v49, %v2042_v18  ;;  %v5544_v20 = vpack.c.bf16 %v2043_v17, %v2041_v16  ;;  %v5222_v18 = vld [vmem:[%s8291_s4 + $0x130] sm:$0xff] }
 0x540   : > { %v6126_v21 = vunpack.i.h.bf16 %v6124_v19  ;;  %v6125_v50 = vunpack.i.l.bf16 %v6124_v19  ;;  %v6116_v52 = vunpack.i.h.bf16 %v6114_v46  ;;  %v6115_v51 = vunpack.i.l.bf16 %v6114_v46  ;;  %5224 = vmatmul.mubr.msk.f32.vlgmr.msra.gmra.mrb[24].mxu0 %vm772_vm5, %v5216_v48  ;;  %v5221_v48 = vld [vmem:[%s8291_s4 + $0x128] sm:$0xff] }
 0x541   : > { %5543 = vmatprep.subr.bf16.mxu0 %v5542_v44  ;;  %1961 = vmatprep.mubr.f32.mxu0 %v6703_v0 }
 0x542   : > { %5545 = vmatpush1.bf16.msra.mxu0 %v5544_v20  ;;  %v2046_v63 = vsel %vm2040_vm8, %v6115_v51, %v6116_v52  ;;  %v2048_v23 = vsel %vm2040_vm8, %v6125_v50, %v6126_v21  ;;  %v5223_v21 = vld [vmem:[%s8291_s4 + $0x138] sm:$0xff] }
 0x543   : > { %v6129_v60 = vpop.permute.xlu0 %6128  ;;  %v6119_v24 = vpop.permute.xlu1 %6118  ;;  %v5546_v58 = vpack.c.bf16 %v2048_v23, %v2046_v63 }
 0x544   : > { %v6121_v25 = vunpack.i.h.bf16 %v6119_v24  ;;  %v6120_v1 = vunpack.i.l.bf16 %v6119_v24  ;;  %5225 = vmatmul.mubr.msk.f32.gmra.mrb[26].mxu0 %vm772_vm5, %v5217_v22  ;;  %v6131_v3 = vunpack.i.h.bf16 %v6129_v60  ;;  %v6130_v30 = vunpack.i.l.bf16 %v6129_v60 }
 0x545   : > { %5547 = vmatprep.subr.bf16.mxu0 %v5546_v58  ;;  %1967 = vmatprep.mubr.f32.mxu0 %v6703_v0 }
 0x546   : > { %v2047_v32 = vsel %vm2040_vm8, %v6121_v25, %v6125_v50  ;;  %v2045_v33 = vsel %vm2040_vm8, %v6120_v1, %v6115_v51  ;;  %v2050_v42 = vsel %vm2040_vm8, %v6130_v30, %v6131_v3 }
 0x547   : > { %v6139_v36 = vpop.permute.xlu0 %6138  ;;  %v6134_v38 = vpop.permute.xlu1 %6133  ;;  %v5548_v39 = vpack.c.bf16 %v2047_v32, %v2045_v33 }
 0x548   : > { %v6141_v40 = vunpack.i.h.bf16 %v6139_v36  ;;  %v6140_v41 = vunpack.i.l.bf16 %v6139_v36  ;;  %v6136_v47 = vunpack.i.h.bf16 %v6134_v38  ;;  %v6135_v53 = vunpack.i.l.bf16 %v6134_v38  ;;  %5226 = vmatmul.mubr.msk.f32.gmra.mrb[28].mxu0 %vm772_vm5, %v5218_v28 }
 0x549   : > { %5549 = vmatpush1.bf16.msra.mxu0 %v5548_v39  ;;  %1973 = vmatprep.mubr.f32.mxu0 %v6703_v0 }
 0x54a   : > { %v2049_v56 = vsel %vm2040_vm8, %v6140_v41, %v6130_v30  ;;  %v2051_v57 = vsel %vm2040_vm8, %v6141_v40, %v6135_v53  ;;  %v2052_v59 = vsel %vm2040_vm8, %v6135_v53, %v6136_v47  ;;  %v5208_v30 = vld [vmem:[%s8291_s4 + $0xc0] sm:$0xff]  ;;  %v5209_v47 = vld [vmem:[%s8291_s4 + $0xc8] sm:$0xff] }
 0x54b   : > { %v6149_v61 = vpop.permute.xlu0 %6148  ;;  %v6144_v62 = vpop.permute.xlu1 %6143  ;;  %v5550_v2 = vpack.c.bf16 %v2052_v59, %v2050_v42  ;;  %v5552_v43 = vpack.c.bf16 %v2051_v57, %v2049_v56 }
 0x54c   : > { %v6151_v4 = vunpack.i.h.bf16 %v6149_v61  ;;  %v6150_v45 = vunpack.i.l.bf16 %v6149_v61  ;;  %v6146_v5 = vunpack.i.h.bf16 %v6144_v62  ;;  %v6145_v6 = vunpack.i.l.bf16 %v6144_v62  ;;  %5227 = vmatmul.mubr.msk.f32.gmra.mrb[30].mxu0 %vm772_vm5, %v5219_v55  ;;  %v5210_v61 = vld [vmem:[%s8291_s4 + $0xd0] sm:$0xff] }
 0x54d   : > { %5551 = vmatprep.subr.bf16.mxu0 %v5550_v2  ;;  %1979 = vmatprep.mubr.f32.mxu0 %v6703_v0  ;;  %v5211_v2 = vld [vmem:[%s8291_s4 + $0xd8] sm:$0xff] }
 0x54e   : > { %5553 = vmatpush1.bf16.msra.mxu0 %v5552_v43  ;;  %v2249_v8 = vsel %vm2247_vm9, %v6145_v6, %v6146_v5  ;;  %v2251_v9 = vsel %vm2247_vm9, %v6150_v45, %v6151_v4  ;;  %v5212_v43 = vld [vmem:[%s8291_s4 + $0xe0] sm:$0xff]  ;;  %v5213_v4 = vld [vmem:[%s8291_s4 + $0xe8] sm:$0xff]  ;;  %v5215_v5 = vld [vmem:[%s8291_s4 + $0xf8] sm:$0xff] }
 0x54f   : > { %v6159_v11 = vpop.permute.xlu0 %6158  ;;  %v6154_v13 = vpop.permute.xlu1 %6153  ;;  %v5554_v15 = vpack.c.bf16 %v2251_v9, %v2249_v8  ;;  %v5242_v8 = vld [vmem:[%s8291_s4 + $0x150] sm:$0xff]  ;;  %v5243_v9 = vld [vmem:[%s8291_s4 + $0x158] sm:$0xff] }
 0x550   : > { %5228 = vmatmul.mubr.msk.f32.gmra.mrb[32].mxu0 %vm772_vm5, %v5220_v7  ;;  %v6156_v19 = vunpack.i.h.bf16 %v6154_v13  ;;  %v6155_v46 = vunpack.i.l.bf16 %v6154_v13  ;;  %v6161_v52 = vunpack.i.h.bf16 %v6159_v11  ;;  %v6160_v51 = vunpack.i.l.bf16 %v6159_v11  ;;  %v5241_v7 = vld [vmem:[%s8291_s4 + $0x148] sm:$0xff]  ;;  %v5244_v11 = vld [vmem:[%s8291_s4 + $0x160] sm:$0xff] }
 0x551   : > { %5555 = vmatprep.subr.bf16.mxu0 %v5554_v15  ;;  %1985 = vmatprep.mubr.f32.mxu0 %v6703_v0  ;;  %v5245_v13 = vld [vmem:[%s8291_s4 + $0x168] sm:$0xff]  ;;  %v5246_v15 = vld [vmem:[%s8291_s4 + $0x170] sm:$0xff] }
 0x552   : > { %v2250_v63 = vsel %vm2247_vm9, %v6156_v19, %v6150_v45  ;;  %v2248_v23 = vsel %vm2247_vm9, %v6155_v46, %v6145_v6  ;;  %v2253_v36 = vsel %vm2247_vm9, %v6160_v51, %v6161_v52  ;;  %v5214_v45 = vld [vmem:[%s8291_s4 + $0xf0] sm:$0xff]  ;;  %v5240_v6 = vld [vmem:[%s8291_s4 + $0x140] sm:$0xff] }
 0x553   : > { %v6169_v16 = vpop.permute.xlu1 %6168  ;;  %v6164_v17 = vpop.permute.xlu0 %6163  ;;  %v5556_v33 = vpack.c.bf16 %v2250_v63, %v2248_v23 }
 0x554   : > { %5229 = vmatmul.mubr.msk.f32.gmra.mrb[34].mxu0 %vm772_vm5, %v5221_v48  ;;  %v6171_v44 = vunpack.i.h.bf16 %v6169_v16  ;;  %v6170_v20 = vunpack.i.l.bf16 %v6169_v16  ;;  %v6165_v22 = vunpack.i.l.bf16 %v6164_v17  ;;  %v6166_v60 = vunpack.i.h.bf16 %v6164_v17  ;;  %v5247_v48 = vld [vmem:[%s8291_s4 + $0x178] sm:$0xff] }
 0x555   : > { %1991 = vmatprep.mubr.f32.mxu0 %v6703_v0 }
 0x556   : > { %v2255_v24 = vsel %vm2247_vm9, %v6170_v20, %v6171_v44  ;;  %v2252_v32 = vsel %vm2247_vm9, %v6165_v22, %v6160_v51  ;;  %v2254_v38 = vsel %vm2247_vm9, %v6166_v60, %v6170_v20 }
 0x557   : > { %v6174_v49 = vpop.permute.xlu1 %6173  ;;  %v6179_v50 = vpop.permute.xlu0 %6178  ;;  %v5558_v41 = vpack.c.bf16 %v2255_v24, %v2253_v36  ;;  %v5560_v56 = vpack.c.bf16 %v2254_v38, %v2252_v32 }
 0x558   : > { %5230 = vmatmul.mubr.msk.f32.gmra.mrb[36].mxu0 %vm772_vm5, %v5222_v18  ;;  %v6181_v58 = vunpack.i.h.bf16 %v6179_v50  ;;  %v6180_v25 = vunpack.i.l.bf16 %v6179_v50  ;;  %v6176_v1 = vunpack.i.h.bf16 %v6174_v49  ;;  %v6175_v28 = vunpack.i.l.bf16 %v6174_v49 }
 0x559   : > { %1997 = vmatprep.mubr.f32.mxu0 %v6703_v0 }
 0x55a   : > { %v2257_v53 = vsel %vm2247_vm9, %v6175_v28, %v6176_v1  ;;  %v2259_v55 = vsel %vm2247_vm9, %v6180_v25, %v6181_v58 }
 0x55b   : > { %v6184_v3 = vpop.permute.xlu1 %6183  ;;  %v5562_v59 = vpack.c.bf16 %v2259_v55, %v2257_v53 }
 0x55c   : > { %5231 = vmatmul.mubr.msk.f32.gmra.mrb[38].mxu0 %vm772_vm5, %v5223_v21  ;;  %v6186_v39 = vunpack.i.h.bf16 %v6184_v3  ;;  %v6185_v40 = vunpack.i.l.bf16 %v6184_v3 }
 0x55d   : > { %2153 = vmatprep.mubr.f32.mxu0 %v6703_v0 }
 0x55e   : > { %v2258_v57 = vsel %vm2247_vm9, %v6186_v39, %v6180_v25  ;;  %v2256_v42 = vsel %vm2247_vm9, %v6185_v40, %v6175_v28 }
 0x55f   : > { %v5564_v62 = vpack.c.bf16 %v2258_v57, %v2256_v42 }
 0x560   : > { %5232 = vmatmul.mubr.msk.f32.vlgmr.msra.gmra.mrb[24].mxu0 %vm772_vm5, %v5208_v30 }
 0x561   : > { %5557 = vmatpush1.bf16.msra.mxu0 %v5556_v33  ;;  %2159 = vmatprep.mubr.f32.mxu0 %v6703_v0 }
 0x562   : > { %5559 = vmatprep.subr.bf16.mxu0 %v5558_v41 }
 0x564   : > { %5233 = vmatmul.mubr.msk.f32.gmra.mrb[26].mxu0 %vm772_vm5, %v5209_v47 }
 0x565   : > { %5561 = vmatpush1.bf16.msra.mxu0 %v5560_v56  ;;  %2165 = vmatprep.mubr.f32.mxu0 %v6703_v0 }
 0x566   : > { %5563 = vmatprep.subr.bf16.mxu0 %v5562_v59 }
 0x568   : > { %5234 = vmatmul.mubr.msk.f32.gmra.mrb[28].mxu0 %vm772_vm5, %v5210_v61  ;;  %v2457_v44 = vpop.permute.xlu0 %2456 }
 0x569   : > { %5565 = vmatpush1.bf16.msra.mxu0 %v5564_v62  ;;  %2171 = vmatprep.mubr.f32.mxu0 %v6703_v0 }
 0x56c   : > { %5235 = vmatmul.mubr.msk.f32.gmra.mrb[30].mxu0 %vm772_vm5, %v5211_v2  ;;  %v2462_v50 = vpop.permute.xlu1 %2461  ;;  %v2467_v51 = vpop.permute.xlu0 %2466 }
 0x56d   : > { %2177 = vmatprep.mubr.f32.mxu0 %v6703_v0 }
 0x570   : > { %5236 = vmatmul.mubr.msk.f32.gmra.mrb[32].mxu0 %vm772_vm5, %v5212_v43  ;;  %v2472_v25 = vpop.permute.xlu1 %2471  ;;  %v2437_v30 = vpop.permute.xlu0 %2436 }
 0x571   : > { %2183 = vmatprep.mubr.f32.mxu0 %v6703_v0 }
 0x574   : > { %5237 = vmatmul.mubr.msk.f32.gmra.mrb[34].mxu0 %vm772_vm5, %v5213_v4  ;;  %v2442_v47 = vpop.permute.xlu1 %2441 }
 0x575   : > { %2189 = vmatprep.mubr.f32.mxu0 %v6703_v0 }
 0x578   : > { %5238 = vmatmul.mubr.msk.f32.gmra.mrb[36].mxu0 %vm772_vm5, %v5214_v45 }
 0x579   : > { %2195 = vmatprep.mubr.f32.mxu0 %v6703_v0 }
 0x57c   : > { %5239 = vmatmul.mubr.msk.f32.gmra.mrb[38].mxu0 %vm772_vm5, %v5215_v5 }
 0x57d   : > { %2360 = vmatprep.mubr.f32.mxu0 %v6703_v0 }
 0x580   : > { %5248 = vmatmul.mubr.msk.f32.vlgmr.msra.gmra.mrb[24].mxu0 %vm772_vm5, %v5240_v6 }
 0x581   : > { %2366 = vmatprep.mubr.f32.mxu0 %v6703_v0 }
 0x584   : > { %5249 = vmatmul.mubr.msk.f32.gmra.mrb[26].mxu0 %vm772_vm5, %v5241_v7 }
 0x585   : > { %2372 = vmatprep.mubr.f32.mxu0 %v6703_v0 }
 0x588   : > { %5250 = vmatmul.mubr.msk.f32.gmra.mrb[28].mxu0 %vm772_vm5, %v5242_v8 }
 0x589   : > { %2378 = vmatprep.mubr.f32.mxu0 %v6703_v0 }
 0x58c   : > { %5251 = vmatmul.mubr.msk.f32.gmra.mrb[30].mxu0 %vm772_vm5, %v5243_v9  ;;  %v2447_v9 = vpop.permute.xlu0 %2446 }
 0x58d   : > { %2384 = vmatprep.mubr.f32.mxu0 %v6703_v0 }
 0x590   : > { %5252 = vmatmul.mubr.msk.f32.gmra.mrb[32].mxu0 %vm772_vm5, %v5244_v11 }
 0x591   : > { %2390 = vmatprep.mubr.f32.mxu0 %v6703_v0 }
 0x594   : > { %5253 = vmatmul.mubr.msk.f32.gmra.mrb[34].mxu0 %vm772_vm5, %v5245_v13 }
 0x595   : > { %2396 = vmatprep.mubr.f32.mxu0 %v6703_v0 }
 0x598   : > { %5254 = vmatmul.mubr.msk.f32.gmra.mrb[36].mxu0 %vm772_vm5, %v5246_v15 }
 0x599   : > { %2402 = vmatprep.mubr.f32.mxu0 %v6703_v0 }
 0x59c   : > { %5255 = vmatmul.mubr.msk.f32.gmra.mrb[38].mxu0 %vm772_vm5, %v5247_v48 }
 0x59d   : > { %2700 = vmatprep.mubr.f32.mxu0 %v6703_v0 }
 0x653   : > { %v2362_v16 = vpop.f32.mrb[24].mxu0 }
 0x654   : > { %v2364_v17 = vpop.f32.mrb[25].mxu0  ;;  %v2474_v33 = vadd.f32 %v2437_v30, %v2362_v16 }
 0x655   : > { %v2475_v53 = vadd.f32 %v2437_v30, %v2364_v17 }
 0x657   : > { %v2368_v18 = vpop.f32.mrb[26].mxu0 }
 0x658   : > { %v2370_v49 = vpop.f32.mrb[27].mxu0  ;;  %v2476_v56 = vadd.f32 %v2442_v47, %v2368_v18 }
 0x659   : > { %v2477_v6 = vadd.f32 %v2442_v47, %v2370_v49 }
 0x65b   : > { %v2374_v19 = vpop.f32.mrb[28].mxu0 }
 0x65c   : > { %v2376_v46 = vpop.f32.mrb[29].mxu0  ;;  %v2478_v13 = vadd.f32 %v2447_v9, %v2374_v19 }
 0x65d   : > { %v2479_v48 = vadd.f32 %v2447_v9, %v2376_v46 }
 0x65f   : > { %v7465_v20 = vpop.f32.mrb[30].mxu0 }
 0x660   : > { %v7467_v21 = vpop.f32.mrb[31].mxu0 }
 0x663   : > { %v2386_v52 = vpop.f32.mrb[32].mxu0 }
 0x664   : > { %v2482_v22 = vadd.f32 %v2457_v44, %v2386_v52  ;;  %v2388_v63 = vpop.f32.mrb[33].mxu0 }
 0x665   : > { %v2483_v23 = vadd.f32 %v2457_v44, %v2388_v63 }
 0x666   : > { %v5264_v60 = vmul.f32 -1.442695, %v2482_v22 }
 0x667   : > { %v5265_v24 = vmul.f32 -1.442695, %v2483_v23  ;;  %v2392_v58 = vpop.f32.mrb[34].mxu0 }
 0x668   : > { %6460 = vpow2.f32 %v5264_v60  ;;  %v2484_v1 = vadd.f32 %v2462_v50, %v2392_v58  ;;  %v2394_v28 = vpop.f32.mrb[35].mxu0 }
 0x669   : > { %6462 = vpow2.f32 %v5265_v24  ;;  %v2485_v3 = vadd.f32 %v2462_v50, %v2394_v28  ;;  %v2452_v50 = vpop.permute.xlu1 %2451 }
 0x66a   : > { %v5266_v32 = vmul.f32 -1.442695, %v2484_v1  ;;  %v2481_v46 = vadd.f32 %v2452_v50, %v7467_v21 }
 0x66b   : > { %v5267_v36 = vmul.f32 -1.442695, %v2485_v3  ;;  %v2398_v38 = vpop.f32.mrb[36].mxu0 }
 0x66c   : > { %6464 = vpow2.f32 %v5266_v32  ;;  %v2486_v39 = vadd.f32 %v2467_v51, %v2398_v38  ;;  %v2400_v40 = vpop.f32.mrb[37].mxu0 }
 0x66d   : > { %6466 = vpow2.f32 %v5267_v36  ;;  %v2487_v41 = vadd.f32 %v2467_v51, %v2400_v40  ;;  %v2480_v51 = vadd.f32 %v2452_v50, %v7465_v20 }
 0x66e   : > { %v5268_v55 = vmul.f32 -1.442695, %v2486_v39  ;;  %6468 = vtanh.f32 %v2474_v33 }
 0x66f   : > { %v5269_v57 = vmul.f32 -1.442695, %v2487_v41  ;;  %v2404_v42 = vpop.f32.mrb[38].mxu0 }
 0x670   : > { %6470 = vpow2.f32 %v5268_v55  ;;  %v2488_v59 = vadd.f32 %v2472_v25, %v2404_v42  ;;  %v2406_v61 = vpop.f32.mrb[39].mxu0 }
 0x671   : > { %6472 = vpow2.f32 %v5269_v57  ;;  %v2489_v62 = vadd.f32 %v2472_v25, %v2406_v61 }
 0x672   : > { %v6461_v2 = vpop.eup %6460  ;;  %6474 = vtanh.f32 %v2475_v53  ;;  %v5270_v43 = vmul.f32 -1.442695, %v2488_v59 }
 0x673   : > { %v6463_v4 = vpop.eup %6462  ;;  %6476 = vtanh.f32 %v2476_v56  ;;  %v2522_v45 = vadd.f32 1.0, %v6461_v2  ;;  %v5271_v5 = vmul.f32 -1.442695, %v2489_v62 }
 0x674   : > { %v2523_v7 = vadd.f32 1.0, %v6463_v4  ;;  %6478 = vpow2.f32 %v5270_v43  ;;  %v5272_v43 = vld [vmem:[%s8293_s6 + $0x40] sm:$0xff]  ;;  %v5273_v4 = vld [vmem:[%s8293_s6 + $0x48] sm:$0xff] }
 0x675   : > { %6480 = vrcp.f32 %v2522_v45  ;;  %v5274_v45 = vld [vmem:[%s8293_s6 + $0x50] sm:$0xff] }
 0x676   : > { %v6465_v8 = vpop.eup %6464  ;;  %6482 = vrcp.f32 %v2523_v7 }
 0x677   : > { %v6467_v11 = vpop.eup %6466  ;;  %v2524_v15 = vadd.f32 1.0, %v6465_v8  ;;  %6484 = vpow2.f32 %v5271_v5  ;;  %v5275_v5 = vld [vmem:[%s8293_s6 + $0x58] sm:$0xff] }
 0x678   : > { %6486 = vtanh.f32 %v2477_v6  ;;  %v2525_v16 = vadd.f32 1.0, %v6467_v11  ;;  %v6469_v17 = vpop.eup %6468  ;;  %v2575_v6 = vpop.permute.xlu0 %2574 }
 0x679   : > { %6488 = vrcp.f32 %v2524_v15 }
 0x67a   : > { %v6471_v18 = vpop.eup %6470  ;;  %6490 = vrcp.f32 %v2525_v16 }
 0x67b   : > { %v6473_v44 = vpop.eup %6472  ;;  %6492 = vtanh.f32 %v2478_v13  ;;  %v2526_v49 = vadd.f32 1.0, %v6471_v18  ;;  %v2580_v13 = vpop.permute.xlu1 %2579 }
 0x67c   : > { %v6475_v52 = vpop.eup %6474  ;;  %6494 = vtanh.f32 %v2479_v48  ;;  %v2527_v22 = vadd.f32 1.0, %v6473_v44  ;;  %v2585_v18 = vpop.permute.xlu0 %2584 }
 0x67d   : > { %v6477_v63 = vpop.eup %6476  ;;  %6496 = vrcp.f32 %v2526_v49 }
 0x67e   : > { %v6479_v19 = vpop.eup %6478  ;;  %6498 = vrcp.f32 %v2527_v22 }
 0x67f   : > { %v6481_v23 = vpop.eup %6480  ;;  %v2528_v60 = vadd.f32 1.0, %v6479_v19  ;;  %6500 = vtanh.f32 %v2480_v51  ;;  %v2590_v51 = vpop.permute.xlu1 %2589 }
 0x680   : > { %v6483_v24 = vpop.eup %6482  ;;  %v2546_v58 = vmul.f32 %v6481_v23, %v6469_v17 }
 0x681   : > { %v6485_v25 = vpop.eup %6484  ;;  %6502 = vrcp.f32 %v2528_v60  ;;  %v2547_v1 = vmul.f32 %v6483_v24, %v6475_v52 }
 0x682   : > { %v6487_v28 = vpop.eup %6486  ;;  %v2529_v3 = vadd.f32 1.0, %v6485_v25  ;;  %6504 = vtanh.f32 %v2481_v46 }
 0x683   : > { %v6489_v30 = vpop.eup %6488 }
 0x684   : > { %v6491_v20 = vpop.eup %6490  ;;  %6506 = vrcp.f32 %v2529_v3  ;;  %v2548_v32 = vmul.f32 %v6489_v30, %v6477_v63 }
 0x685   : > { %v6493_v33 = vpop.eup %6492  ;;  %v2549_v36 = vmul.f32 %v6491_v20, %v6487_v28 }
 0x686   : > { %v6495_v38 = vpop.eup %6494  ;;  %v5568_v39 = vpack.c.bf16 %v2548_v32, %v2546_v58  ;;  %v2750_v58 = vld [vmem:[#allocation2 + $0x8] sm:$0xff]  ;;  %v2753_v32 = vld [vmem:[#allocation2 + $0x20] sm:$0xff] }
 0x687   : > { %v6497_v40 = vpop.eup %6496  ;;  %v5566_v21 = vpack.c.bf16 %v2549_v36, %v2547_v1 }
 0x688   : > { %v6499_v41 = vpop.eup %6498  ;;  %v2550_v47 = vmul.f32 %v6497_v40, %v6493_v33  ;;  %v2756_v40 = vld [vmem:[#allocation2 + $0x38] sm:$0xff] }
 0x689   : > { %5567 = vmatprep.subr.bf16.mxu0 %v5566_v21  ;;  %v2551_v53 = vmul.f32 %v6499_v41, %v6495_v38  ;;  %v6501_v55 = vpop.eup %6500 }
 0x68a   : > { %5569 = vmatpush1.bf16.msra.mxu0 %v5568_v39 }
 0x68b   : > { %v6503_v56 = vpop.eup %6502 }
 0x68c   : > { %v2552_v57 = vmul.f32 %v6503_v56, %v6501_v55  ;;  %v6505_v42 = vpop.eup %6504  ;;  %v2759_v56 = vld [vmem:[#allocation2 + $0x50] sm:$0xff] }
 0x68e   : > { %v6507_v59 = vpop.eup %6506  ;;  %v5572_v61 = vpack.c.bf16 %v2552_v57, %v2550_v47 }
 0x68f   : > { %v2553_v62 = vmul.f32 %v6507_v59, %v6505_v42 }
 0x691   : > { %v5570_v2 = vpack.c.bf16 %v2553_v62, %v2551_v53 }
 0x693   : > { %5571 = vmatprep.subr.bf16.mxu0 %v5570_v2 }
 0x694   : > { %5573 = vmatpush1.bf16.msra.mxu0 %v5572_v61 }
 0x697   : > { %5288 = vmatmul.mubr.msk.f32.vlgmr.msra.gmra.mrb[40].mxu0 %vm1515_vm7, %v5272_v43 }
 0x698   : > { %2706 = vmatprep.mubr.f32.mxu0 %v6703_v0 }
 0x69b   : > { %5289 = vmatmul.mubr.msk.f32.gmra.mrb[42].mxu0 %vm1515_vm7, %v5273_v4 }
 0x69c   : > { %2712 = vmatprep.mubr.f32.mxu0 %v6703_v0 }
 0x69f   : > { %5290 = vmatmul.mubr.msk.f32.gmra.mrb[44].mxu0 %vm1515_vm7, %v5274_v45 }
 0x6a0   : > { %2718 = vmatprep.mubr.f32.mxu0 %v6703_v0 }
 0x6a3   : > { %5291 = vmatmul.mubr.msk.f32.gmra.mrb[46].mxu0 %vm1515_vm7, %v5275_v5 }
 0x6a4   : > { %2724 = vmatprep.mubr.f32.mxu0 %v6703_v0 }
 0x76a   : > { %v2702_v7 = vpop.f32.mrb[40].mxu0 }
 0x76b   : > { %v2703_v8 = vadd.f32 %v2702_v7, %v2575_v6  ;;  %v2704_v9 = vpop.f32.mrb[41].mxu0 }
 0x76c   : > { %v2705_v11 = vadd.f32 %v2704_v9, %v2575_v6  ;;  %v2865_v9 = vld [vmem:[#allocation2 + $0x80] sm:$0xff] }
 0x76d   : > { %2769 = vrot.lane.b32.xlu0 %v2703_v8, %s6705_s26  ;;  %v2862_v8 = vld [vmem:[#allocation2 + $0x68] sm:$0xff] }
 0x76e   : > { %v2708_v15 = vpop.f32.mrb[42].mxu0  ;;  %2771 = vrot.lane.b32.xlu1 %v2705_v11, %s6705_s26  ;;  %v2866_v11 = vld [vmem:[#allocation2 + $0x88] sm:$0xff] }
 0x76f   : > { %v2709_v48 = vadd.f32 %v2708_v15, %v2580_v13  ;;  %v2710_v16 = vpop.f32.mrb[43].mxu0  ;;  %v6222_v15 = vpack.i.bf16 %v2866_v11, %v2865_v9 }
 0x770   : > { %v2711_v17 = vadd.f32 %v2710_v16, %v2580_v13  ;;  %v2863_v13 = vld [vmem:[#allocation2 + $0x70] sm:$0xff]  ;;  %v2864_v16 = vld [vmem:[#allocation2 + $0x78] sm:$0xff] }
 0x771   : > { %2773 = vrot.lane.b32.xlu0 %v2709_v48, %s6705_s26  ;;  %v6217_v48 = vpack.i.bf16 %v2863_v13, %v2862_v8 }
 0x772   : > { %v2714_v44 = vpop.f32.mrb[44].mxu0  ;;  %2775 = vrot.lane.b32.xlu1 %v2711_v17, %s6705_s26  ;;  %v2861_v17 = vld [vmem:[#allocation2 + $0x60] sm:$0xff] }
 0x773   : > { %v2715_v50 = vadd.f32 %v2714_v44, %v2585_v18  ;;  %v2716_v49 = vpop.f32.mrb[45].mxu0  ;;  %v5348_v44 = vld [vmem:[%s8292_s5 + $0xa0] sm:$0xff] }
 0x774   : > { %v2717_v52 = vadd.f32 %v2716_v49, %v2585_v18  ;;  %v6227_v18 = vpack.i.bf16 %v2864_v16, %v2861_v17  ;;  %v5349_v49 = vld [vmem:[%s8292_s5 + $0xa8] sm:$0xff] }
 0x775   : > { %2777 = vrot.lane.b32.xlu0 %v2715_v50, %s6705_s26  ;;  %v5350_v50 = vld [vmem:[%s8292_s5 + $0xb0] sm:$0xff] }
 0x776   : > { %v2720_v22 = vpop.f32.mrb[46].mxu0  ;;  %2779 = vrot.lane.b32.xlu1 %v2717_v52, %s6705_s26  ;;  %v5344_v52 = vld [vmem:[%s8292_s5 + $0x80] sm:$0xff] }
 0x777   : > { %v2721_v63 = vadd.f32 %v2720_v22, %v2590_v51  ;;  %v2722_v19 = vpop.f32.mrb[47].mxu0  ;;  %v5346_v22 = vld [vmem:[%s8292_s5 + $0x90] sm:$0xff] }
 0x778   : > { %v2723_v23 = vadd.f32 %v2722_v19, %v2590_v51  ;;  %v5351_v51 = vld [vmem:[%s8292_s5 + $0xb8] sm:$0xff]  ;;  %v5368_v19 = vld [vmem:[%s8294_s7 + $0x80] sm:$0xff] }
 0x779   : > { %2781 = vrot.lane.b32.xlu0 %v2721_v63, %s6705_s26  ;;  %v5345_v63 = vld [vmem:[%s8292_s5 + $0x88] sm:$0xff] }
 0x77a   : > { %2783 = vrot.lane.b32.xlu1 %v2723_v23, %s6705_s26  ;;  %v5347_v23 = vld [vmem:[%s8292_s5 + $0x98] sm:$0xff] }
 0x7df   : > { %v2770_v46 = vpop.permute.xlu0 %2769 }
 0x7e0   : > { %v2801_v60 = vadd.f32 %v2770_v46, %v7224_v26  ;;  %v2772_v24 = vpop.permute.xlu1 %2771 }
 0x7e1   : > { %v2785_v25 = vsel %vm473_vm0, %v2770_v46, %v2772_v24  ;;  %v2803_v1 = vadd.f32 %v2772_v24, %v7209_v54  ;;  %v5370_v46 = vld [vmem:[%s8294_s7 + $0x90] sm:$0xff]  ;;  %v5371_v24 = vld [vmem:[%s8294_s7 + $0x98] sm:$0xff] }
 0x7e2   : > { %2813 = vst.msk [vmem:[#allocation2] sm:$0xff] %vm615_vm2, %v2801_v60  ;;  %v2802_v28 = vadd.f32 %v2785_v25, %v2750_v58  ;;  %v5369_v60 = vld [vmem:[%s8294_s7 + $0x88] sm:$0xff] }
 0x7e3   : > { %2815 = vst.msk [vmem:[#allocation2 + $0x10] sm:$0xff] %vm473_vm0, %v2803_v1  ;;  %v2774_v3 = vpop.permute.xlu0 %2773 }
 0x7e4   : > { %2814 = vst [vmem:[#allocation2 + $0x8] sm:$0xff] %v2802_v28  ;;  %v2804_v30 = vadd.f32 %v2774_v3, %v7226_v27  ;;  %v2776_v20 = vpop.permute.xlu1 %2775 }
 0x7e5   : > { %v2786_v33 = vsel %vm473_vm0, %v2774_v3, %v2776_v20  ;;  %v2806_v26 = vadd.f32 %v2776_v20, %v7232_v29 }
 0x7e6   : > { %2816 = vst.msk [vmem:[#allocation2 + $0x18] sm:$0xff] %vm615_vm2, %v2804_v30  ;;  %v2805_v36 = vadd.f32 %v2786_v33, %v2753_v32 }
 0x7e7   : > { %2818 = vst.msk [vmem:[#allocation2 + $0x28] sm:$0xff] %vm473_vm0, %v2806_v26  ;;  %v2778_v54 = vpop.permute.xlu0 %2777 }
 0x7e8   : > { %2817 = vst [vmem:[#allocation2 + $0x20] sm:$0xff] %v2805_v36  ;;  %v2807_v38 = vadd.f32 %v2778_v54, %v7251_v34  ;;  %v2780_v39 = vpop.permute.xlu1 %2779 }
 0x7e9   : > { %v2787_v21 = vsel %vm473_vm0, %v2778_v54, %v2780_v39  ;;  %v2809_v27 = vadd.f32 %v2780_v39, %v7242_v31  ;;  %v7521_v31 = vld [vmem:[#allocation2] sm:$0xff] }
 0x7ea   : > { %2819 = vst.msk [vmem:[#allocation2 + $0x30] sm:$0xff] %vm615_vm2, %v2807_v38  ;;  %v2808_v41 = vadd.f32 %v2787_v21, %v2756_v40  ;;  %v7513_v47 = vld [vmem:[#allocation2 + $0x10] sm:$0xff] }
 0x7eb   : > { %2821 = vst.msk [vmem:[#allocation2 + $0x40] sm:$0xff] %vm473_vm0, %v2809_v27  ;;  %v2782_v29 = vpop.permute.xlu0 %2781  ;;  %v6187_v53 = vpack.i.bf16 %v7513_v47, %v2802_v28 }
 0x7ec   : > { %2820 = vst [vmem:[#allocation2 + $0x38] sm:$0xff] %v2808_v41  ;;  %v2810_v55 = vadd.f32 %v2782_v29, %v7253_v35  ;;  %v2784_v34 = vpop.permute.xlu1 %2783 }
 0x7ed   : > { %v2788_v57 = vsel %vm473_vm0, %v2782_v29, %v2784_v34  ;;  %v2812_v42 = vadd.f32 %v2784_v34, %v7258_v37  ;;  %6188 = vrot.lane.b32.xlu0 %v6187_v53, %s6706_s24  ;;  %v7523_v59 = vld [vmem:[#allocation2 + $0x18] sm:$0xff] }
 0x7ee   : > { %2822 = vst.msk [vmem:[#allocation2 + $0x48] sm:$0xff] %vm615_vm2, %v2810_v55  ;;  %v2811_v61 = vadd.f32 %v2788_v57, %v2759_v56  ;;  %v6192_v62 = vpack.i.bf16 %v7523_v59, %v7521_v31  ;;  %v7528_v2 = vld [vmem:[#allocation2 + $0x28] sm:$0xff] }
 0x7ef   : > { %2824 = vst.msk [vmem:[#allocation2 + $0x58] sm:$0xff] %vm473_vm0, %v2812_v42  ;;  %v6197_v35 = vpack.i.bf16 %v7528_v2, %v2805_v36 }
 0x7f0   : > { %2823 = vst [vmem:[#allocation2 + $0x50] sm:$0xff] %v2811_v61 }
 0x7f1   : > { %6193 = vrot.lane.b32.xlu0 %v6192_v62, %s6706_s24  ;;  %6198 = vrot.lane.b32.xlu1 %v6197_v35, %s6706_s24  ;;  %v7538_v4 = vld [vmem:[#allocation2 + $0x30] sm:$0xff] }
 0x7f2   : > { %v7534_v37 = vld [vmem:[#allocation2 + $0x40] sm:$0xff] }
 0x7f3   : > { %v6202_v43 = vpack.i.bf16 %v7534_v37, %v2808_v41 }
 0x7f5   : > { %6203 = vrot.lane.b32.xlu1 %v6202_v43, %s6706_s24  ;;  %v7540_v45 = vld [vmem:[#allocation2 + $0x48] sm:$0xff] }
 0x7f6   : > { %v6207_v5 = vpack.i.bf16 %v7540_v45, %v7538_v4  ;;  %v7544_v6 = vld [vmem:[#allocation2 + $0x58] sm:$0xff] }
 0x7f7   : > { %v6212_v7 = vpack.i.bf16 %v7544_v6, %v2811_v61 }
 0x7f9   : > { %6208 = vrot.lane.b32.xlu1 %v6207_v5, %s6706_s24  ;;  %6213 = vrot.lane.b32.xlu0 %v6212_v7, %s6706_s24 }
 0x7fd   : > { %6223 = vrot.lane.b32.xlu1 %v6222_v15, %s6706_s24  ;;  %6218 = vrot.lane.b32.xlu0 %v6217_v48, %s6706_s24 }
 0x801   : > { %6233 = vrot.lane.b32.xlu1 %v6187_v53, %s6711_s12  ;;  %6228 = vrot.lane.b32.xlu0 %v6227_v18, %s6706_s24 }
 0x805   : > { %6243 = vrot.lane.b32.xlu1 %v6192_v62, %s6711_s12  ;;  %6238 = vrot.lane.b32.xlu0 %v6197_v35, %s6711_s12 }
 0x809   : > { %6258 = vrot.lane.b32.xlu1 %v6212_v7, %s6711_s12  ;;  %6248 = vrot.lane.b32.xlu0 %v6202_v43, %s6711_s12 }
 0x80d   : > { %6263 = vrot.lane.b32.xlu1 %v6217_v48, %s6711_s12  ;;  %6253 = vrot.lane.b32.xlu0 %v6207_v5, %s6711_s12 }
 0x811   : > { %6273 = vrot.lane.b32.xlu1 %v6227_v18, %s6711_s12  ;;  %6268 = vrot.lane.b32.xlu0 %v6222_v15, %s6711_s12  ;;  %s6613_s12 = scalar_lea.vmem %s6612_s22, 512 }
 0x815   : > { %6283 = vrot.lane.b32.xlu1 %v6197_v35, %s6712_s14  ;;  %6278 = vrot.lane.b32.xlu0 %v6187_v53, %s6712_s14 }
 0x819   : > { %6293 = vrot.lane.b32.xlu1 %v6202_v43, %s6712_s14  ;;  %6288 = vrot.lane.b32.xlu0 %v6192_v62, %s6712_s14 }
 0x81d   : > { %6298 = vrot.lane.b32.xlu1 %v6207_v5, %s6712_s14  ;;  %6303 = vrot.lane.b32.xlu0 %v6212_v7, %s6712_s14 }
 0x821   : > { %6313 = vrot.lane.b32.xlu1 %v6222_v15, %s6712_s14  ;;  %6308 = vrot.lane.b32.xlu0 %v6217_v48, %s6712_s14 }
 0x825   : > { %3552 = vperm.xlu1 %5916, %v5348_v44   ;;  %6318 = vrot.lane.b32.xlu0 %v6227_v18, %s6712_s14 }
 0x829   : > { %3562 = vperm.xlu1 %5916, %v5350_v50   ;;  %3557 = vperm.xlu0 %5915, %v5349_v49  }
 0x82d   : > { %3532 = vperm.xlu1 %5916, %v5344_v52   ;;  %3567 = vperm.xlu0 %5915, %v5351_v51  }
 0x831   : > { %3542 = vperm.xlu1 %5916, %v5346_v22   ;;  %3537 = vperm.xlu0 %5915, %v5345_v63  }
 0x835   : > { %3670 = vperm.xlu1 %5916, %v5368_v19   ;;  %3547 = vperm.xlu0 %5915, %v5347_v23  }
 0x839   : > { %3680 = vperm.xlu1 %5916, %v5370_v46   ;;  %3675 = vperm.xlu0 %5915, %v5369_v60  }
 0x83d   : > { %3685 = vperm.xlu0 %5915, %v5371_v24  }
 0x85f   : > { %v6189_v58 = vpop.permute.xlu0 %6188 }
 0x860   : > { %v6191_v25 = vunpack.i.h.bf16 %v6189_v58  ;;  %v6190_v1 = vunpack.i.l.bf16 %v6189_v58 }
 0x862   : > { %v2940_v54 = vsel %vm747_vm3, %v6190_v1, %v6191_v25 }
 0x863   : > { %v6199_v28 = vpop.permute.xlu1 %6198  ;;  %v6194_v3 = vpop.permute.xlu0 %6193 }
 0x864   : > { %v6201_v30 = vunpack.i.h.bf16 %v6199_v28  ;;  %v6200_v20 = vunpack.i.l.bf16 %v6199_v28  ;;  %v6196_v32 = vunpack.i.h.bf16 %v6194_v3  ;;  %v6195_v33 = vunpack.i.l.bf16 %v6194_v3 }
 0x866   : > { %v2941_v26 = vsel %vm747_vm3, %v6196_v32, %v6200_v20  ;;  %v2939_v36 = vsel %vm747_vm3, %v6195_v33, %v6190_v1  ;;  %v2942_v38 = vsel %vm747_vm3, %v6200_v20, %v6201_v30  ;;  %v5304_v1 = vld [vmem:[%s8291_s4 + $0x1c0] sm:$0xff] }
 0x867   : > { %v5576_v39 = vpack.c.bf16 %v2941_v26, %v2939_v36  ;;  %v6204_v40 = vpop.permute.xlu1 %6203  ;;  %v5574_v21 = vpack.c.bf16 %v2942_v38, %v2940_v54 }
 0x868   : > { %v6206_v27 = vunpack.i.h.bf16 %v6204_v40  ;;  %v6205_v41 = vunpack.i.l.bf16 %v6204_v40 }
 0x869   : > { %5575 = vmatprep.subr.bf16.mxu1 %v5574_v21  ;;  %v5305_v21 = vld [vmem:[%s8291_s4 + $0x1c8] sm:$0xff] }
 0x86a   : > { %5577 = vmatpush1.bf16.msra.mxu1 %v5576_v39  ;;  %v2944_v62 = vsel %vm747_vm3, %v6205_v41, %v6206_v27 }
 0x86b   : > { %v6209_v29 = vpop.permute.xlu1 %6208  ;;  %v6214_v53 = vpop.permute.xlu0 %6213 }
 0x86c   : > { %v6211_v55 = vunpack.i.h.bf16 %v6209_v29  ;;  %v6210_v34 = vunpack.i.l.bf16 %v6209_v29  ;;  %v6216_v56 = vunpack.i.h.bf16 %v6214_v53  ;;  %v6215_v57 = vunpack.i.l.bf16 %v6214_v53 }
 0x86e   : > { %v2943_v42 = vsel %vm747_vm3, %v6210_v34, %v6205_v41  ;;  %v2945_v61 = vsel %vm747_vm3, %v6211_v55, %v6215_v57  ;;  %v2946_v35 = vsel %vm747_vm3, %v6215_v57, %v6216_v56  ;;  %v5306_v57 = vld [vmem:[%s8291_s4 + $0x1d0] sm:$0xff] }
 0x86f   : > { %v5580_v43 = vpack.c.bf16 %v2945_v61, %v2943_v42  ;;  %v6224_v5 = vpop.permute.xlu1 %6223  ;;  %v6219_v7 = vpop.permute.xlu0 %6218  ;;  %v5578_v8 = vpack.c.bf16 %v2946_v35, %v2944_v62 }
 0x870   : > { %v6226_v9 = vunpack.i.h.bf16 %v6224_v5  ;;  %v6225_v11 = vunpack.i.l.bf16 %v6224_v5  ;;  %v6221_v13 = vunpack.i.h.bf16 %v6219_v7  ;;  %v6220_v15 = vunpack.i.l.bf16 %v6219_v7 }
 0x871   : > { %5579 = vmatprep.subr.bf16.mxu1 %v5578_v8 }
 0x872   : > { %5581 = vmatpush1.bf16.msra.mxu1 %v5580_v43  ;;  %v2948_v48 = vsel %vm747_vm3, %v6220_v15, %v6221_v13  ;;  %v2950_v16 = vsel %vm747_vm3, %v6225_v11, %v6226_v9 }
 0x873   : > { %v6234_v17 = vpop.permute.xlu1 %6233  ;;  %v6229_v18 = vpop.permute.xlu0 %6228  ;;  %v5582_v44 = vpack.c.bf16 %v2950_v16, %v2948_v48 }
 0x874   : > { %v6231_v50 = vunpack.i.h.bf16 %v6229_v18  ;;  %v6230_v49 = vunpack.i.l.bf16 %v6229_v18  ;;  %v6236_v52 = vunpack.i.h.bf16 %v6234_v17  ;;  %v6235_v51 = vunpack.i.l.bf16 %v6234_v17 }
 0x875   : > { %5583 = vmatprep.subr.bf16.mxu1 %v5582_v44 }
 0x876   : > { %v2949_v22 = vsel %vm747_vm3, %v6231_v50, %v6225_v11  ;;  %v2947_v63 = vsel %vm747_vm3, %v6230_v49, %v6220_v15  ;;  %v3138_v30 = vsel %vm3136_vm10, %v6235_v51, %v6236_v52  ;;  %v5307_v15 = vld [vmem:[%s8291_s4 + $0x1d8] sm:$0xff] }
 0x877   : > { %v5584_v19 = vpack.c.bf16 %v2949_v22, %v2947_v63  ;;  %v6244_v23 = vpop.permute.xlu1 %6243  ;;  %v6239_v46 = vpop.permute.xlu0 %6238 }
 0x878   : > { %v6246_v60 = vunpack.i.h.bf16 %v6244_v23  ;;  %v6245_v24 = vunpack.i.l.bf16 %v6244_v23  ;;  %v6241_v58 = vunpack.i.h.bf16 %v6239_v46  ;;  %v6240_v25 = vunpack.i.l.bf16 %v6239_v46  ;;  %v5308_v23 = vld [vmem:[%s8291_s4 + $0x1e0] sm:$0xff] }
 0x879   : > { %5585 = vmatpush1.bf16.msra.mxu1 %v5584_v19 }
 0x87a   : > { %v3137_v28 = vsel %vm3136_vm10, %v6245_v24, %v6235_v51  ;;  %v3139_v3 = vsel %vm3136_vm10, %v6246_v60, %v6240_v25  ;;  %v3140_v20 = vsel %vm3136_vm10, %v6240_v25, %v6241_v58 }
 0x87b   : > { %v5588_v32 = vpack.c.bf16 %v3139_v3, %v3137_v28  ;;  %v6259_v33 = vpop.permute.xlu1 %6258  ;;  %v6249_v26 = vpop.permute.xlu0 %6248  ;;  %v5586_v36 = vpack.c.bf16 %v3140_v20, %v3138_v30  ;;  %v5310_v30 = vld [vmem:[%s8291_s4 + $0x1f0] sm:$0xff] }
 0x87c   : > { %v6261_v54 = vunpack.i.h.bf16 %v6259_v33  ;;  %v6260_v38 = vunpack.i.l.bf16 %v6259_v33  ;;  %v6251_v39 = vunpack.i.h.bf16 %v6249_v26  ;;  %v6250_v40 = vunpack.i.l.bf16 %v6249_v26  ;;  %5312 = vmatmul.mubr.msk.f32.vlgmr.msra.gmra.mrb[16].mxu1 %vm772_vm5, %v5304_v1  ;;  %v5309_v1 = vld [vmem:[%s8291_s4 + $0x1e8] sm:$0xff] }
 0x87d   : > { %5587 = vmatprep.subr.bf16.mxu1 %v5586_v36  ;;  %3057 = vmatprep.mubr.f32.mxu1 %v6703_v0 }
 0x87e   : > { %5589 = vmatpush1.bf16.msra.mxu1 %v5588_v32  ;;  %v3142_v27 = vsel %vm3136_vm10, %v6250_v40, %v6251_v39  ;;  %v3144_v41 = vsel %vm3136_vm10, %v6260_v38, %v6261_v54  ;;  %v5311_v54 = vld [vmem:[%s8291_s4 + $0x1f8] sm:$0xff] }
 0x87f   : > { %v6264_v29 = vpop.permute.xlu1 %6263  ;;  %v6254_v53 = vpop.permute.xlu0 %6253  ;;  %v5590_v55 = vpack.c.bf16 %v3144_v41, %v3142_v27 }
 0x880   : > { %v6256_v34 = vunpack.i.h.bf16 %v6254_v53  ;;  %v6255_v56 = vunpack.i.l.bf16 %v6254_v53  ;;  %5313 = vmatmul.mubr.msk.f32.gmra.mrb[18].mxu1 %vm772_vm5, %v5305_v21  ;;  %v6266_v42 = vunpack.i.h.bf16 %v6264_v29  ;;  %v6265_v61 = vunpack.i.l.bf16 %v6264_v29 }
 0x881   : > { %5591 = vmatprep.subr.bf16.mxu1 %v5590_v55  ;;  %3063 = vmatprep.mubr.f32.mxu1 %v6703_v0 }
 0x882   : > { %v3143_v62 = vsel %vm3136_vm10, %v6256_v34, %v6260_v38  ;;  %v3141_v35 = vsel %vm3136_vm10, %v6255_v56, %v6250_v40  ;;  %v3146_v17 = vsel %vm3136_vm10, %v6265_v61, %v6266_v42 }
 0x883   : > { %v5592_v43 = vpack.c.bf16 %v3143_v62, %v3141_v35  ;;  %v6274_v5 = vpop.permute.xlu1 %6273  ;;  %v6269_v7 = vpop.permute.xlu0 %6268 }
 0x884   : > { %v6276_v8 = vunpack.i.h.bf16 %v6274_v5  ;;  %v6275_v9 = vunpack.i.l.bf16 %v6274_v5  ;;  %v6271_v11 = vunpack.i.h.bf16 %v6269_v7  ;;  %v6270_v13 = vunpack.i.l.bf16 %v6269_v7  ;;  %5314 = vmatmul.mubr.msk.f32.gmra.mrb[20].mxu1 %vm772_vm5, %v5306_v57 }
 0x885   : > { %5593 = vmatpush1.bf16.msra.mxu1 %v5592_v43  ;;  %3069 = vmatprep.mubr.f32.mxu1 %v6703_v0 }
 0x886   : > { %v3145_v48 = vsel %vm3136_vm10, %v6275_v9, %v6265_v61  ;;  %v3147_v16 = vsel %vm3136_vm10, %v6276_v8, %v6270_v13  ;;  %v3148_v18 = vsel %vm3136_vm10, %v6270_v13, %v6271_v11  ;;  %v5296_v61 = vld [vmem:[%s8291_s4 + $0x180] sm:$0xff]  ;;  %v5297_v11 = vld [vmem:[%s8291_s4 + $0x188] sm:$0xff] }
 0x887   : > { %v5596_v44 = vpack.c.bf16 %v3147_v16, %v3145_v48  ;;  %v6284_v50 = vpop.permute.xlu1 %6283  ;;  %v6279_v49 = vpop.permute.xlu0 %6278  ;;  %v5594_v52 = vpack.c.bf16 %v3148_v18, %v3146_v17 }
 0x888   : > { %v6286_v51 = vunpack.i.h.bf16 %v6284_v50  ;;  %v6285_v22 = vunpack.i.l.bf16 %v6284_v50  ;;  %v6281_v63 = vunpack.i.h.bf16 %v6279_v49  ;;  %v6280_v19 = vunpack.i.l.bf16 %v6279_v49  ;;  %5315 = vmatmul.mubr.msk.f32.gmra.mrb[22].mxu1 %vm772_vm5, %v5307_v15  ;;  %v5299_v49 = vld [vmem:[%s8291_s4 + $0x198] sm:$0xff] }
 0x889   : > { %5595 = vmatprep.subr.bf16.mxu1 %v5594_v52  ;;  %3075 = vmatprep.mubr.f32.mxu1 %v6703_v0  ;;  %v5300_v52 = vld [vmem:[%s8291_s4 + $0x1a0] sm:$0xff] }
 0x88a   : > { %5597 = vmatpush1.bf16.msra.mxu1 %v5596_v44  ;;  %v3345_v46 = vsel %vm3343_vm11, %v6280_v19, %v6281_v63  ;;  %v3347_v60 = vsel %vm3343_vm11, %v6285_v22, %v6286_v51  ;;  %v5298_v44 = vld [vmem:[%s8291_s4 + $0x190] sm:$0xff]  ;;  %v5301_v51 = vld [vmem:[%s8291_s4 + $0x1a8] sm:$0xff]  ;;  %v5303_v63 = vld [vmem:[%s8291_s4 + $0x1b8] sm:$0xff] }
 0x88b   : > { %v6294_v24 = vpop.permute.xlu1 %6293  ;;  %v6289_v58 = vpop.permute.xlu0 %6288  ;;  %v5598_v25 = vpack.c.bf16 %v3347_v60, %v3345_v46  ;;  %v5330_v46 = vld [vmem:[%s8291_s4 + $0x210] sm:$0xff]  ;;  %v5331_v60 = vld [vmem:[%s8291_s4 + $0x218] sm:$0xff] }
 0x88c   : > { %5316 = vmatmul.mubr.msk.f32.gmra.mrb[24].mxu1 %vm772_vm5, %v5308_v23  ;;  %v6291_v32 = vunpack.i.h.bf16 %v6289_v58  ;;  %v6290_v33 = vunpack.i.l.bf16 %v6289_v58  ;;  %v6296_v39 = vunpack.i.h.bf16 %v6294_v24  ;;  %v6295_v40 = vunpack.i.l.bf16 %v6294_v24  ;;  %v5329_v23 = vld [vmem:[%s8291_s4 + $0x208] sm:$0xff]  ;;  %v5332_v24 = vld [vmem:[%s8291_s4 + $0x220] sm:$0xff] }
 0x88d   : > { %5599 = vmatprep.subr.bf16.mxu1 %v5598_v25  ;;  %3081 = vmatprep.mubr.f32.mxu1 %v6703_v0  ;;  %v5333_v58 = vld [vmem:[%s8291_s4 + $0x228] sm:$0xff]  ;;  %v5334_v25 = vld [vmem:[%s8291_s4 + $0x230] sm:$0xff] }
 0x88e   : > { %v3346_v27 = vsel %vm3343_vm11, %v6291_v32, %v6285_v22  ;;  %v3344_v41 = vsel %vm3343_vm11, %v6290_v33, %v6280_v19  ;;  %v3349_v43 = vsel %vm3343_vm11, %v6295_v40, %v6296_v39  ;;  %v5302_v22 = vld [vmem:[%s8291_s4 + $0x1b0] sm:$0xff]  ;;  %v5328_v19 = vld [vmem:[%s8291_s4 + $0x200] sm:$0xff] }
 0x88f   : > { %v6304_v28 = vpop.permute.xlu0 %6303  ;;  %v6299_v3 = vpop.permute.xlu1 %6298  ;;  %v5600_v62 = vpack.c.bf16 %v3346_v27, %v3344_v41 }
 0x890   : > { %5317 = vmatmul.mubr.msk.f32.gmra.mrb[26].mxu1 %vm772_vm5, %v5309_v1  ;;  %v6306_v26 = vunpack.i.h.bf16 %v6304_v28  ;;  %v6305_v36 = vunpack.i.l.bf16 %v6304_v28  ;;  %v6300_v21 = vunpack.i.l.bf16 %v6299_v3  ;;  %v6301_v29 = vunpack.i.h.bf16 %v6299_v3  ;;  %v5335_v1 = vld [vmem:[%s8291_s4 + $0x238] sm:$0xff]  ;;  %v5276_v28 = vld [vmem:[%s8293_s6 + $0x60] sm:$0xff]  ;;  %v5277_v3 = vld [vmem:[%s8293_s6 + $0x68] sm:$0xff] }
 0x891   : > { %3087 = vmatprep.mubr.f32.mxu1 %v6703_v0  ;;  %5292 = vmatmul.mubr.msk.f32.gmra.mrb[16].mxu0 %vm1515_vm7, %v5276_v28 }
 0x892   : > { %v3351_v53 = vsel %vm3343_vm11, %v6305_v36, %v6306_v26  ;;  %v3348_v35 = vsel %vm3343_vm11, %v6300_v21, %v6295_v40  ;;  %v3350_v5 = vsel %vm3343_vm11, %v6301_v29, %v6305_v36  ;;  %2730 = vmatprep.mubr.f32.mxu0 %v6703_v0 }
 0x893   : > { %v6309_v20 = vpop.permute.xlu0 %6308  ;;  %v6314_v38 = vpop.permute.xlu1 %6313  ;;  %v5602_v9 = vpack.c.bf16 %v3351_v53, %v3349_v43  ;;  %v5604_v48 = vpack.c.bf16 %v3350_v5, %v3348_v35 }
 0x894   : > { %5318 = vmatmul.mubr.msk.f32.gmra.mrb[28].mxu1 %vm772_vm5, %v5310_v30  ;;  %v6316_v55 = vunpack.i.h.bf16 %v6314_v38  ;;  %v6315_v34 = vunpack.i.l.bf16 %v6314_v38  ;;  %v6311_v56 = vunpack.i.h.bf16 %v6309_v20  ;;  %v6310_v57 = vunpack.i.l.bf16 %v6309_v20  ;;  %v5278_v30 = vld [vmem:[%s8293_s6 + $0x70] sm:$0xff]  ;;  %v5279_v20 = vld [vmem:[%s8293_s6 + $0x78] sm:$0xff] }
 0x895   : > { %3093 = vmatprep.mubr.f32.mxu1 %v6703_v0  ;;  %5293 = vmatmul.mubr.msk.f32.gmra.mrb[18].mxu0 %vm1515_vm7, %v5277_v3 }
 0x896   : > { %v3353_v13 = vsel %vm3343_vm11, %v6310_v57, %v6311_v56  ;;  %v3355_v15 = vsel %vm3343_vm11, %v6315_v34, %v6316_v55  ;;  %2736 = vmatprep.mubr.f32.mxu0 %v6703_v0 }
 0x897   : > { %v6319_v42 = vpop.permute.xlu0 %6318  ;;  %v5606_v18 = vpack.c.bf16 %v3355_v15, %v3353_v13 }
 0x898   : > { %5319 = vmatmul.mubr.msk.f32.gmra.mrb[30].mxu1 %vm772_vm5, %v5311_v54  ;;  %v6321_v7 = vunpack.i.h.bf16 %v6319_v42  ;;  %v6320_v8 = vunpack.i.l.bf16 %v6319_v42 }
 0x899   : > { %3249 = vmatprep.mubr.f32.mxu1 %v6703_v0  ;;  %5294 = vmatmul.mubr.msk.f32.gmra.mrb[20].mxu0 %vm1515_vm7, %v5278_v30 }
 0x89a   : > { %v3354_v16 = vsel %vm3343_vm11, %v6321_v7, %v6315_v34  ;;  %v3352_v17 = vsel %vm3343_vm11, %v6320_v8, %v6310_v57  ;;  %2742 = vmatprep.mubr.f32.mxu0 %v6703_v0 }
 0x89b   : > { %v5608_v50 = vpack.c.bf16 %v3354_v16, %v3352_v17 }
 0x89c   : > { %5320 = vmatmul.mubr.msk.f32.vlgmr.msra.gmra.mrb[16].mxu1 %vm772_vm5, %v5296_v61 }
 0x89d   : > { %5601 = vmatpush1.bf16.msra.mxu1 %v5600_v62  ;;  %3255 = vmatprep.mubr.f32.mxu1 %v6703_v0 }
 0x89e   : > { %5603 = vmatprep.subr.bf16.mxu1 %v5602_v9  ;;  %5295 = vmatmul.mubr.msk.f32.gmra.mrb[22].mxu0 %vm1515_vm7, %v5279_v20 }
 0x89f   : > { %3796 = vmatprep.mubr.f32.mxu0 %v6703_v0 }
 0x8a0   : > { %5321 = vmatmul.mubr.msk.f32.gmra.mrb[18].mxu1 %vm772_vm5, %v5297_v11 }
 0x8a1   : > { %5605 = vmatpush1.bf16.msra.mxu1 %v5604_v48  ;;  %3261 = vmatprep.mubr.f32.mxu1 %v6703_v0 }
 0x8a2   : > { %5607 = vmatprep.subr.bf16.mxu1 %v5606_v18 }
 0x8a4   : > { %5322 = vmatmul.mubr.msk.f32.gmra.mrb[20].mxu1 %vm772_vm5, %v5298_v44  ;;  %v3553_v39 = vpop.permute.xlu1 %3552 }
 0x8a5   : > { %5609 = vmatpush1.bf16.msra.mxu1 %v5608_v50  ;;  %3267 = vmatprep.mubr.f32.mxu1 %v6703_v0 }
 0x8a8   : > { %5323 = vmatmul.mubr.msk.f32.gmra.mrb[22].mxu1 %vm772_vm5, %v5299_v49  ;;  %v3558_v27 = vpop.permute.xlu0 %3557  ;;  %v3563_v29 = vpop.permute.xlu1 %3562 }
 0x8a9   : > { %3273 = vmatprep.mubr.f32.mxu1 %v6703_v0 }
 0x8ac   : > { %5324 = vmatmul.mubr.msk.f32.gmra.mrb[24].mxu1 %vm772_vm5, %v5300_v52  ;;  %v3568_v61 = vpop.permute.xlu0 %3567  ;;  %v3533_v5 = vpop.permute.xlu1 %3532 }
 0x8ad   : > { %3279 = vmatprep.mubr.f32.mxu1 %v6703_v0 }
 0x8b0   : > { %5325 = vmatmul.mubr.msk.f32.gmra.mrb[26].mxu1 %vm772_vm5, %v5301_v51  ;;  %v3538_v16 = vpop.permute.xlu0 %3537 }
 0x8b1   : > { %3285 = vmatprep.mubr.f32.mxu1 %v6703_v0 }
 0x8b4   : > { %5326 = vmatmul.mubr.msk.f32.gmra.mrb[28].mxu1 %vm772_vm5, %v5302_v22 }
 0x8b5   : > { %3291 = vmatprep.mubr.f32.mxu1 %v6703_v0 }
 0x8b8   : > { %5327 = vmatmul.mubr.msk.f32.gmra.mrb[30].mxu1 %vm772_vm5, %v5303_v63 }
 0x8b9   : > { %3456 = vmatprep.mubr.f32.mxu1 %v6703_v0 }
 0x8bc   : > { %5336 = vmatmul.mubr.msk.f32.vlgmr.msra.gmra.mrb[16].mxu1 %vm772_vm5, %v5328_v19 }
 0x8bd   : > { %3462 = vmatprep.mubr.f32.mxu1 %v6703_v0 }
 0x8c0   : > { %5337 = vmatmul.mubr.msk.f32.gmra.mrb[18].mxu1 %vm772_vm5, %v5329_v23 }
 0x8c1   : > { %3468 = vmatprep.mubr.f32.mxu1 %v6703_v0 }
 0x8c4   : > { %5338 = vmatmul.mubr.msk.f32.gmra.mrb[20].mxu1 %vm772_vm5, %v5330_v46 }
 0x8c5   : > { %3474 = vmatprep.mubr.f32.mxu1 %v6703_v0 }
 0x8c8   : > { %5339 = vmatmul.mubr.msk.f32.gmra.mrb[22].mxu1 %vm772_vm5, %v5331_v60 }
 0x8c9   : > { %3480 = vmatprep.mubr.f32.mxu1 %v6703_v0 }
 0x8cc   : > { %5340 = vmatmul.mubr.msk.f32.gmra.mrb[24].mxu1 %vm772_vm5, %v5332_v24 }
 0x8cd   : > { %3486 = vmatprep.mubr.f32.mxu1 %v6703_v0 }
 0x8d0   : > { %5341 = vmatmul.mubr.msk.f32.gmra.mrb[26].mxu1 %vm772_vm5, %v5333_v58 }
 0x8d1   : > { %3492 = vmatprep.mubr.f32.mxu1 %v6703_v0 }
 0x8d4   : > { %5342 = vmatmul.mubr.msk.f32.gmra.mrb[28].mxu1 %vm772_vm5, %v5334_v25 }
 0x8d5   : > { %3498 = vmatprep.mubr.f32.mxu1 %v6703_v0 }
 0x8d8   : > { %5343 = vmatmul.mubr.msk.f32.gmra.mrb[30].mxu1 %vm772_vm5, %v5335_v1  ;;  %v3543_v1 = vpop.permute.xlu1 %3542 }
 0x8d9   : > { %4147 = vmatprep.mubr.f32.mxu1 %v6703_v0 }
 0x98f   : > { %v3458_v32 = vpop.f32.mrb[16].mxu1 }
 0x990   : > { %v3460_v33 = vpop.f32.mrb[17].mxu1  ;;  %v3570_v8 = vadd.f32 %v3533_v5, %v3458_v32 }
 0x991   : > { %v3571_v17 = vadd.f32 %v3533_v5, %v3460_v33 }
 0x993   : > { %v3464_v26 = vpop.f32.mrb[18].mxu1 }
 0x994   : > { %v3466_v36 = vpop.f32.mrb[19].mxu1  ;;  %v3572_v44 = vadd.f32 %v3538_v16, %v3464_v26 }
 0x995   : > { %v3573_v24 = vadd.f32 %v3538_v16, %v3466_v36 }
 0x997   : > { %v3470_v54 = vpop.f32.mrb[20].mxu1 }
 0x998   : > { %v3472_v38 = vpop.f32.mrb[21].mxu1  ;;  %v3574_v3 = vadd.f32 %v3543_v1, %v3470_v54 }
 0x999   : > { %v3575_v20 = vadd.f32 %v3543_v1, %v3472_v38 }
 0x99b   : > { %v7764_v40 = vpop.f32.mrb[22].mxu1 }
 0x99c   : > { %v7766_v21 = vpop.f32.mrb[23].mxu1 }
 0x99f   : > { %v3482_v41 = vpop.f32.mrb[24].mxu1 }
 0x9a0   : > { %v3578_v53 = vadd.f32 %v3553_v39, %v3482_v41  ;;  %v3484_v55 = vpop.f32.mrb[25].mxu1 }
 0x9a1   : > { %v3579_v34 = vadd.f32 %v3553_v39, %v3484_v55 }
 0x9a2   : > { %v5352_v56 = vmul.f32 -1.442695, %v3578_v53 }
 0x9a3   : > { %v5353_v57 = vmul.f32 -1.442695, %v3579_v34  ;;  %v3488_v42 = vpop.f32.mrb[26].mxu1 }
 0x9a4   : > { %6508 = vpow2.f32 %v5352_v56  ;;  %v3580_v62 = vadd.f32 %v3558_v27, %v3488_v42  ;;  %v3490_v35 = vpop.f32.mrb[27].mxu1 }
 0x9a5   : > { %6510 = vpow2.f32 %v5353_v57  ;;  %v3581_v43 = vadd.f32 %v3558_v27, %v3490_v35  ;;  %v3548_v27 = vpop.permute.xlu0 %3547 }
 0x9a6   : > { %v5354_v7 = vmul.f32 -1.442695, %v3580_v62  ;;  %v3577_v38 = vadd.f32 %v3548_v27, %v7766_v21 }
 0x9a7   : > { %v5355_v9 = vmul.f32 -1.442695, %v3581_v43  ;;  %v3494_v11 = vpop.f32.mrb[28].mxu1 }
 0x9a8   : > { %6512 = vpow2.f32 %v5354_v7  ;;  %v3582_v13 = vadd.f32 %v3563_v29, %v3494_v11  ;;  %v3496_v15 = vpop.f32.mrb[29].mxu1 }
 0x9a9   : > { %6514 = vpow2.f32 %v5355_v9  ;;  %v3583_v48 = vadd.f32 %v3563_v29, %v3496_v15  ;;  %v3576_v29 = vadd.f32 %v3548_v27, %v7764_v40 }
 0x9aa   : > { %v5356_v18 = vmul.f32 -1.442695, %v3582_v13  ;;  %6516 = vtanh.f32 %v3570_v8 }
 0x9ab   : > { %v5357_v50 = vmul.f32 -1.442695, %v3583_v48  ;;  %v3500_v49 = vpop.f32.mrb[30].mxu1 }
 0x9ac   : > { %6518 = vpow2.f32 %v5356_v18  ;;  %v3584_v52 = vadd.f32 %v3568_v61, %v3500_v49  ;;  %v3502_v51 = vpop.f32.mrb[31].mxu1 }
 0x9ad   : > { %6520 = vpow2.f32 %v5357_v50  ;;  %v3585_v22 = vadd.f32 %v3568_v61, %v3502_v51 }
 0x9ae   : > { %v6509_v63 = vpop.eup %6508  ;;  %6522 = vtanh.f32 %v3571_v17  ;;  %v5358_v19 = vmul.f32 -1.442695, %v3584_v52 }
 0x9af   : > { %v6511_v23 = vpop.eup %6510  ;;  %6524 = vtanh.f32 %v3572_v44  ;;  %v3618_v46 = vadd.f32 1.0, %v6509_v63  ;;  %v5359_v60 = vmul.f32 -1.442695, %v3585_v22 }
 0x9b0   : > { %v3619_v58 = vadd.f32 1.0, %v6511_v23  ;;  %6526 = vpow2.f32 %v5358_v19  ;;  %v5360_v19 = vld [vmem:[%s8293_s6 + $0x80] sm:$0xff]  ;;  %v5361_v23 = vld [vmem:[%s8293_s6 + $0x88] sm:$0xff] }
 0x9b1   : > { %6528 = vrcp.f32 %v3618_v46  ;;  %v5362_v46 = vld [vmem:[%s8293_s6 + $0x90] sm:$0xff] }
 0x9b2   : > { %v6513_v25 = vpop.eup %6512  ;;  %6530 = vrcp.f32 %v3619_v58 }
 0x9b3   : > { %v6515_v28 = vpop.eup %6514  ;;  %v3620_v30 = vadd.f32 1.0, %v6513_v25  ;;  %6532 = vpow2.f32 %v5359_v60  ;;  %v5363_v60 = vld [vmem:[%s8293_s6 + $0x98] sm:$0xff] }
 0x9b4   : > { %6534 = vtanh.f32 %v3573_v24  ;;  %v3621_v32 = vadd.f32 1.0, %v6515_v28  ;;  %v6517_v33 = vpop.eup %6516  ;;  %v3671_v24 = vpop.permute.xlu1 %3670 }
 0x9b5   : > { %6536 = vrcp.f32 %v3620_v30 }
 0x9b6   : > { %v6519_v26 = vpop.eup %6518  ;;  %6538 = vrcp.f32 %v3621_v32 }
 0x9b7   : > { %v6521_v39 = vpop.eup %6520  ;;  %6540 = vtanh.f32 %v3574_v3  ;;  %v3622_v36 = vadd.f32 1.0, %v6519_v26  ;;  %v3676_v3 = vpop.permute.xlu0 %3675 }
 0x9b8   : > { %v6523_v41 = vpop.eup %6522  ;;  %6542 = vtanh.f32 %v3575_v20  ;;  %v3623_v53 = vadd.f32 1.0, %v6521_v39  ;;  %v3681_v26 = vpop.permute.xlu1 %3680 }
 0x9b9   : > { %v6525_v55 = vpop.eup %6524  ;;  %6544 = vrcp.f32 %v3622_v36 }
 0x9ba   : > { %v6527_v54 = vpop.eup %6526  ;;  %6546 = vrcp.f32 %v3623_v53 }
 0x9bb   : > { %v6529_v34 = vpop.eup %6528  ;;  %v3624_v56 = vadd.f32 1.0, %v6527_v54  ;;  %6548 = vtanh.f32 %v3576_v29  ;;  %v3686_v29 = vpop.permute.xlu0 %3685 }
 0x9bc   : > { %v6531_v57 = vpop.eup %6530  ;;  %v3642_v42 = vmul.f32 %v6529_v34, %v6517_v33 }
 0x9bd   : > { %v6533_v61 = vpop.eup %6532  ;;  %6550 = vrcp.f32 %v3624_v56  ;;  %v3643_v62 = vmul.f32 %v6531_v57, %v6523_v41 }
 0x9be   : > { %v6535_v35 = vpop.eup %6534  ;;  %v3625_v43 = vadd.f32 1.0, %v6533_v61  ;;  %6552 = vtanh.f32 %v3577_v38 }
 0x9bf   : > { %v6537_v5 = vpop.eup %6536 }
 0x9c0   : > { %v6539_v40 = vpop.eup %6538  ;;  %6554 = vrcp.f32 %v3625_v43  ;;  %v3644_v7 = vmul.f32 %v6537_v5, %v6525_v55 }
 0x9c1   : > { %v6541_v8 = vpop.eup %6540  ;;  %v3645_v9 = vmul.f32 %v6539_v40, %v6535_v35 }
 0x9c2   : > { %v6543_v11 = vpop.eup %6542  ;;  %v5612_v13 = vpack.c.bf16 %v3644_v7, %v3642_v42  ;;  %v3846_v42 = vld [vmem:[#allocation2 + $0x8] sm:$0xff]  ;;  %v3849_v7 = vld [vmem:[#allocation2 + $0x20] sm:$0xff] }
 0x9c3   : > { %v6545_v15 = vpop.eup %6544  ;;  %v5610_v21 = vpack.c.bf16 %v3645_v9, %v3643_v62 }
 0x9c4   : > { %v6547_v48 = vpop.eup %6546  ;;  %v3646_v16 = vmul.f32 %v6545_v15, %v6541_v8  ;;  %v3852_v15 = vld [vmem:[#allocation2 + $0x38] sm:$0xff] }
 0x9c5   : > { %5611 = vmatprep.subr.bf16.mxu0 %v5610_v21  ;;  %v3647_v17 = vmul.f32 %v6547_v48, %v6543_v11  ;;  %v6549_v18 = vpop.eup %6548 }
 0x9c6   : > { %5613 = vmatpush1.bf16.msra.mxu0 %v5612_v13 }
 0x9c7   : > { %v6551_v44 = vpop.eup %6550 }
 0x9c8   : > { %v3648_v50 = vmul.f32 %v6551_v44, %v6549_v18  ;;  %v6553_v49 = vpop.eup %6552 }
 0x9ca   : > { %v6555_v52 = vpop.eup %6554  ;;  %v5616_v51 = vpack.c.bf16 %v3648_v50, %v3646_v16  ;;  %v3855_v50 = vld [vmem:[#allocation2 + $0x50] sm:$0xff] }
 0x9cb   : > { %v3649_v22 = vmul.f32 %v6555_v52, %v6553_v49 }
 0x9cd   : > { %v5614_v63 = vpack.c.bf16 %v3649_v22, %v3647_v17 }
 0x9cf   : > { %5615 = vmatprep.subr.bf16.mxu0 %v5614_v63 }
 0x9d0   : > { %5617 = vmatpush1.bf16.msra.mxu0 %v5616_v51 }
 0x9d3   : > { %5376 = vmatmul.mubr.msk.f32.vlgmr.msra.gmra.mrb[48].mxu0 %vm1515_vm7, %v5360_v19 }
 0x9d4   : > { %3802 = vmatprep.mubr.f32.mxu0 %v6703_v0 }
 0x9d7   : > { %5377 = vmatmul.mubr.msk.f32.gmra.mrb[50].mxu0 %vm1515_vm7, %v5361_v23 }
 0x9d8   : > { %3808 = vmatprep.mubr.f32.mxu0 %v6703_v0 }
 0x9db   : > { %5378 = vmatmul.mubr.msk.f32.gmra.mrb[52].mxu0 %vm1515_vm7, %v5362_v46 }
 0x9dc   : > { %3814 = vmatprep.mubr.f32.mxu0 %v6703_v0 }
 0x9df   : > { %5379 = vmatmul.mubr.msk.f32.gmra.mrb[54].mxu0 %vm1515_vm7, %v5363_v60 }
 0x9e0   : > { %3820 = vmatprep.mubr.f32.mxu0 %v6703_v0 }
 0xaa6   : > { %v3798_v58 = vpop.f32.mrb[48].mxu0 }
 0xaa7   : > { %v3799_v25 = vadd.f32 %v3798_v58, %v3671_v24  ;;  %v3800_v1 = vpop.f32.mrb[49].mxu0 }
 0xaa8   : > { %v3801_v28 = vadd.f32 %v3800_v1, %v3671_v24 }
 0xaa9   : > { %3865 = vrot.lane.b32.xlu1 %v3799_v25, %s6705_s26 }
 0xaaa   : > { %v3804_v30 = vpop.f32.mrb[50].mxu0  ;;  %3867 = vrot.lane.b32.xlu0 %v3801_v28, %s6705_s26 }
 0xaab   : > { %v3805_v20 = vadd.f32 %v3804_v30, %v3676_v3  ;;  %v3806_v32 = vpop.f32.mrb[51].mxu0  ;;  %v3971_v30 = vld [vmem:[#allocation2 + $0x88] sm:$0xff] }
 0xaac   : > { %v3807_v33 = vadd.f32 %v3806_v32, %v3676_v3  ;;  %v3970_v32 = vld [vmem:[#allocation2 + $0x70] sm:$0xff] }
 0xaad   : > { %3869 = vrot.lane.b32.xlu1 %v3805_v20, %s6705_s26  ;;  %v7858_v20 = vld [vmem:[#allocation2 + $0x68] sm:$0xff] }
 0xaae   : > { %v3810_v39 = vpop.f32.mrb[52].mxu0  ;;  %3871 = vrot.lane.b32.xlu0 %v3807_v33, %s6705_s26  ;;  %v7862_v33 = vld [vmem:[#allocation2 + $0x80] sm:$0xff] }
 0xaaf   : > { %v3811_v27 = vadd.f32 %v3810_v39, %v3681_v26  ;;  %v3812_v36 = vpop.f32.mrb[53].mxu0  ;;  %v6352_v39 = vpack.i.bf16 %v3970_v32, %v7858_v20 }
 0xab0   : > { %v3813_v41 = vadd.f32 %v3812_v36, %v3681_v26  ;;  %v6357_v26 = vpack.i.bf16 %v3971_v30, %v7862_v33  ;;  %v6606_v36 = vld [vmem:[#allocation2 + $0x60] sm:$0xff] }
 0xab1   : > { %3873 = vrot.lane.b32.xlu1 %v3811_v27, %s6705_s26  ;;  %v6605_v27 = vld [vmem:[#allocation2 + $0x78] sm:$0xff] }
 0xab2   : > { %v3816_v53 = vpop.f32.mrb[54].mxu0  ;;  %3875 = vrot.lane.b32.xlu0 %v3813_v41, %s6705_s26  ;;  %v6362_v41 = vpack.i.bf16 %v6605_v27, %v6606_v36 }
 0xab3   : > { %v3817_v55 = vadd.f32 %v3816_v53, %v3686_v29  ;;  %v3818_v54 = vpop.f32.mrb[55].mxu0  ;;  %v5365_v53 = vld [vmem:[%s8293_s6 + $0xa8] sm:$0xff] }
 0xab4   : > { %v3819_v34 = vadd.f32 %v3818_v54, %v3686_v29  ;;  %v5364_v29 = vld [vmem:[%s8293_s6 + $0xa0] sm:$0xff]  ;;  %v5437_v54 = vld [vmem:[%s8292_s5 + $0xe8] sm:$0xff] }
 0xab5   : > { %3877 = vrot.lane.b32.xlu1 %v3817_v55, %s6705_s26  ;;  %5380 = vmatmul.mubr.msk.f32.gmra.mrb[16].mxu0 %vm1515_vm7, %v5364_v29  ;;  %v5366_v55 = vld [vmem:[%s8293_s6 + $0xb0] sm:$0xff] }
 0xab6   : > { %3879 = vrot.lane.b32.xlu0 %v3819_v34, %s6705_s26  ;;  %s6713_s26 = smov 112   ;;  %3826 = vmatprep.mubr.f32.mxu0 %v6703_v0  ;;  %v5436_v34 = vld [vmem:[%s8292_s5 + $0xe0] sm:$0xff] }
 0xab9   : > { %5381 = vmatmul.mubr.msk.f32.gmra.mrb[18].mxu0 %vm1515_vm7, %v5365_v53 }
 0xaba   : > { %3832 = vmatprep.mubr.f32.mxu0 %v6703_v0 }
 0xabd   : > { %5382 = vmatmul.mubr.msk.f32.gmra.mrb[20].mxu0 %vm1515_vm7, %v5366_v55 }
 0xabe   : > { %3838 = vmatprep.mubr.f32.mxu0 %v6703_v0 }
 0xb1b   : > { %v3866_v38 = vpop.permute.xlu1 %3865 }
 0xb1c   : > { %v3897_v56 = vadd.f32 %v3866_v38, %v7521_v31  ;;  %v3868_v57 = vpop.permute.xlu0 %3867 }
 0xb1d   : > { %v3881_v61 = vsel %vm473_vm0, %v3866_v38, %v3868_v57  ;;  %v3899_v62 = vadd.f32 %v3868_v57, %v7513_v47  ;;  %v5367_v38 = vld [vmem:[%s8293_s6 + $0xb8] sm:$0xff]  ;;  %v5438_v57 = vld [vmem:[%s8292_s5 + $0xf0] sm:$0xff] }
 0xb1e   : > { %3909 = vst.msk [vmem:[#allocation2] sm:$0xff] %vm615_vm2, %v3897_v56  ;;  %v7802_v35 = vadd.f32 %v3881_v61, %v3846_v42  ;;  %v5439_v56 = vld [vmem:[%s8292_s5 + $0xf8] sm:$0xff]  ;;  %5383 = vmatmul.mubr.msk.f32.gmra.mrb[22].mxu0 %vm1515_vm7, %v5367_v38  ;;  %v5433_v42 = vld [vmem:[%s8292_s5 + $0xc8] sm:$0xff]  ;;  %v5432_v61 = vld [vmem:[%s8292_s5 + $0xc0] sm:$0xff] }
 0xb1f   : > { %3911 = vst.msk [vmem:[#allocation2 + $0x10] sm:$0xff] %vm473_vm0, %v3899_v62  ;;  %v3870_v43 = vpop.permute.xlu1 %3869  ;;  %4491 = vmatprep.mubr.f32.mxu0 %v6703_v0  ;;  %v5435_v62 = vld [vmem:[%s8292_s5 + $0xd8] sm:$0xff] }
 0xb20   : > { %3910 = vst [vmem:[#allocation2 + $0x8] sm:$0xff] %v7802_v35  ;;  %v3900_v5 = vadd.f32 %v3870_v43, %v7523_v59  ;;  %v3872_v40 = vpop.permute.xlu0 %3871 }
 0xb21   : > { %v3882_v31 = vsel %vm473_vm0, %v3870_v43, %v3872_v40  ;;  %v3902_v8 = vadd.f32 %v3872_v40, %v7528_v2  ;;  %v5434_v43 = vld [vmem:[%s8292_s5 + $0xd0] sm:$0xff]  ;;  %v1471_v40 = vld [vmem:[%s8294_s7 + $0x20] sm:$0xff] }
 0xb22   : > { %3912 = vst.msk [vmem:[#allocation2 + $0x18] sm:$0xff] %vm615_vm2, %v3900_v5  ;;  %v7810_v47 = vadd.f32 %v3882_v31, %v3849_v7  ;;  %v1472_v5 = vld [vmem:[%s8294_s7 + $0x28] sm:$0xff]  ;;  %v5284_v31 = vld [vmem:[%s8294_s7 + $0x60] sm:$0xff] }
 0xb23   : > { %3914 = vst.msk [vmem:[#allocation2 + $0x28] sm:$0xff] %vm473_vm0, %v3902_v8  ;;  %v3874_v9 = vpop.permute.xlu1 %3873  ;;  %v5285_v7 = vld [vmem:[%s8294_s7 + $0x68] sm:$0xff] }
 0xb24   : > { %3913 = vst [vmem:[#allocation2 + $0x20] sm:$0xff] %v7810_v47  ;;  %v3903_v11 = vadd.f32 %v3874_v9, %v7538_v4  ;;  %v3876_v13 = vpop.permute.xlu0 %3875  ;;  %v5630_v59 = vpack.c.bf16 %v7810_v47, %v7802_v35  ;;  %v5373_v8 = vld [vmem:[%s8294_s7 + $0xa8] sm:$0xff] }
 0xb25   : > { %v3883_v21 = vsel %vm473_vm0, %v3874_v9, %v3876_v13  ;;  %v3905_v2 = vadd.f32 %v3876_v13, %v7534_v37  ;;  %v7829_v52 = vld [vmem:[#allocation2] sm:$0xff]  ;;  %v1473_v13 = vld [vmem:[%s8294_s7 + $0x30] sm:$0xff] }
 0xb26   : > { %3915 = vst.msk [vmem:[#allocation2 + $0x30] sm:$0xff] %vm615_vm2, %v3903_v11  ;;  %v7820_v48 = vadd.f32 %v3883_v21, %v3852_v15  ;;  %v3966_v16 = vld [vmem:[#allocation2 + $0x10] sm:$0xff]  ;;  %v5372_v9 = vld [vmem:[%s8294_s7 + $0xa0] sm:$0xff]  ;;  %v1474_v11 = vld [vmem:[%s8294_s7 + $0x38] sm:$0xff] }
 0xb27   : > { %3917 = vst.msk [vmem:[#allocation2 + $0x40] sm:$0xff] %vm473_vm0, %v3905_v2  ;;  %v3878_v17 = vpop.permute.xlu1 %3877  ;;  %v6322_v18 = vpack.i.bf16 %v3966_v16, %v7802_v35  ;;  %v5287_v15 = vld [vmem:[%s8294_s7 + $0x78] sm:$0xff]  ;;  %v5286_v21 = vld [vmem:[%s8294_s7 + $0x70] sm:$0xff]  ;;  %v5461_v2 = vld [vmem:[%s8294_s7 + $0xe8] sm:$0xff] }
 0xb28   : > { %3916 = vst [vmem:[#allocation2 + $0x38] sm:$0xff] %v7820_v48  ;;  %v3906_v4 = vadd.f32 %v3878_v17, %v7540_v45  ;;  %v3880_v44 = vpop.permute.xlu0 %3879  ;;  %v5460_v16 = vld [vmem:[%s8294_s7 + $0xe0] sm:$0xff]  ;;  %v5393_v35 = vld [vmem:[%s8291_s4 + $0x288] sm:$0xff] }
 0xb29   : > { %v3884_v49 = vsel %vm473_vm0, %v3878_v17, %v3880_v44  ;;  %v3908_v37 = vadd.f32 %v3880_v44, %v7544_v6  ;;  %6323 = vrot.lane.b32.xlu1 %v6322_v18, %s6706_s24  ;;  %v7831_v51 = vld [vmem:[#allocation2 + $0x18] sm:$0xff]  ;;  %v5462_v44 = vld [vmem:[%s8294_s7 + $0xf0] sm:$0xff] }
 0xb2a   : > { %3918 = vst.msk [vmem:[#allocation2 + $0x48] sm:$0xff] %vm615_vm2, %v3906_v4  ;;  %v7834_v22 = vadd.f32 %v3884_v49, %v3855_v50  ;;  %v6327_v63 = vpack.i.bf16 %v7831_v51, %v7829_v52  ;;  %v3967_v45 = vld [vmem:[#allocation2 + $0x28] sm:$0xff]  ;;  %v5632_v19 = vpack.c.bf16 %v7831_v51, %v7829_v52  ;;  %v5375_v17 = vld [vmem:[%s8294_s7 + $0xb8] sm:$0xff]  ;;  %v4902_v49 = vld [vmem:[%s8296_s9] sm:$0xff] }
 0xb2b   : > { %3920 = vst.msk [vmem:[#allocation2 + $0x58] sm:$0xff] %vm473_vm0, %v3908_v37  ;;  %v6332_v6 = vpack.i.bf16 %v3967_v45, %v7810_v47  ;;  %v5463_v4 = vld [vmem:[%s8294_s7 + $0xf8] sm:$0xff]  ;;  %v4903_v50 = vld [vmem:[%s8296_s9 + $0x8] sm:$0xff] }
 0xb2c   : > { %3919 = vst [vmem:[#allocation2 + $0x50] sm:$0xff] %v7834_v22  ;;  %v5634_v23 = vpack.c.bf16 %v7834_v22, %v7820_v48 }
 0xb2d   : > { %6328 = vrot.lane.b32.xlu1 %v6327_v63, %s6706_s24  ;;  %6333 = vrot.lane.b32.xlu0 %v6332_v6, %s6706_s24  ;;  %v7849_v24 = vld [vmem:[#allocation2 + $0x30] sm:$0xff] }
 0xb2e   : > { %v3968_v46 = vld [vmem:[#allocation2 + $0x40] sm:$0xff] }
 0xb2f   : > { %v6337_v60 = vpack.i.bf16 %v3968_v46, %v7820_v48  ;;  %v5638_v48 = vpack.c.bf16 %v7862_v33, %v7858_v20 }
 0xb31   : > { %6338 = vrot.lane.b32.xlu0 %v6337_v60, %s6706_s24  ;;  %v7851_v58 = vld [vmem:[#allocation2 + $0x48] sm:$0xff] }
 0xb32   : > { %v6342_v25 = vpack.i.bf16 %v7851_v58, %v7849_v24  ;;  %v3969_v1 = vld [vmem:[#allocation2 + $0x58] sm:$0xff]  ;;  %v5636_v28 = vpack.c.bf16 %v7851_v58, %v7849_v24 }
 0xb33   : > { %v6347_v3 = vpack.i.bf16 %v3969_v1, %v7834_v22 }
 0xb35   : > { %6343 = vrot.lane.b32.xlu0 %v6342_v25, %s6706_s24  ;;  %6348 = vrot.lane.b32.xlu1 %v6347_v3, %s6706_s24 }
 0xb39   : > { %6358 = vrot.lane.b32.xlu0 %v6357_v26, %s6706_s24  ;;  %6353 = vrot.lane.b32.xlu1 %v6352_v39, %s6706_s24 }
 0xb3d   : > { %6368 = vrot.lane.b32.xlu0 %v6322_v18, %s6713_s26  ;;  %6363 = vrot.lane.b32.xlu1 %v6362_v41, %s6706_s24  ;;  %v5374_v18 = vld [vmem:[%s8294_s7 + $0xb0] sm:$0xff]  ;;  %s5484_s24 = sshll.u32 %s6797_s21, 8 }
 0xb3e   : > { %s8206_s19 = scalar_lea.hbm %s8297_s10, %s5484_s24 }
 0xb41   : > { %6378 = vrot.lane.b32.xlu0 %v6327_v63, %s6713_s26  ;;  %6373 = vrot.lane.b32.xlu1 %v6332_v6, %s6713_s26 }
 0xb45   : > { %6393 = vrot.lane.b32.xlu0 %v6347_v3, %s6713_s26  ;;  %6383 = vrot.lane.b32.xlu1 %v6337_v60, %s6713_s26 }
 0xb49   : > { %6398 = vrot.lane.b32.xlu0 %v6352_v39, %s6713_s26  ;;  %6388 = vrot.lane.b32.xlu1 %v6342_v25, %s6713_s26 }
 0xb4d   : > { %6408 = vrot.lane.b32.xlu0 %v6362_v41, %s6713_s26  ;;  %6403 = vrot.lane.b32.xlu1 %v6357_v26, %s6713_s26  ;;  %s6607_s26 = scalar_lea.vmem %s8208_s13, 256 }
 0xb4e   : > { %p6608_p11 = scmp.ne.s32.totalorder %s8208_s13, %s6607_s26  ;;  %p6615_p1 = scmp.lt.s32.totalorder %s6613_s12, %s6607_s26 }
 0xb50   : > { %p6609_p12 = pnand %p6608_p11, %p6814_p5  ;;  %p6616_p2 = por %p6615_p1, %p6614_p0 }
 0xb51   : > { %4592 = vperm.xlu0 %5915, %v5437_v54   ;;  %4587 = vperm.xlu1 %5916, %v5436_v34  }
 0xb52   : > { %p6610_p13 = pneg %p6609_p12 }
 0xb54   : > { %p6617_p3 = pnand %p6616_p2, %p6610_p13 }
 0xb55   : > { %4602 = vperm.xlu0 %5915, %v5439_v56   ;;  %4597 = vperm.xlu1 %5916, %v5438_v57  }
 0xb59   : > { %4572 = vperm.xlu0 %5915, %v5433_v42   ;;  %4567 = vperm.xlu1 %5916, %v5432_v61  }
 0xb5d   : > { %4582 = vperm.xlu0 %5915, %v5435_v62   ;;  %4577 = vperm.xlu1 %5916, %v5434_v43  }
 0xb61   : > { %1502 = vperm.xlu0 %5915, %v1472_v5   ;;  %1497 = vperm.xlu1 %5916, %v1471_v40  }
 0xb65   : > { %2599 = vperm.xlu0 %5915, %v5285_v7   ;;  %2594 = vperm.xlu1 %5916, %v5284_v31  }
 0xb69   : > { %3695 = vperm.xlu0 %5915, %v5373_v8   ;;  %3690 = vperm.xlu1 %5916, %v5372_v9  }
 0xb6d   : > { %1512 = vperm.xlu0 %5915, %v1474_v11   ;;  %1507 = vperm.xlu1 %5916, %v1473_v13  }
 0xb71   : > { %2609 = vperm.xlu0 %5915, %v5287_v15   ;;  %2604 = vperm.xlu1 %5916, %v5286_v21  }
 0xb75   : > { %4726 = vperm.xlu0 %5915, %v5461_v2   ;;  %4721 = vperm.xlu1 %5916, %v5460_v16  }
 0xb79   : > { %3705 = vperm.xlu0 %5915, %v5375_v17   ;;  %3700 = vperm.xlu1 %5916, %v5374_v18  }
 0xb7d   : > { %4736 = vperm.xlu0 %5915, %v5463_v4   ;;  %4731 = vperm.xlu1 %5916, %v5462_v44  }
 0xb81   : > { %4911 = vperm.xlu0 %5915, %v4903_v50   ;;  %4906 = vperm.xlu1 %5916, %v4902_v49  }
 0xb9b   : > { %v6324_v37 = vpop.permute.xlu1 %6323 }
 0xb9c   : > { %v6326_v63 = vunpack.i.h.bf16 %v6324_v37  ;;  %v6325_v45 = vunpack.i.l.bf16 %v6324_v37 }
 0xb9e   : > { %v4036_v26 = vsel %vm747_vm3, %v6325_v45, %v6326_v63 }
 0xb9f   : > { %v6334_v6 = vpop.permute.xlu0 %6333  ;;  %v6329_v46 = vpop.permute.xlu1 %6328 }
 0xba0   : > { %v6336_v60 = vunpack.i.h.bf16 %v6334_v6  ;;  %v6335_v25 = vunpack.i.l.bf16 %v6334_v6  ;;  %v6331_v1 = vunpack.i.h.bf16 %v6329_v46  ;;  %v6330_v3 = vunpack.i.l.bf16 %v6329_v46 }
 0xba2   : > { %v4037_v30 = vsel %vm747_vm3, %v6331_v1, %v6335_v25  ;;  %v4035_v32 = vsel %vm747_vm3, %v6330_v3, %v6325_v45  ;;  %v4038_v39 = vsel %vm747_vm3, %v6335_v25, %v6336_v60  ;;  %v5392_v3 = vld [vmem:[%s8291_s4 + $0x280] sm:$0xff] }
 0xba3   : > { %v5620_v27 = vpack.c.bf16 %v4037_v30, %v4035_v32  ;;  %v6339_v36 = vpop.permute.xlu0 %6338  ;;  %v5618_v41 = vpack.c.bf16 %v4038_v39, %v4036_v26 }
 0xba4   : > { %v6341_v29 = vunpack.i.h.bf16 %v6339_v36  ;;  %v6340_v53 = vunpack.i.l.bf16 %v6339_v36 }
 0xba5   : > { %5619 = vmatprep.subr.bf16.mxu1 %v5618_v41 }
 0xba6   : > { %5621 = vmatpush1.bf16.msra.mxu1 %v5620_v27  ;;  %v4040_v62 = vsel %vm747_vm3, %v6340_v53, %v6341_v29 }
 0xba7   : > { %v6344_v55 = vpop.permute.xlu0 %6343  ;;  %v6349_v54 = vpop.permute.xlu1 %6348 }
 0xba8   : > { %v6346_v34 = vunpack.i.h.bf16 %v6344_v55  ;;  %v6345_v38 = vunpack.i.l.bf16 %v6344_v55  ;;  %v6351_v56 = vunpack.i.h.bf16 %v6349_v54  ;;  %v6350_v57 = vunpack.i.l.bf16 %v6349_v54 }
 0xbaa   : > { %v4039_v42 = vsel %vm747_vm3, %v6345_v38, %v6340_v53  ;;  %v4041_v61 = vsel %vm747_vm3, %v6346_v34, %v6350_v57  ;;  %v4042_v43 = vsel %vm747_vm3, %v6350_v57, %v6351_v56  ;;  %v5394_v57 = vld [vmem:[%s8291_s4 + $0x290] sm:$0xff] }
 0xbab   : > { %v5624_v5 = vpack.c.bf16 %v4041_v61, %v4039_v42  ;;  %v6359_v40 = vpop.permute.xlu0 %6358  ;;  %v6354_v7 = vpop.permute.xlu1 %6353  ;;  %v5622_v31 = vpack.c.bf16 %v4042_v43, %v4040_v62 }
 0xbac   : > { %v6361_v8 = vunpack.i.h.bf16 %v6359_v40  ;;  %v6360_v9 = vunpack.i.l.bf16 %v6359_v40  ;;  %v6356_v11 = vunpack.i.h.bf16 %v6354_v7  ;;  %v6355_v13 = vunpack.i.l.bf16 %v6354_v7 }
 0xbad   : > { %5623 = vmatprep.subr.bf16.mxu1 %v5622_v31 }
 0xbae   : > { %5625 = vmatpush1.bf16.msra.mxu1 %v5624_v5  ;;  %v4044_v15 = vsel %vm747_vm3, %v6355_v13, %v6356_v11  ;;  %v4046_v21 = vsel %vm747_vm3, %v6360_v9, %v6361_v8 }
 0xbaf   : > { %v6369_v2 = vpop.permute.xlu0 %6368  ;;  %v6364_v16 = vpop.permute.xlu1 %6363  ;;  %v5626_v17 = vpack.c.bf16 %v4046_v21, %v4044_v15  ;;  %v5398_v15 = vld [vmem:[%s8291_s4 + $0x2b0] sm:$0xff] }
 0xbb0   : > { %v6366_v18 = vunpack.i.h.bf16 %v6364_v16  ;;  %v6365_v4 = vunpack.i.l.bf16 %v6364_v16  ;;  %v6371_v44 = vunpack.i.h.bf16 %v6369_v2  ;;  %v6370_v50 = vunpack.i.l.bf16 %v6369_v2  ;;  %v5418_v21 = vld [vmem:[%s8291_s4 + $0x2d0] sm:$0xff]  ;;  %v5399_v2 = vld [vmem:[%s8291_s4 + $0x2b8] sm:$0xff] }
 0xbb1   : > { %5627 = vmatprep.subr.bf16.mxu1 %v5626_v17  ;;  %v5419_v16 = vld [vmem:[%s8291_s4 + $0x2d8] sm:$0xff]  ;;  %v5384_v17 = vld [vmem:[%s8291_s4 + $0x240] sm:$0xff] }
 0xbb2   : > { %v4045_v49 = vsel %vm747_vm3, %v6366_v18, %v6360_v9  ;;  %v4043_v37 = vsel %vm747_vm3, %v6365_v4, %v6355_v13  ;;  %v4380_v26 = vsel %vm4378_vm12, %v6370_v50, %v6371_v44  ;;  %v5417_v13 = vld [vmem:[%s8291_s4 + $0x2c8] sm:$0xff]  ;;  %v5420_v18 = vld [vmem:[%s8291_s4 + $0x2e0] sm:$0xff] }
 0xbb3   : > { %v5628_v63 = vpack.c.bf16 %v4045_v49, %v4043_v37  ;;  %v6379_v45 = vpop.permute.xlu0 %6378  ;;  %v6374_v6 = vpop.permute.xlu1 %6373  ;;  %v5385_v4 = vld [vmem:[%s8291_s4 + $0x248] sm:$0xff]  ;;  %v5387_v49 = vld [vmem:[%s8291_s4 + $0x258] sm:$0xff]  ;;  %v5388_v37 = vld [vmem:[%s8291_s4 + $0x260] sm:$0xff] }
 0xbb4   : > { %v6381_v46 = vunpack.i.h.bf16 %v6379_v45  ;;  %v6380_v60 = vunpack.i.l.bf16 %v6379_v45  ;;  %v6376_v25 = vunpack.i.h.bf16 %v6374_v6  ;;  %v6375_v1 = vunpack.i.l.bf16 %v6374_v6  ;;  %v5421_v44 = vld [vmem:[%s8291_s4 + $0x2e8] sm:$0xff]  ;;  %v5390_v45 = vld [vmem:[%s8291_s4 + $0x270] sm:$0xff]  ;;  %v5391_v6 = vld [vmem:[%s8291_s4 + $0x278] sm:$0xff] }
 0xbb5   : > { %5629 = vmatpush1.bf16.msra.mxu1 %v5628_v63  ;;  %v5389_v63 = vld [vmem:[%s8291_s4 + $0x268] sm:$0xff] }
 0xbb6   : > { %v4379_v30 = vsel %vm4378_vm12, %v6380_v60, %v6370_v50  ;;  %v4381_v32 = vsel %vm4378_vm12, %v6381_v46, %v6375_v1  ;;  %5631 = vmatprep.subr.bf16.mxu1 %v5630_v59  ;;  %v4382_v39 = vsel %vm4378_vm12, %v6375_v1, %v6376_v25  ;;  %v5386_v50 = vld [vmem:[%s8291_s4 + $0x250] sm:$0xff]  ;;  %v5423_v60 = vld [vmem:[%s8291_s4 + $0x2f8] sm:$0xff] }
 0xbb7   : > { %v7989_v27 = vpack.c.bf16 %v4381_v32, %v4379_v30  ;;  %v6394_v36 = vpop.permute.xlu0 %6393  ;;  %v6384_v41 = vpop.permute.xlu1 %6383  ;;  %v5642_v29 = vpack.c.bf16 %v4382_v39, %v4380_v26  ;;  %v5422_v46 = vld [vmem:[%s8291_s4 + $0x2f0] sm:$0xff] }
 0xbb8   : > { %v6396_v53 = vunpack.i.h.bf16 %v6394_v36  ;;  %v6395_v55 = vunpack.i.l.bf16 %v6394_v36  ;;  %v6386_v54 = vunpack.i.h.bf16 %v6384_v41  ;;  %v6385_v34 = vunpack.i.l.bf16 %v6384_v41  ;;  %5400 = vmatmul.mubr.msk.f32.vlgmr.msra.gmra.mrb[32].mxu1 %vm772_vm5, %v5392_v3 }
 0xbb9   : > { %5633 = vmatpush1.bf16.msra.mxu1 %v5632_v19  ;;  %5643 = vmatprep.subr.bf16.mxu0 %v5642_v29 }
 0xbba   : > { %5635 = vmatprep.subr.bf16.mxu1 %v5634_v23  ;;  %5645 = vmatpush1.bf16.msra.mxu0 %v7989_v27  ;;  %v4384_v47 = vsel %vm4378_vm12, %v6385_v34, %v6386_v54  ;;  %v4386_v59 = vsel %vm4378_vm12, %v6395_v55, %v6396_v53 }
 0xbbb   : > { %v6399_v38 = vpop.permute.xlu0 %6398  ;;  %v6389_v56 = vpop.permute.xlu1 %6388  ;;  %4153 = vmatprep.mubr.f32.mxu1 %v6703_v0  ;;  %v8005_v52 = vpack.c.bf16 %v4386_v59, %v4384_v47 }
 0xbbc   : > { %v6391_v51 = vunpack.i.h.bf16 %v6389_v56  ;;  %v6390_v19 = vunpack.i.l.bf16 %v6389_v56  ;;  %5401 = vmatmul.mubr.msk.f32.gmra.mrb[34].mxu1 %vm772_vm5, %v5393_v35  ;;  %v6401_v22 = vunpack.i.h.bf16 %v6399_v38  ;;  %v6400_v23 = vunpack.i.l.bf16 %v6399_v38 }
 0xbbd   : > { %5637 = vmatpush1.bf16.msra.mxu1 %v5636_v28  ;;  %5647 = vmatprep.subr.bf16.mxu0 %v8005_v52  ;;  %v5395_v28 = vld [vmem:[%s8291_s4 + $0x298] sm:$0xff] }
 0xbbe   : > { %v4385_v42 = vsel %vm4378_vm12, %v6391_v51, %v6395_v55  ;;  %v4383_v61 = vsel %vm4378_vm12, %v6390_v19, %v6385_v34  ;;  %5639 = vmatprep.subr.bf16.mxu1 %v5638_v48  ;;  %4159 = vmatprep.mubr.f32.mxu1 %v6703_v0  ;;  %v4388_v40 = vsel %vm4378_vm12, %v6400_v23, %v6401_v22 }
 0xbbf   : > { %v5648_v20 = vpack.c.bf16 %v4385_v42, %v4383_v61  ;;  %v6409_v33 = vpop.permute.xlu0 %6408  ;;  %v6404_v62 = vpop.permute.xlu1 %6403 }
 0xbc0   : > { %v6411_v43 = vunpack.i.h.bf16 %v6409_v33  ;;  %v6410_v5 = vunpack.i.l.bf16 %v6409_v33  ;;  %v6406_v24 = vunpack.i.h.bf16 %v6404_v62  ;;  %v6405_v58 = vunpack.i.l.bf16 %v6404_v62  ;;  %5402 = vmatmul.mubr.msk.f32.gmra.mrb[36].mxu1 %vm772_vm5, %v5394_v57 }
 0xbc1   : > { %5641 = vmatpush1.bf16.msra.mxu1 %v5640_v14  ;;  %5649 = vmatpush1.bf16.msra.mxu0 %v5648_v20  ;;  %v5397_v14 = vld [vmem:[%s8291_s4 + $0x2a8] sm:$0xff] }
 0xbc2   : > { %v4387_v7 = vsel %vm4378_vm12, %v6410_v5, %v6400_v23  ;;  %v4389_v31 = vsel %vm4378_vm12, %v6411_v43, %v6405_v58  ;;  %5670 = vmatprep.subr.bf16.mxu1 %v5642_v29  ;;  %4165 = vmatprep.mubr.f32.mxu1 %v6703_v0  ;;  %v4390_v8 = vsel %vm4378_vm12, %v6405_v58, %v6406_v24 }
 0xbc3   : > { %v5652_v9 = vpack.c.bf16 %v4389_v31, %v4387_v7  ;;  %v5650_v11 = vpack.c.bf16 %v4390_v8, %v4388_v40 }
 0xbc4   : > { %5403 = vmatmul.mubr.msk.f32.gmra.mrb[38].mxu1 %vm772_vm5, %v5395_v28 }
 0xbc5   : > { %5651 = vmatprep.subr.bf16.mxu0 %v5650_v11  ;;  %4171 = vmatprep.mubr.f32.mxu1 %v6703_v0 }
 0xbc6   : > { %5653 = vmatpush1.bf16.msra.mxu0 %v5652_v9 }
 0xbc8   : > { %5404 = vmatmul.mubr.msk.f32.gmra.mrb[40].mxu1 %vm772_vm5, %v5396_v10 }
 0xbc9   : > { %4177 = vmatprep.mubr.f32.mxu1 %v6703_v0  ;;  %5424 = vmatmul.mubr.msk.f32.vlgmr.msra.gmra.mrb[56].mxu0 %vm772_vm5, %v5416_v12 }
 0xbca   : > { %4497 = vmatprep.mubr.f32.mxu0 %v6703_v0 }
 0xbcc   : > { %5405 = vmatmul.mubr.msk.f32.gmra.mrb[42].mxu1 %vm772_vm5, %v5397_v14 }
 0xbcd   : > { %4183 = vmatprep.mubr.f32.mxu1 %v6703_v0  ;;  %5425 = vmatmul.mubr.msk.f32.gmra.mrb[58].mxu0 %vm772_vm5, %v5417_v13 }
 0xbce   : > { %4503 = vmatprep.mubr.f32.mxu0 %v6703_v0 }
 0xbd0   : > { %5406 = vmatmul.mubr.msk.f32.gmra.mrb[44].mxu1 %vm772_vm5, %v5398_v15  ;;  %v4588_v61 = vpop.permute.xlu1 %4587  ;;  %v4593_v33 = vpop.permute.xlu0 %4592 }
 0xbd1   : > { %4189 = vmatprep.mubr.f32.mxu1 %v6703_v0  ;;  %5426 = vmatmul.mubr.msk.f32.gmra.mrb[60].mxu0 %vm772_vm5, %v5418_v21 }
 0xbd2   : > { %4509 = vmatprep.mubr.f32.mxu0 %v6703_v0 }
 0xbd4   : > { %5407 = vmatmul.mubr.msk.f32.gmra.mrb[46].mxu1 %vm772_vm5, %v5399_v2  ;;  %v4598_v40 = vpop.permute.xlu1 %4597  ;;  %v4603_v10 = vpop.permute.xlu0 %4602 }
 0xbd5   : > { %4284 = vmatprep.mubr.f32.mxu1 %v6703_v0  ;;  %5427 = vmatmul.mubr.msk.f32.gmra.mrb[62].mxu0 %vm772_vm5, %v5419_v16 }
 0xbd6   : > { %4515 = vmatprep.mubr.f32.mxu0 %v6703_v0 }
 0xbd8   : > { %5408 = vmatmul.mubr.msk.f32.vlgmr.msra.gmra.mrb[32].mxu1 %vm772_vm5, %v5384_v17  ;;  %v4568_v21 = vpop.permute.xlu1 %4567  ;;  %v4573_v16 = vpop.permute.xlu0 %4572 }
 0xbd9   : > { %5673 = vmatpush1.bf16.msra.mxu1 %v7989_v27  ;;  %4290 = vmatprep.mubr.f32.mxu1 %v6703_v0 }
 0xbda   : > { %5671 = vmatprep.subr.bf16.mxu1 %v8005_v52  ;;  %5428 = vmatmul.mubr.msk.f32.gmra.mrb[64].mxu0 %vm772_vm5, %v5420_v18 }
 0xbdb   : > { %4521 = vmatprep.mubr.f32.mxu0 %v6703_v0 }
 0xbdc   : > { %5409 = vmatmul.mubr.msk.f32.gmra.mrb[34].mxu1 %vm772_vm5, %v5385_v4 }
 0xbdd   : > { %5674 = vmatpush1.bf16.msra.mxu1 %v5648_v20  ;;  %4296 = vmatprep.mubr.f32.mxu1 %v6703_v0 }
 0xbde   : > { %5672 = vmatprep.subr.bf16.mxu1 %v5650_v11  ;;  %5429 = vmatmul.mubr.msk.f32.gmra.mrb[66].mxu0 %vm772_vm5, %v5421_v44 }
 0xbdf   : > { %4827 = vmatprep.mubr.f32.mxu0 %v6703_v0 }
 0xbe0   : > { %5410 = vmatmul.mubr.msk.f32.gmra.mrb[36].mxu1 %vm772_vm5, %v5386_v50 }
 0xbe1   : > { %5675 = vmatpush1.bf16.msra.mxu1 %v5652_v9  ;;  %4302 = vmatprep.mubr.f32.mxu1 %v6703_v0 }
 0xbe4   : > { %5411 = vmatmul.mubr.msk.f32.gmra.mrb[38].mxu1 %vm772_vm5, %v5387_v49 }
 0xbe5   : > { %4308 = vmatprep.mubr.f32.mxu1 %v6703_v0 }
 0xbe8   : > { %5412 = vmatmul.mubr.msk.f32.gmra.mrb[40].mxu1 %vm772_vm5, %v5388_v37 }
 0xbe9   : > { %4314 = vmatprep.mubr.f32.mxu1 %v6703_v0 }
 0xbec   : > { %5413 = vmatmul.mubr.msk.f32.gmra.mrb[42].mxu1 %vm772_vm5, %v5389_v63 }
 0xbed   : > { %4320 = vmatprep.mubr.f32.mxu1 %v6703_v0 }
 0xbf0   : > { %5414 = vmatmul.mubr.msk.f32.gmra.mrb[44].mxu1 %vm772_vm5, %v5390_v45 }
 0xbf1   : > { %4326 = vmatprep.mubr.f32.mxu1 %v6703_v0 }
 0xbf4   : > { %5415 = vmatmul.mubr.msk.f32.gmra.mrb[46].mxu1 %vm772_vm5, %v5391_v6 }
 0xbf5   : > { %4527 = vmatprep.mubr.f32.mxu1 %v6703_v0 }
 0xbf8   : > { %5430 = vmatmul.mubr.msk.f32.vlgmr.msra.gmra.mrb[44].mxu1 %vm772_vm5, %v5422_v46 }
 0xbf9   : > { %4533 = vmatprep.mubr.f32.mxu1 %v6703_v0 }
 0xbfc   : > { %5431 = vmatmul.mubr.msk.f32.gmra.mrb[46].mxu1 %vm772_vm5, %v5423_v60 }
 0xc9c   : > { %v4493_v25 = vpop.f32.mrb[56].mxu0 }
 0xc9d   : > { %v4495_v1 = vpop.f32.mrb[57].mxu0 }
 0xca0   : > { %v4499_v3 = vpop.f32.mrb[58].mxu0 }
 0xca1   : > { %v4501_v30 = vpop.f32.mrb[59].mxu0 }
 0xca4   : > { %v4505_v32 = vpop.f32.mrb[60].mxu0 }
 0xca5   : > { %v4507_v26 = vpop.f32.mrb[61].mxu0 }
 0xca8   : > { %v4511_v39 = vpop.f32.mrb[62].mxu0 }
 0xca9   : > { %v4513_v27 = vpop.f32.mrb[63].mxu0 }
 0xcab   : > { %v4286_v36 = vpop.f32.mrb[32].mxu1 }
 0xcac   : > { %v5708_v41 = vadd.f32 %v4493_v25, %v4286_v36  ;;  %v4288_v29 = vpop.f32.mrb[33].mxu1 }
 0xcad   : > { %v5709_v53 = vadd.f32 %v4495_v1, %v4288_v29  ;;  %v4517_v55 = vpop.f32.mrb[64].mxu0 }
 0xcae   : > { %v4519_v54 = vpop.f32.mrb[65].mxu0  ;;  %v4605_v2 = vadd.f32 %v5708_v41, %v4568_v21 }
 0xcaf   : > { %v4292_v34 = vpop.f32.mrb[34].mxu1  ;;  %v4606_v17 = vadd.f32 %v5709_v53, %v4568_v21 }
 0xcb0   : > { %v5710_v35 = vadd.f32 %v4499_v3, %v4292_v34  ;;  %v4294_v47 = vpop.f32.mrb[35].mxu1  ;;  %v4578_v34 = vpop.permute.xlu1 %4577 }
 0xcb1   : > { %v5711_v59 = vadd.f32 %v4501_v30, %v4294_v47  ;;  %v4523_v38 = vpop.f32.mrb[66].mxu0 }
 0xcb2   : > { %v4525_v56 = vpop.f32.mrb[67].mxu0  ;;  %v4607_v18 = vadd.f32 %v5710_v35, %v4573_v16 }
 0xcb3   : > { %v4298_v52 = vpop.f32.mrb[36].mxu1  ;;  %v4608_v4 = vadd.f32 %v5711_v59, %v4573_v16 }
 0xcb4   : > { %v8135_v51 = vadd.f32 %v4505_v32, %v4298_v52  ;;  %v4300_v19 = vpop.f32.mrb[37].mxu1 }
 0xcb5   : > { %v8137_v48 = vadd.f32 %v4507_v26, %v4300_v19 }
 0xcb6   : > { %v4609_v47 = vadd.f32 %v8135_v51, %v4578_v34 }
 0xcb7   : > { %v4304_v22 = vpop.f32.mrb[38].mxu1 }
 0xcb8   : > { %v8139_v23 = vadd.f32 %v4511_v39, %v4304_v22  ;;  %v4306_v57 = vpop.f32.mrb[39].mxu1  ;;  %v4583_v22 = vpop.permute.xlu0 %4582 }
 0xcb9   : > { %v8141_v42 = vadd.f32 %v4513_v27, %v4306_v57 }
 0xcbb   : > { %v4310_v20 = vpop.f32.mrb[40].mxu1 }
 0xcbc   : > { %v5716_v62 = vadd.f32 %v4517_v55, %v4310_v20  ;;  %v4312_v43 = vpop.f32.mrb[41].mxu1  ;;  %v4611_v20 = vadd.f32 %v8139_v23, %v4583_v22 }
 0xcbd   : > { %v5717_v5 = vadd.f32 %v4519_v54, %v4312_v43  ;;  %v4612_v43 = vadd.f32 %v8141_v42, %v4583_v22 }
 0xcbe   : > { %v4613_v24 = vadd.f32 %v5716_v62, %v4588_v61 }
 0xcbf   : > { %v4614_v58 = vadd.f32 %v5717_v5, %v4588_v61  ;;  %v4316_v28 = vpop.f32.mrb[42].mxu1 }
 0xcc0   : > { %v5440_v7 = vmul.f32 -1.442695, %v4613_v24  ;;  %v5718_v31 = vadd.f32 %v4523_v38, %v4316_v28  ;;  %v4318_v8 = vpop.f32.mrb[43].mxu1  ;;  %v4610_v38 = vadd.f32 %v8137_v48, %v4578_v34 }
 0xcc1   : > { %v5441_v9 = vmul.f32 -1.442695, %v4614_v58  ;;  %v5719_v11 = vadd.f32 %v4525_v56, %v4318_v8 }
 0xcc2   : > { %6556 = vpow2.f32 %v5440_v7  ;;  %v4615_v12 = vadd.f32 %v5718_v31, %v4593_v33 }
 0xcc3   : > { %6558 = vpow2.f32 %v5441_v9  ;;  %v4616_v14 = vadd.f32 %v5719_v11, %v4593_v33 }
 0xcc4   : > { %v5442_v13 = vmul.f32 -1.442695, %v4615_v12 }
 0xcc5   : > { %v5443_v15 = vmul.f32 -1.442695, %v4616_v14 }
 0xcc6   : > { %6560 = vpow2.f32 %v5442_v13 }
 0xcc7   : > { %6562 = vpow2.f32 %v5443_v15 }
 0xcc8   : > { %6564 = vtanh.f32 %v4605_v2 }
 0xcc9   : > { %6566 = vtanh.f32 %v4606_v17 }
 0xcca   : > { %6568 = vtanh.f32 %v4607_v18 }
 0xccb   : > { %v4529_v44 = vpop.f32.mrb[44].mxu1  ;;  %6570 = vtanh.f32 %v4608_v4  ;;  %v5448_v4 = vld [vmem:[%s8293_s6 + $0xc0] sm:$0xff] }
 0xccc   : > { %v6557_v50 = vpop.eup %6556  ;;  %v4617_v49 = vadd.f32 %v4598_v40, %v4529_v44  ;;  %v4531_v37 = vpop.f32.mrb[45].mxu1  ;;  %v5449_v44 = vld [vmem:[%s8293_s6 + $0xc8] sm:$0xff] }
 0xccd   : > { %v6559_v63 = vpop.eup %6558  ;;  %v4653_v45 = vadd.f32 1.0, %v6557_v50  ;;  %v4618_v6 = vadd.f32 %v4598_v40, %v4531_v37  ;;  %v5450_v50 = vld [vmem:[%s8293_s6 + $0xd0] sm:$0xff]  ;;  %v5452_v37 = vld [vmem:[%s8293_s6 + $0xe0] sm:$0xff] }
 0xcce   : > { %v4654_v46 = vadd.f32 1.0, %v6559_v63  ;;  %v5444_v60 = vmul.f32 -1.442695, %v4617_v49  ;;  %v5451_v49 = vld [vmem:[%s8293_s6 + $0xd8] sm:$0xff]  ;;  %v5453_v63 = vld [vmem:[%s8293_s6 + $0xe8] sm:$0xff] }
 0xccf   : > { %6572 = vrcp.f32 %v4653_v45  ;;  %v5445_v25 = vmul.f32 -1.442695, %v4618_v6  ;;  %v4535_v1 = vpop.f32.mrb[46].mxu1  ;;  %v5454_v45 = vld [vmem:[%s8293_s6 + $0xf0] sm:$0xff]  ;;  %v5455_v6 = vld [vmem:[%s8293_s6 + $0xf8] sm:$0xff] }
 0xcd0   : > { %v6561_v3 = vpop.eup %6560  ;;  %6574 = vrcp.f32 %v4654_v46  ;;  %v4619_v30 = vadd.f32 %v4603_v10, %v4535_v1  ;;  %v4537_v32 = vpop.f32.mrb[47].mxu1 }
 0xcd1   : > { %v6563_v26 = vpop.eup %6562  ;;  %v4655_v39 = vadd.f32 1.0, %v6561_v3  ;;  %6576 = vpow2.f32 %v5444_v60  ;;  %v4620_v27 = vadd.f32 %v4603_v10, %v4537_v32  ;;  %v1503_v46 = vpop.permute.xlu0 %1502 }
 0xcd2   : > { %v4656_v36 = vadd.f32 1.0, %v6563_v26  ;;  %6578 = vpow2.f32 %v5445_v25  ;;  %v5446_v41 = vmul.f32 -1.442695, %v4619_v30  ;;  %v6565_v53 = vpop.eup %6564  ;;  %v1498_v60 = vpop.permute.xlu1 %1497 }
 0xcd3   : > { %6580 = vrcp.f32 %v4655_v39  ;;  %v5447_v29 = vmul.f32 -1.442695, %v4620_v27  ;;  %v6567_v55 = vpop.eup %6566 }
 0xcd4   : > { %6582 = vrcp.f32 %v4656_v36  ;;  %v6569_v54 = vpop.eup %6568 }
 0xcd5   : > { %6584 = vpow2.f32 %v5446_v41  ;;  %v6571_v35 = vpop.eup %6570  ;;  %v2600_v25 = vpop.permute.xlu0 %2599 }
 0xcd6   : > { %6586 = vpow2.f32 %v5447_v29  ;;  %v2595_v1 = vpop.permute.xlu1 %2594 }
 0xcd7   : > { %6588 = vtanh.f32 %v4609_v47 }
 0xcd8   : > { %6590 = vtanh.f32 %v4610_v38  ;;  %v5684_v38 = vadd.f32 %v2600_v25, %v1503_v46 }
 0xcd9   : > { %v6573_v59 = vpop.eup %6572  ;;  %v3696_v3 = vpop.permute.xlu0 %3695 }
 0xcda   : > { %v6575_v56 = vpop.eup %6574  ;;  %v4677_v52 = vmul.f32 %v6573_v59, %v6565_v53  ;;  %v3691_v30 = vpop.permute.xlu1 %3690 }
 0xcdb   : > { %v6577_v19 = vpop.eup %6576  ;;  %v4678_v57 = vmul.f32 %v6575_v56, %v6567_v55  ;;  %v5676_v56 = vadd.f32 %v2595_v1, %v1498_v60 }
 0xcdc   : > { %v6579_v61 = vpop.eup %6578  ;;  %v4657_v33 = vadd.f32 1.0, %v6577_v19  ;;  %v5685_v19 = vadd.f32 %v5684_v38, %v3696_v3 }
 0xcdd   : > { %v6581_v62 = vpop.eup %6580  ;;  %v4658_v5 = vadd.f32 1.0, %v6579_v61  ;;  %v1513_v32 = vpop.permute.xlu0 %1512  ;;  %v5677_v22 = vadd.f32 %v5676_v56, %v3691_v30 }
 0xcde   : > { %v6583_v24 = vpop.eup %6582  ;;  %6592 = vrcp.f32 %v4657_v33  ;;  %v4679_v51 = vmul.f32 %v6581_v62, %v6569_v54  ;;  %v1508_v26 = vpop.permute.xlu1 %1507 }
 0xcdf   : > { %v6585_v58 = vpop.eup %6584  ;;  %6594 = vrcp.f32 %v4658_v5  ;;  %v4680_v48 = vmul.f32 %v6583_v24, %v6571_v35 }
 0xce0   : > { %v6587_v28 = vpop.eup %6586  ;;  %6596 = vtanh.f32 %v4611_v20  ;;  %v4659_v40 = vadd.f32 1.0, %v6585_v58  ;;  %v5656_v7 = vpack.c.bf16 %v4679_v51, %v4677_v52 }
 0xce1   : > { %6598 = vtanh.f32 %v4612_v43  ;;  %v4660_v31 = vadd.f32 1.0, %v6587_v28  ;;  %v5654_v8 = vpack.c.bf16 %v4680_v48, %v4678_v57  ;;  %v6589_v23 = vpop.eup %6588  ;;  %v2610_v41 = vpop.permute.xlu0 %2609 }
 0xce2   : > { %6600 = vrcp.f32 %v4659_v40  ;;  %v6591_v42 = vpop.eup %6590  ;;  %v2605_v53 = vpop.permute.xlu1 %2604  ;;  %v5700_v28 = vadd.f32 %v2610_v41, %v1513_v32 }
 0xce3   : > { %6602 = vrcp.f32 %v4660_v31  ;;  %5655 = vmatprep.subr.bf16.mxu0 %v5654_v8  ;;  %v5692_v40 = vadd.f32 %v2605_v53, %v1508_v26 }
 0xce4   : > { %5657 = vmatpush1.bf16.msra.mxu0 %v5656_v7 }
 0xce5   : > { %v4727_v34 = vpop.permute.xlu0 %4726 }
 0xce6   : > { %v4722_v35 = vpop.permute.xlu1 %4721  ;;  %v5686_v33 = vadd.f32 %v5685_v19, %v4727_v34 }
 0xce7   : > { %v5678_v62 = vadd.f32 %v5677_v22, %v4722_v35 }
 0xce8   : > { %v6593_v9 = vpop.eup %6592 }
 0xce9   : > { %v6595_v11 = vpop.eup %6594  ;;  %v4681_v10 = vmul.f32 %v6593_v9, %v6589_v23  ;;  %v3706_v57 = vpop.permute.xlu0 %3705 }
 0xcea   : > { %v6597_v12 = vpop.eup %6596  ;;  %v4682_v14 = vmul.f32 %v6595_v11, %v6591_v42  ;;  %v3701_v20 = vpop.permute.xlu1 %3700  ;;  %v5701_v9 = vadd.f32 %v5700_v28, %v3706_v57 }
 0xceb   : > { %v6599_v13 = vpop.eup %6598  ;;  %v5693_v11 = vadd.f32 %v5692_v40, %v3701_v20 }
 0xcec   : > { %v6601_v15 = vpop.eup %6600 }
 0xced   : > { %v6603_v21 = vpop.eup %6602  ;;  %v4683_v2 = vmul.f32 %v6601_v15, %v6597_v12  ;;  %v4737_v7 = vpop.permute.xlu0 %4736 }
 0xcee   : > { %v4684_v16 = vmul.f32 %v6603_v21, %v6599_v13  ;;  %v4732_v8 = vpop.permute.xlu1 %4731  ;;  %v5702_v12 = vadd.f32 %v5701_v9, %v4737_v7 }
 0xcef   : > { %v5660_v17 = vpack.c.bf16 %v4683_v2, %v4681_v10 }
 0xcf0   : > { %v5658_v18 = vpack.c.bf16 %v4684_v16, %v4682_v14  ;;  %v5694_v14 = vadd.f32 %v5693_v11, %v4732_v8 }
 0xcf2   : > { %5659 = vmatprep.subr.bf16.mxu0 %v5658_v18 }
 0xcf3   : > { %5661 = vmatpush1.bf16.msra.mxu0 %v5660_v17 }
 0xcf6   : > { %5464 = vmatmul.mubr.msk.f32.vlgmr.msra.gmra.mrb[68].mxu0 %vm1515_vm7, %v5448_v4 }
 0xcf7   : > { %4831 = vmatprep.mubr.f32.mxu0 %v6703_v0 }
 0xcfa   : > { %5465 = vmatmul.mubr.msk.f32.gmra.mrb[70].mxu0 %vm1515_vm7, %v5449_v44  ;;  %v4892_v44 = vld [vmem:[%s8295_s8] sm:$0xff] }
 0xcfb   : > { %4835 = vmatprep.mubr.f32.mxu0 %v6703_v0 }
 0xcfe   : > { %5466 = vmatmul.mubr.msk.f32.gmra.mrb[72].mxu0 %vm1515_vm7, %v5450_v50  ;;  %v4893_v50 = vld [vmem:[%s8295_s8 + $0x8] sm:$0xff] }
 0xcff   : > { %4839 = vmatprep.mubr.f32.mxu0 %v6703_v0 }
 0xd02   : > { %5467 = vmatmul.mubr.msk.f32.gmra.mrb[74].mxu0 %vm1515_vm7, %v5451_v49  ;;  %v4907_v49 = vpop.permute.xlu1 %4906 }
 0xd03   : > { %4843 = vmatprep.mubr.f32.mxu0 %v6703_v0 }
 0xd06   : > { %5468 = vmatmul.mubr.msk.f32.gmra.mrb[16].mxu0 %vm1515_vm7, %v5452_v37 }
 0xd07   : > { %4849 = vmatprep.mubr.f32.mxu0 %v6703_v0 }
 0xd0a   : > { %5469 = vmatmul.mubr.msk.f32.gmra.mrb[18].mxu0 %vm1515_vm7, %v5453_v63 }
 0xd0b   : > { %4855 = vmatprep.mubr.f32.mxu0 %v6703_v0 }
 0xd0e   : > { %5470 = vmatmul.mubr.msk.f32.gmra.mrb[20].mxu0 %vm1515_vm7, %v5454_v45 }
 0xd0f   : > { %4861 = vmatprep.mubr.f32.mxu0 %v6703_v0 }
 0xd12   : > { %5471 = vmatmul.mubr.msk.f32.gmra.mrb[22].mxu0 %vm1515_vm7, %v5455_v6  ;;  %v4912_v6 = vpop.permute.xlu0 %4911 }
 0xd13   : > { %4984 = vmatprep.mubr.f32.mxu0 %v6703_v0 }
 0xdc9   : > { %v4829_v39 = vpop.f32.mrb[68].mxu0 }
 0xdca   : > { %v4830_v27 = vpop.f32.mrb[69].mxu0 }
 0xdcd   : > { %v4833_v36 = vpop.f32.mrb[70].mxu0 }
 0xdce   : > { %v4834_v29 = vpop.f32.mrb[71].mxu0 }
 0xdd1   : > { %v4837_v55 = vpop.f32.mrb[72].mxu0 }
 0xdd2   : > { %v4838_v54 = vpop.f32.mrb[73].mxu0 }
 0xdd5   : > { %v4841_v47 = vpop.f32.mrb[74].mxu0 }
 0xdd6   : > { %v4842_v59 = vpop.f32.mrb[75].mxu0 }
 0xdd9   : > { %v4845_v52 = vpop.f32.mrb[16].mxu0 }
 0xdda   : > { %v4847_v61 = vpop.f32.mrb[17].mxu0  ;;  %v5679_v5 = vadd.f32 %v5678_v62, %v4845_v52 }
 0xddb   : > { %v5683_v58 = vadd.f32 %v5678_v62, %v4847_v61 }
 0xddd   : > { %v4851_v43 = vpop.f32.mrb[18].mxu0 }
 0xdde   : > { %v5687_v24 = vadd.f32 %v5686_v33, %v4851_v43  ;;  %v4853_v51 = vpop.f32.mrb[19].mxu0 }
 0xddf   : > { %v5691_v48 = vadd.f32 %v5686_v33, %v4853_v51 }
 0xde0   : > { %v5664_v31 = vpack.c.bf16 %v5687_v24, %v5679_v5 }
 0xde1   : > { %v5662_v23 = vpack.c.bf16 %v5691_v48, %v5683_v58  ;;  %v4857_v42 = vpop.f32.mrb[20].mxu0 }
 0xde2   : > { %v4859_v10 = vpop.f32.mrb[21].mxu0  ;;  %v5695_v15 = vadd.f32 %v5694_v14, %v4857_v42 }
 0xde3   : > { %5663 = vmatprep.subr.bf16.mxu0 %v5662_v23  ;;  %v5699_v16 = vadd.f32 %v5694_v14, %v4859_v10 }
 0xde4   : > { %5665 = vmatpush1.bf16.msra.mxu0 %v5664_v31 }
 0xde5   : > { %v4863_v13 = vpop.f32.mrb[22].mxu0 }
 0xde6   : > { %v5703_v21 = vadd.f32 %v5702_v12, %v4863_v13  ;;  %v4865_v2 = vpop.f32.mrb[23].mxu0 }
 0xde7   : > { %v5707_v17 = vadd.f32 %v5702_v12, %v4865_v2 }
 0xde8   : > { %v5668_v18 = vpack.c.bf16 %v5703_v21, %v5695_v15 }
 0xde9   : > { %v5666_v4 = vpack.c.bf16 %v5707_v17, %v5699_v16 }
 0xdeb   : > { %5667 = vmatprep.subr.bf16.mxu0 %v5666_v4 }
 0xdec   : > { %5669 = vmatpush1.bf16.msra.mxu0 %v5668_v18 }
 0xdef   : > { %5472 = vmatmul.mubr.msk.f32.vlgmr.msra.gmra.mrb[76].mxu0 %vm1515_vm7, %v4892_v44 }
 0xdf0   : > { %4990 = vmatprep.mubr.f32.mxu0 %v6703_v0 }
 0xdf3   : > { %5473 = vmatmul.mubr.msk.f32.gmra.mrb[78].mxu0 %vm1515_vm7, %v4893_v50 }
 0xec2   : > { %v4986_v37 = vpop.f32.mrb[76].mxu0 }
 0xec3   : > { %v4987_v63 = vadd.f32 %v4986_v37, %v4907_v49  ;;  %v4988_v45 = vpop.f32.mrb[77].mxu0 }
 0xec4   : > { %v4989_v0 = vadd.f32 %v4988_v45, %v4907_v49 }
 0xec5   : > { %4997 = vst [vmem:[%s398_s30] sm:$0xff] %v4987_v63 }
 0xec6   : > { %4998 = vst [vmem:[%s398_s30 + $0x8] sm:$0xff] %v4989_v0  ;;  %v4992_v46 = vpop.f32.mrb[78].mxu0 }
 0xec7   : > { %v4993_v60 = vadd.f32 %v4992_v46, %v4912_v6  ;;  %v4994_v25 = vpop.f32.mrb[79].mxu0 }
 0xec8   : > { %6620 = shalt.err (!%p6617_p3)
}
 0xec9   : > { %s6621_s29 = scalar_lea.hbm %s8206_s19, 256  ;;  %s6625_s16 = scalar_lea.hbm %s8297_s10, 512 }
 0xeca   : > { %p6622_p4 = scmp.ne.s32.totalorder %s8206_s19, %s6621_s29  ;;  %p6626_p9 = scmp.lt.u32.totalorder %s8206_s19, %s8297_s10 }
 0xecb   : > { %p6627_p10 = scmp.lt.u32.totalorder %s6625_s16, %s6621_s29  ;;  %p6629_p12 = scmp.lt.u32.totalorder %s6621_s29, %s8206_s19 }
 0xecc   : > { %p6623_p7 = pnand %p6622_p4, %p6814_p5 }
 0xecd   : > { %p6628_p11 = por %p6627_p10, %p6626_p9 }
 0xece   : > { %p6624_p8 = pneg %p6623_p7 }
 0xecf   : > { %p6630_p13 = por %p6629_p12, %p6628_p11 }
 0xed1   : > { %p6631_p0 = pnand %p6630_p13, %p6624_p8 }
 0xed3   : > { %6634 = shalt.err (!%p6631_p0)
}
 0xed4   : > { %5860 = dma.vmem_to_hbm [thread:$0]  (%p6814_p5), %s8208_s13, 256, %s8206_s19, %s5002_s15   ;;  %v4995_v1 = vadd.f32 %v4994_v25, %v4912_v6  ;;  %4999 = vst [vmem:[%s8210_s23] sm:$0xff] %v4993_v60 }
 0xed5   : > { %s8240_s12 = scalar_lea.hbm %s8298_s11, %s5484_s24  ;;  %s8309_s29 = sshll.u32 %s8210_s23, 4  ;;  %s8244_s29 = int_to_ptr.vmem [resolvable:$true] %s8309_s29 }
 0xed6   : > { %5000 = vst [vmem:[%s8210_s23 + $0x8] sm:$0xff] %v4995_v1  ;;  %s5007_s30 = scalar_lea.sflag [#allocation7], %s8197_s25  ;;  %s6635_s14 = scalar_lea.vmem %s8244_s29, 256 }
 0xed7   : > { %p6636_p1 = scmp.ne.s32.totalorder %s8244_s29, %s6635_s14  ;;  %s6715_s21 = smov [#allocation6]  }
 0xed8   : > { %s6639_s13 = sshll.u32 %s6715_s21, 4  ;;  %s6640_s13 = int_to_ptr.vmem [resolvable:$false] %s6639_s13 }
 0xed9   : > { %p6637_p2 = pnand %p6636_p1, %p6814_p5  ;;  %s6641_s19 = scalar_lea.vmem %s6640_s13, 512 }
 0xeda   : > { %p6642_p4 = scmp.lt.s32.totalorder %s8244_s29, %s6640_s13  ;;  %p6643_p7 = scmp.lt.s32.totalorder %s6641_s19, %s6635_s14 }
 0xedb   : > { %p6638_p3 = pneg %p6637_p2 }
 0xedc   : > { %p6644_p8 = por %p6643_p7, %p6642_p4 }
 0xede   : > { %p6645_p9 = pnand %p6644_p8, %p6638_p3 }
 0xee0   : > { %6648 = shalt.err (!%p6645_p9)
}
 0xee1   : > { %s6649_s25 = scalar_lea.hbm %s8240_s12, 256  ;;  %s6653_s15 = scalar_lea.hbm %s8298_s11, 512 }
 0xee2   : > { %p6650_p10 = scmp.ne.s32.totalorder %s8240_s12, %s6649_s25  ;;  %p6654_p13 = scmp.lt.u32.totalorder %s8240_s12, %s8298_s11 }
 0xee3   : > { %p6655_p0 = scmp.lt.u32.totalorder %s6653_s15, %s6649_s25  ;;  %p6657_p2 = scmp.lt.u32.totalorder %s6649_s25, %s8240_s12 }
 0xee4   : > { %p6651_p11 = pnand %p6650_p10, %p6814_p5 }
 0xee5   : > { %p6656_p1 = por %p6655_p0, %p6654_p13 }
 0xee6   : > { %p6652_p12 = pneg %p6651_p11 }
 0xee7   : > { %p6658_p3 = por %p6657_p2, %p6656_p1 }
 0xee9   : > { %p6659_p4 = pnand %p6658_p3, %p6652_p12 }
 0xeeb   : > { %6662 = shalt.err (!%p6659_p4)
}
 0xeec   : > { %5861 = dma.vmem_to_hbm [thread:$0]  (%p6814_p5), %s8244_s29, 256, %s8240_s12, %s5007_s30  }
 0xeed PF: > { %p5871_p7 = scmp.ge.s32.totalorder %s6701_s20, 2  ;;  %s5047_s26 = sand.u32 1, %s6689_s17  }
 0xeee   : > { %s5048_s14 = scalar_lea.sflag [#allocation5], %s5047_s26 }
 0xeef   : > { %p5865_p8 = pnand %p5871_p7, %p6818_p6 }
 0xef1   : > { %6680 = dma.done.wait (!%p5865_p8), %s5048_s14, 256  }
 0xef2   : > { %6682 = vsyncadd (!%p5865_p8), %s5048_s14, 4294967040  ;;  %s5057_s21 = scalar_lea.sflag [#allocation7], %s5047_s26 }
 0xef3   : > { %6684 = dma.done.wait (!%p5865_p8), %s5057_s21, 256  }
 0xef4   : > { %6686 = vsyncadd (!%p5865_p8), %s5057_s21, 4294967040  ;;  %s8311_s20 = sld [smem:[#allocation11_spill]]  ;;  %s8312_s27 = sld [smem:[#allocation10_spill]] }
 0xef5   : > { %s8313_s19 = sld [smem:[#allocation12_spill]]  ;;  %s8314_s17 = smov %s6693_s18 }
 0xefa   : > { %p25_p5 = scmp.ge.s32.totalorder %s8311_s20, 4   ;;  %s8315_s18 = smov %s8312_s27 }
 0xefc   :  { %27 = sbr.rel (!%p25_p5) target bundleno = 5 (0x5), region = 135 }
 0xf03   :  { %5062 = vsyncpa [#allocation5], 1 }
 0xf04   :  { %5064 = vsyncpa [#allocation5 + $0x1], 1 }
 0xf05   :  { %5065 = vsyncpa [#allocation7], 1 }
 0xf06   :  { %5067 = vsyncpa [#allocation7 + $0x1], 1 }

</bundles_post_ra>
